<compile_context>
chip_gen: v6e
topology: v6e:2x2x1
jax: 0.10.0
libtpu: 0.0.40
codegen_flags: <defaults>
</compile_context>

<pallas_src>
import jax
import jax.numpy as jnp
from jax.experimental import pallas as pl
from jax.experimental.pallas import tpu as pltpu

N = 2                 # batch
CIN = 3               # input channels (image)
H = W = 16            # spatial
COUT = 64             # conv output channels
KH = KW = 3           # conv kernel
H2, W2 = H // 2, W // 2
FEAT = COUT * H2 * W2          # 64 * 8 * 8 = 4096 -> matches nn.Linear(4096, 1)
ROWS = N * H * W               # 512 rows: batch merged into matmul M dimension


# ---------------- fused Pallas kernel (entire forward pass) ----------------

def fused_net_kernel(xpad_ref, wmat_ref, cb_ref, fcw_ref, fcb_ref, o_ref,
                     conv_scr):
    # xpad_ref: (N, H+2, W+2, CIN) f32 padded NHWC input
    # wmat_ref: (KH*KW, CIN, COUT) bf16 conv taps
    # cb_ref  : (1, COUT) f32 conv bias
    # fcw_ref : (1, H2, W2, COUT) f32 FC weight, pre-permuted to NHWC order
    # fcb_ref : (1, 1) f32 FC bias
    # o_ref   : (N, 1) f32 output
    # conv_scr: (ROWS, COUT) f32 VMEM scratch holding the ReLU'd conv map

    # --- conv 3x3 (pad=1): 9 shifted matmuls, batch merged into M=512 ---
    acc = jnp.zeros((ROWS, COUT), jnp.float32)
    for kh in range(KH):
        for kw in range(KW):
            xs = xpad_ref[:, kh:kh + H, kw:kw + W, :]            # (N, H, W, CIN)
            xs = xs.reshape(ROWS, CIN).astype(jnp.bfloat16)       # bf16 MXU operand
            acc = acc + jnp.dot(xs, wmat_ref[kh * KW + kw],
                                preferred_element_type=jnp.float32)

    # --- bias + ReLU (f32 epilogue), park in VMEM scratch ---
    conv_scr[...] = jnp.maximum(acc + cb_ref[...], 0.0)           # rows = (n, h, w)

    # --- 2x2 max-pool ---
    # W-pairs: stride-2 reads along the sublane (row) dim.
    we = conv_scr[pl.ds(0, N * H * W2, 2), :]                     # (256, 64) w even
    wo = conv_scr[pl.ds(1, N * H * W2, 2), :]                     # (256, 64) w odd
    wmax = jnp.maximum(we, wo)                                    # rows = (n, h, w2)
    # H-pairs: layout-free reshape (splits at 8-row boundaries), static major split.
    wv = wmax.reshape(N * H2, 2, W2, COUT)                        # (16, 2, 8, 64)
    pooled = jnp.maximum(wv[:, 0, :, :], wv[:, 1, :, :])          # (16, 8, 64)
    pooled = pooled.reshape(N, H2, W2, COUT)                      # (2, 8, 8, 64)

    # --- FC head: VPU multiply + staged reductions (weight already permuted) ---
    prod = pooled * fcw_ref[...]                                  # (N, 8, 8, 64)
    s = jnp.sum(prod, axis=-1, keepdims=True)                     # (N, 8, 8, 1)
    s = jnp.sum(s, axis=2, keepdims=True)                         # (N, 8, 1, 1)
    s = jnp.sum(s, axis=1, keepdims=True)                         # (N, 1, 1, 1)
    o_ref[...] = (s.reshape(N, 1) + fcb_ref[...]).astype(o_ref.dtype)


def fused_forward(xpad, wmat_bf16, conv_b, fcw_nhwc, fc_b):
    return pl.pallas_call(
        fused_net_kernel,
        out_shape=jax.ShapeDtypeStruct((N, 1), jnp.float32),
        grid=(1,),
        in_specs=[
            pl.BlockSpec((N, H + 2, W + 2, CIN), lambda i: (0, 0, 0, 0)),
            pl.BlockSpec((KH * KW, CIN, COUT), lambda i: (0, 0, 0)),
            pl.BlockSpec((1, COUT), lambda i: (0, 0)),
            pl.BlockSpec((1, H2, W2, COUT), lambda i: (0, 0, 0, 0)),
            pl.BlockSpec((1, 1), lambda i: (0, 0)),
        ],
        out_specs=pl.BlockSpec((N, 1), lambda i: (0, 0)),
        scratch_shapes=[pltpu.VMEM((ROWS, COUT), jnp.float32)],
        compiler_params=pltpu.CompilerParams(
            dimension_semantics=("arbitrary",)),
    )(xpad, wmat_bf16, conv_b, fcw_nhwc, fc_b)


# ---------------- plain-JAX glue (tiny, one-time per call) ----------------

def init_params(key):
    k1, k2, k3, k4 = jax.random.split(key, 4)
    return dict(
        conv_w=jax.random.normal(k1, (KH, KW, CIN, COUT), jnp.float32) * 0.05,
        conv_b=jax.random.normal(k2, (1, COUT), jnp.float32) * 0.05,
        fc_w=jax.random.normal(k3, (FEAT, 1), jnp.float32) * 0.01,
        fc_b=jax.random.normal(k4, (1, 1), jnp.float32) * 0.01,
    )


@jax.jit
def net_forward(x_nchw, params):
    # NCHW -> NHWC + spatial pad=1 (6 KB of data; the only pre-kernel tensor ops)
    x_nhwc = jnp.transpose(x_nchw, (0, 2, 3, 1))                      # (N,16,16,3)
    xpad = jnp.pad(x_nhwc, ((0, 0), (1, 1), (1, 1), (0, 0)))          # (N,18,18,3)
    # conv taps as (9, CIN, COUT), bf16 for the MXU (accumulation stays f32)
    wmat = params["conv_w"].reshape(KH * KW, CIN, COUT).astype(jnp.bfloat16)
    # Fold torch's NCHW flatten into the FC weight: fcw[h,w,c] = fc_w[c*H2*W2+h*W2+w]
    fcw = jnp.transpose(params["fc_w"].reshape(COUT, H2, W2), (1, 2, 0))
    fcw = fcw.reshape(1, H2, W2, COUT)
    return fused_forward(xpad, wmat, params["conv_b"], fcw, params["fc_b"])


if __name__ == "__main__":
    key = jax.random.PRNGKey(0)
    pkey, xkey = jax.random.split(key)
    params = init_params(pkey)
    x = jax.random.normal(xkey, (N, CIN, H, W), jnp.float32)   # PyTorch-style NCHW
    out = net_forward(x, params)
    out = jax.block_until_ready(out)
    assert out.shape == (N, 1) and out.dtype == jnp.float32
    print("KERNEL_OK")
</pallas_src>

<mosaic_0001>
module attributes {stable_mosaic.version = 11 : i64} {
  func.func @fused_net_kernel(%arg0: i32, %arg1: memref<2x18x18x3xf32, #tpu.memory_space<vmem>>, %arg2: memref<9x3x64xbf16, #tpu.memory_space<vmem>>, %arg3: memref<1x64xf32, #tpu.memory_space<vmem>>, %arg4: memref<1x8x8x64xf32, #tpu.memory_space<vmem>>, %arg5: memref<1x1xf32, #tpu.memory_space<vmem>>, %arg6: memref<2x1xf32, #tpu.memory_space<vmem>>, %arg7: memref<512x64xf32, #tpu.memory_space<vmem>>) attributes {dimension_semantics = [#tpu.dimension_semantics<arbitrary>], iteration_bounds = array<i64: 1>, scalar_prefetch = 0 : i64, scratch_operands = 1 : i64, tpu.core_type = #tpu.core_type<tc>, window_params = [{pipeline_mode = #tpu.pipeline_mode<synchronous>, transform_indices = @transform_0, window_bounds = array<i64: 2, 18, 18, 3>}, {pipeline_mode = #tpu.pipeline_mode<synchronous>, transform_indices = @transform_1, window_bounds = array<i64: 9, 3, 64>}, {pipeline_mode = #tpu.pipeline_mode<synchronous>, transform_indices = @transform_2, window_bounds = array<i64: 1, 64>}, {pipeline_mode = #tpu.pipeline_mode<synchronous>, transform_indices = @transform_3, window_bounds = array<i64: 1, 8, 8, 64>}, {pipeline_mode = #tpu.pipeline_mode<synchronous>, transform_indices = @transform_4, window_bounds = array<i64: 1, 1>}, {pipeline_mode = #tpu.pipeline_mode<synchronous>, transform_indices = @transform_5, window_bounds = array<i64: 2, 1>}]} {
    %cst = arith.constant 0.000000e+00 : f32
    %0 = vector.broadcast %cst : f32 to vector<512x64xf32>
    %c0 = arith.constant 0 : index
    %c0_0 = arith.constant 0 : index
    %c0_1 = arith.constant 0 : index
    %c0_2 = arith.constant 0 : index
    %1 = vector.load %arg1[%c0, %c0_0, %c0_1, %c0_2] : memref<2x18x18x3xf32, #tpu.memory_space<vmem>>, vector<2x16x16x3xf32>
    %2 = vector.shape_cast %1 : vector<2x16x16x3xf32> to vector<512x3xf32>
    %3 = arith.truncf %2 : vector<512x3xf32> to vector<512x3xbf16>
    %c0_3 = arith.constant 0 : index
    %c0_4 = arith.constant 0 : index
    %c0_5 = arith.constant 0 : index
    %4 = vector.load %arg2[%c0_3, %c0_4, %c0_5] : memref<9x3x64xbf16, #tpu.memory_space<vmem>>, vector<1x3x64xbf16>
    %5 = vector.shape_cast %4 : vector<1x3x64xbf16> to vector<3x64xbf16>
    %cst_6 = arith.constant dense<0.000000e+00> : vector<512x64xf32>
    %6 = tpu.matmul %3, %5, %cst_6 {dimension_numbers = #tpu.dot_dimension_numbers<[1], [0], [0], [1], [0, 0, 1, 1], [], []>} : vector<512x3xbf16>, vector<3x64xbf16>, vector<512x64xf32> -> vector<512x64xf32>
    %7 = arith.addf %0, %6 : vector<512x64xf32>
    %c0_7 = arith.constant 0 : index
    %c0_8 = arith.constant 0 : index
    %c1 = arith.constant 1 : index
    %c0_9 = arith.constant 0 : index
    %8 = vector.load %arg1[%c0_7, %c0_8, %c1, %c0_9] : memref<2x18x18x3xf32, #tpu.memory_space<vmem>>, vector<2x16x16x3xf32>
    %9 = vector.shape_cast %8 : vector<2x16x16x3xf32> to vector<512x3xf32>
    %10 = arith.truncf %9 : vector<512x3xf32> to vector<512x3xbf16>
    %c1_10 = arith.constant 1 : index
    %c0_11 = arith.constant 0 : index
    %c0_12 = arith.constant 0 : index
    %11 = vector.load %arg2[%c1_10, %c0_11, %c0_12] : memref<9x3x64xbf16, #tpu.memory_space<vmem>>, vector<1x3x64xbf16>
    %12 = vector.shape_cast %11 : vector<1x3x64xbf16> to vector<3x64xbf16>
    %cst_13 = arith.constant dense<0.000000e+00> : vector<512x64xf32>
    %13 = tpu.matmul %10, %12, %cst_13 {dimension_numbers = #tpu.dot_dimension_numbers<[1], [0], [0], [1], [0, 0, 1, 1], [], []>} : vector<512x3xbf16>, vector<3x64xbf16>, vector<512x64xf32> -> vector<512x64xf32>
    %14 = arith.addf %7, %13 : vector<512x64xf32>
    %c0_14 = arith.constant 0 : index
    %c0_15 = arith.constant 0 : index
    %c2 = arith.constant 2 : index
    %c0_16 = arith.constant 0 : index
    %15 = vector.load %arg1[%c0_14, %c0_15, %c2, %c0_16] : memref<2x18x18x3xf32, #tpu.memory_space<vmem>>, vector<2x16x16x3xf32>
    %16 = vector.shape_cast %15 : vector<2x16x16x3xf32> to vector<512x3xf32>
    %17 = arith.truncf %16 : vector<512x3xf32> to vector<512x3xbf16>
    %c2_17 = arith.constant 2 : index
    %c0_18 = arith.constant 0 : index
    %c0_19 = arith.constant 0 : index
    %18 = vector.load %arg2[%c2_17, %c0_18, %c0_19] : memref<9x3x64xbf16, #tpu.memory_space<vmem>>, vector<1x3x64xbf16>
    %19 = vector.shape_cast %18 : vector<1x3x64xbf16> to vector<3x64xbf16>
    %cst_20 = arith.constant dense<0.000000e+00> : vector<512x64xf32>
    %20 = tpu.matmul %17, %19, %cst_20 {dimension_numbers = #tpu.dot_dimension_numbers<[1], [0], [0], [1], [0, 0, 1, 1], [], []>} : vector<512x3xbf16>, vector<3x64xbf16>, vector<512x64xf32> -> vector<512x64xf32>
    %21 = arith.addf %14, %20 : vector<512x64xf32>
    %c0_21 = arith.constant 0 : index
    %c1_22 = arith.constant 1 : index
    %c0_23 = arith.constant 0 : index
    %c0_24 = arith.constant 0 : index
    %22 = vector.load %arg1[%c0_21, %c1_22, %c0_23, %c0_24] : memref<2x18x18x3xf32, #tpu.memory_space<vmem>>, vector<2x16x16x3xf32>
    %23 = vector.shape_cast %22 : vector<2x16x16x3xf32> to vector<512x3xf32>
    %24 = arith.truncf %23 : vector<512x3xf32> to vector<512x3xbf16>
    %c3 = arith.constant 3 : index
    %c0_25 = arith.constant 0 : index
    %c0_26 = arith.constant 0 : index
    %25 = vector.load %arg2[%c3, %c0_25, %c0_26] : memref<9x3x64xbf16, #tpu.memory_space<vmem>>, vector<1x3x64xbf16>
    %26 = vector.shape_cast %25 : vector<1x3x64xbf16> to vector<3x64xbf16>
    %cst_27 = arith.constant dense<0.000000e+00> : vector<512x64xf32>
    %27 = tpu.matmul %24, %26, %cst_27 {dimension_numbers = #tpu.dot_dimension_numbers<[1], [0], [0], [1], [0, 0, 1, 1], [], []>} : vector<512x3xbf16>, vector<3x64xbf16>, vector<512x64xf32> -> vector<512x64xf32>
    %28 = arith.addf %21, %27 : vector<512x64xf32>
    %c0_28 = arith.constant 0 : index
    %c1_29 = arith.constant 1 : index
    %c1_30 = arith.constant 1 : index
    %c0_31 = arith.constant 0 : index
    %29 = vector.load %arg1[%c0_28, %c1_29, %c1_30, %c0_31] : memref<2x18x18x3xf32, #tpu.memory_space<vmem>>, vector<2x16x16x3xf32>
    %30 = vector.shape_cast %29 : vector<2x16x16x3xf32> to vector<512x3xf32>
    %31 = arith.truncf %30 : vector<512x3xf32> to vector<512x3xbf16>
    %c4 = arith.constant 4 : index
    %c0_32 = arith.constant 0 : index
    %c0_33 = arith.constant 0 : index
    %32 = vector.load %arg2[%c4, %c0_32, %c0_33] : memref<9x3x64xbf16, #tpu.memory_space<vmem>>, vector<1x3x64xbf16>
    %33 = vector.shape_cast %32 : vector<1x3x64xbf16> to vector<3x64xbf16>
    %cst_34 = arith.constant dense<0.000000e+00> : vector<512x64xf32>
    %34 = tpu.matmul %31, %33, %cst_34 {dimension_numbers = #tpu.dot_dimension_numbers<[1], [0], [0], [1], [0, 0, 1, 1], [], []>} : vector<512x3xbf16>, vector<3x64xbf16>, vector<512x64xf32> -> vector<512x64xf32>
    %35 = arith.addf %28, %34 : vector<512x64xf32>
    %c0_35 = arith.constant 0 : index
    %c1_36 = arith.constant 1 : index
    %c2_37 = arith.constant 2 : index
    %c0_38 = arith.constant 0 : index
    %36 = vector.load %arg1[%c0_35, %c1_36, %c2_37, %c0_38] : memref<2x18x18x3xf32, #tpu.memory_space<vmem>>, vector<2x16x16x3xf32>
    %37 = vector.shape_cast %36 : vector<2x16x16x3xf32> to vector<512x3xf32>
    %38 = arith.truncf %37 : vector<512x3xf32> to vector<512x3xbf16>
    %c5 = arith.constant 5 : index
    %c0_39 = arith.constant 0 : index
    %c0_40 = arith.constant 0 : index
    %39 = vector.load %arg2[%c5, %c0_39, %c0_40] : memref<9x3x64xbf16, #tpu.memory_space<vmem>>, vector<1x3x64xbf16>
    %40 = vector.shape_cast %39 : vector<1x3x64xbf16> to vector<3x64xbf16>
    %cst_41 = arith.constant dense<0.000000e+00> : vector<512x64xf32>
    %41 = tpu.matmul %38, %40, %cst_41 {dimension_numbers = #tpu.dot_dimension_numbers<[1], [0], [0], [1], [0, 0, 1, 1], [], []>} : vector<512x3xbf16>, vector<3x64xbf16>, vector<512x64xf32> -> vector<512x64xf32>
    %42 = arith.addf %35, %41 : vector<512x64xf32>
    %c0_42 = arith.constant 0 : index
    %c2_43 = arith.constant 2 : index
    %c0_44 = arith.constant 0 : index
    %c0_45 = arith.constant 0 : index
    %43 = vector.load %arg1[%c0_42, %c2_43, %c0_44, %c0_45] : memref<2x18x18x3xf32, #tpu.memory_space<vmem>>, vector<2x16x16x3xf32>
    %44 = vector.shape_cast %43 : vector<2x16x16x3xf32> to vector<512x3xf32>
    %45 = arith.truncf %44 : vector<512x3xf32> to vector<512x3xbf16>
    %c6 = arith.constant 6 : index
    %c0_46 = arith.constant 0 : index
    %c0_47 = arith.constant 0 : index
    %46 = vector.load %arg2[%c6, %c0_46, %c0_47] : memref<9x3x64xbf16, #tpu.memory_space<vmem>>, vector<1x3x64xbf16>
    %47 = vector.shape_cast %46 : vector<1x3x64xbf16> to vector<3x64xbf16>
    %cst_48 = arith.constant dense<0.000000e+00> : vector<512x64xf32>
    %48 = tpu.matmul %45, %47, %cst_48 {dimension_numbers = #tpu.dot_dimension_numbers<[1], [0], [0], [1], [0, 0, 1, 1], [], []>} : vector<512x3xbf16>, vector<3x64xbf16>, vector<512x64xf32> -> vector<512x64xf32>
    %49 = arith.addf %42, %48 : vector<512x64xf32>
    %c0_49 = arith.constant 0 : index
    %c2_50 = arith.constant 2 : index
    %c1_51 = arith.constant 1 : index
    %c0_52 = arith.constant 0 : index
    %50 = vector.load %arg1[%c0_49, %c2_50, %c1_51, %c0_52] : memref<2x18x18x3xf32, #tpu.memory_space<vmem>>, vector<2x16x16x3xf32>
    %51 = vector.shape_cast %50 : vector<2x16x16x3xf32> to vector<512x3xf32>
    %52 = arith.truncf %51 : vector<512x3xf32> to vector<512x3xbf16>
    %c7 = arith.constant 7 : index
    %c0_53 = arith.constant 0 : index
    %c0_54 = arith.constant 0 : index
    %53 = vector.load %arg2[%c7, %c0_53, %c0_54] : memref<9x3x64xbf16, #tpu.memory_space<vmem>>, vector<1x3x64xbf16>
    %54 = vector.shape_cast %53 : vector<1x3x64xbf16> to vector<3x64xbf16>
    %cst_55 = arith.constant dense<0.000000e+00> : vector<512x64xf32>
    %55 = tpu.matmul %52, %54, %cst_55 {dimension_numbers = #tpu.dot_dimension_numbers<[1], [0], [0], [1], [0, 0, 1, 1], [], []>} : vector<512x3xbf16>, vector<3x64xbf16>, vector<512x64xf32> -> vector<512x64xf32>
    %56 = arith.addf %49, %55 : vector<512x64xf32>
    %c0_56 = arith.constant 0 : index
    %c2_57 = arith.constant 2 : index
    %c2_58 = arith.constant 2 : index
    %c0_59 = arith.constant 0 : index
    %57 = vector.load %arg1[%c0_56, %c2_57, %c2_58, %c0_59] : memref<2x18x18x3xf32, #tpu.memory_space<vmem>>, vector<2x16x16x3xf32>
    %58 = vector.shape_cast %57 : vector<2x16x16x3xf32> to vector<512x3xf32>
    %59 = arith.truncf %58 : vector<512x3xf32> to vector<512x3xbf16>
    %c8 = arith.constant 8 : index
    %c0_60 = arith.constant 0 : index
    %c0_61 = arith.constant 0 : index
    %60 = vector.load %arg2[%c8, %c0_60, %c0_61] : memref<9x3x64xbf16, #tpu.memory_space<vmem>>, vector<1x3x64xbf16>
    %61 = vector.shape_cast %60 : vector<1x3x64xbf16> to vector<3x64xbf16>
    %cst_62 = arith.constant dense<0.000000e+00> : vector<512x64xf32>
    %62 = tpu.matmul %59, %61, %cst_62 {dimension_numbers = #tpu.dot_dimension_numbers<[1], [0], [0], [1], [0, 0, 1, 1], [], []>} : vector<512x3xbf16>, vector<3x64xbf16>, vector<512x64xf32> -> vector<512x64xf32>
    %63 = arith.addf %56, %62 : vector<512x64xf32>
    %c0_63 = arith.constant 0 : index
    %c0_64 = arith.constant 0 : index
    %64 = vector.load %arg3[%c0_63, %c0_64] : memref<1x64xf32, #tpu.memory_space<vmem>>, vector<1x64xf32>
    %65 = vector.broadcast %64 : vector<1x64xf32> to vector<512x64xf32>
    %66 = arith.addf %63, %65 : vector<512x64xf32>
    %cst_65 = arith.constant 0.000000e+00 : f32
    %67 = vector.broadcast %cst_65 : f32 to vector<512x64xf32>
    %68 = arith.maximumf %66, %67 : vector<512x64xf32>
    %c0_66 = arith.constant 0 : index
    %c0_67 = arith.constant 0 : index
    %69 = vector.load %arg7[%c0_66, %c0_67] : memref<512x64xf32, #tpu.memory_space<vmem>>, vector<512x64xf32>
    tpu.vector_store %arg7[%c0_66, %c0_67], %68 {strides = array<i32>} : memref<512x64xf32, #tpu.memory_space<vmem>>, vector<512x64xf32>,
    %c0_68 = arith.constant 0 : index
    %c0_69 = arith.constant 0 : index
    %70 = tpu.strided_load %arg7[%c0_68, %c0_69] {strides = array<i32: 2, 1>} : memref<512x64xf32, #tpu.memory_space<vmem>>, vector<256x64xf32>
    %c1_70 = arith.constant 1 : index
    %c0_71 = arith.constant 0 : index
    %71 = tpu.strided_load %arg7[%c1_70, %c0_71] {strides = array<i32: 2, 1>} : memref<512x64xf32, #tpu.memory_space<vmem>>, vector<256x64xf32>
    %72 = arith.maximumf %70, %71 : vector<256x64xf32>
    %73 = vector.shape_cast %72 : vector<256x64xf32> to vector<16x2x8x64xf32>
    %74 = vector.extract_strided_slice %73 {offsets = [0, 0, 0, 0], sizes = [16, 1, 8, 64], strides = [1, 1, 1, 1]} : vector<16x2x8x64xf32> to vector<16x1x8x64xf32>
    %75 = vector.shape_cast %74 : vector<16x1x8x64xf32> to vector<16x8x64xf32>
    %76 = vector.extract_strided_slice %73 {offsets = [0, 1, 0, 0], sizes = [16, 1, 8, 64], strides = [1, 1, 1, 1]} : vector<16x2x8x64xf32> to vector<16x1x8x64xf32>
    %77 = vector.shape_cast %76 : vector<16x1x8x64xf32> to vector<16x8x64xf32>
    %78 = arith.maximumf %75, %77 : vector<16x8x64xf32>
    %79 = vector.shape_cast %78 : vector<16x8x64xf32> to vector<2x8x8x64xf32>
    %c0_72 = arith.constant 0 : index
    %c0_73 = arith.constant 0 : index
    %c0_74 = arith.constant 0 : index
    %c0_75 = arith.constant 0 : index
    %80 = vector.load %arg4[%c0_72, %c0_73, %c0_74, %c0_75] : memref<1x8x8x64xf32, #tpu.memory_space<vmem>>, vector<1x8x8x64xf32>
    %81 = vector.broadcast %80 : vector<1x8x8x64xf32> to vector<2x8x8x64xf32>
    %82 = arith.mulf %79, %81 : vector<2x8x8x64xf32>
    %cst_76 = arith.constant dense<0.000000e+00> : vector<2x8x8xf32>
    %83 = vector.multi_reduction <add>, %82, %cst_76 [3] : vector<2x8x8x64xf32> to vector<2x8x8xf32>
    %84 = vector.shape_cast %83 : vector<2x8x8xf32> to vector<2x8x8x1xf32>
    %cst_77 = arith.constant dense<0.000000e+00> : vector<2x8x1xf32>
    %85 = vector.multi_reduction <add>, %84, %cst_77 [2] : vector<2x8x8x1xf32> to vector<2x8x1xf32>
    %86 = vector.shape_cast %85 : vector<2x8x1xf32> to vector<2x8x1x1xf32>
    %cst_78 = arith.constant dense<0.000000e+00> : vector<2x1x1xf32>
    %87 = vector.multi_reduction <add>, %86, %cst_78 [1] : vector<2x8x1x1xf32> to vector<2x1x1xf32>
    %88 = vector.shape_cast %87 : vector<2x1x1xf32> to vector<2x1x1x1xf32>
    %89 = vector.shape_cast %88 : vector<2x1x1x1xf32> to vector<2x1xf32>
    %c0_79 = arith.constant 0 : index
    %c0_80 = arith.constant 0 : index
    %90 = vector.load %arg5[%c0_79, %c0_80] : memref<1x1xf32, #tpu.memory_space<vmem>>, vector<1x1xf32>
    %91 = vector.broadcast %90 : vector<1x1xf32> to vector<2x1xf32>
    %92 = arith.addf %89, %91 : vector<2x1xf32>
    %c0_81 = arith.constant 0 : index
    %c0_82 = arith.constant 0 : index
    %93 = vector.load %arg6[%c0_81, %c0_82] : memref<2x1xf32, #tpu.memory_space<vmem>>, vector<2x1xf32>
    tpu.vector_store %arg6[%c0_81, %c0_82], %92 {strides = array<i32>} : memref<2x1xf32, #tpu.memory_space<vmem>>, vector<2x1xf32>,
    return
  }
  func.func @transform_0(%arg0: i32) -> (i32, i32, i32, i32) {
    %c0_i32 = arith.constant 0 : i32
    %c0_i32_0 = arith.constant 0 : i32
    %c0_i32_1 = arith.constant 0 : i32
    %c0_i32_2 = arith.constant 0 : i32
    %c0_i32_3 = arith.constant 0 : i32
    return %c0_i32, %c0_i32_0, %c0_i32_1, %c0_i32_2 : i32, i32, i32, i32
  }
  func.func @transform_1(%arg0: i32) -> (i32, i32, i32) {
    %c0_i32 = arith.constant 0 : i32
    %c0_i32_0 = arith.constant 0 : i32
    %c0_i32_1 = arith.constant 0 : i32
    %c0_i32_2 = arith.constant 0 : i32
    return %c0_i32, %c0_i32_0, %c0_i32_1 : i32, i32, i32
  }
  func.func @transform_2(%arg0: i32) -> (i32, i32) {
    %c0_i32 = arith.constant 0 : i32
    %c0_i32_0 = arith.constant 0 : i32
    %c0_i32_1 = arith.constant 0 : i32
    return %c0_i32, %c0_i32_0 : i32, i32
  }
  func.func @transform_3(%arg0: i32) -> (i32, i32, i32, i32) {
    %c0_i32 = arith.constant 0 : i32
    %c0_i32_0 = arith.constant 0 : i32
    %c0_i32_1 = arith.constant 0 : i32
    %c0_i32_2 = arith.constant 0 : i32
    %c0_i32_3 = arith.constant 0 : i32
    return %c0_i32, %c0_i32_0, %c0_i32_1, %c0_i32_2 : i32, i32, i32, i32
  }
  func.func @transform_4(%arg0: i32) -> (i32, i32) {
    %c0_i32 = arith.constant 0 : i32
    %c0_i32_0 = arith.constant 0 : i32
    %c0_i32_1 = arith.constant 0 : i32
    return %c0_i32, %c0_i32_0 : i32, i32
  }
  func.func @transform_5(%arg0: i32) -> (i32, i32) {
    %c0_i32 = arith.constant 0 : i32
    %c0_i32_0 = arith.constant 0 : i32
    %c0_i32_1 = arith.constant 0 : i32
    return %c0_i32, %c0_i32_0 : i32, i32
  }
}

</mosaic_0001>

<bundles_post_ra>
// kernel: net_forward.1
= control target key start
LH: loop header
LB: loop body
LE: loop exit
PB: predicated region body
PF: predicated region fallthrough
CT: control target
= control target key end

     0   :  { %vm315_vm0 = vcmask 1040384   ;;  %vm316_vm1 = vcmask 1041408   ;;  %v7006_v1 = vmov 65535   ;;  %vm218_vm2 = vcmask 23552   ;;  %s9945_s1 = inlined_call_operand.vmem [shape: bf16[9,3,64], index: 1, kind: input, shape index: {}]   ;;  %s9946_s0 = inlined_call_operand.vmem [shape: f32[2,18,18,3], index: 0, kind: input, shape index: {}]   ;;  %s9947_s2 = inlined_call_operand.vmem [shape: f32[1,64], index: 2, kind: input, shape index: {}]   ;;  %s9948_s3 = inlined_call_operand.vmem [shape: f32[1,8,8,64], index: 3, kind: input, shape index: {}]   ;;  %s9949_s4 = inlined_call_operand.<no memory space> [shape: f32[1,1], index: 4, kind: input, shape index: {}]   ;;  %s9950_s5 = inlined_call_operand.vmem [shape: f32[2,1], index: 5, kind: output, shape index: {}]  }
   0x1   :  { %v5429_v0 = vld [vmem:[%s9945_s1 + $0x2] sm:$0x3]  ;;  %v317_v2 = vsel %vm315_vm0, 4294967295, %v7006_v1  ;;  %v121_v4 = vld [vmem:[%s9946_s0 + $0x9] sm:$0xff]  ;;  %v152_v7 = vld [vmem:[%s9946_s0 + $0x1b1] sm:$0xff]  ;;  %vm4986_vm3 = vcmask 523264  }
   0x2   :  { %v120_v3 = vld [vmem:[%s9946_s0 + $0x1] sm:$0xff]  ;;  %v7046_v5 = vsel %vm316_vm1, %v317_v2, 0  ;;  %v153_v8 = vld [vmem:[%s9946_s0 + $0x1b9] sm:$0xff]  ;;  %v154_v13 = vld [vmem:[%s9946_s0 + $0x1c9] sm:$0xff]  ;;  %vm5420_vm4 = vcmask 1041409   ;;  %vm5423_vm5 = vcmask 1024  }
   0x3   :  { %v184_v6 = vpack.c.bf16 %v121_v4, %v120_v3  ;;  %v122_v9 = vld [vmem:[%s9946_s0 + $0x19] sm:$0xff]  ;;  %v320_v10 = vand.u32 %v5429_v0, %v7046_v5  ;;  %v200_v11 = vpack.c.bf16 %v153_v8, %v152_v7  ;;  %v123_v12 = vld [vmem:[%s9946_s0 + $0x21] sm:$0xff]  ;;  %v155_v14 = vld [vmem:[%s9946_s0 + $0x1d1] sm:$0xff] }
   0x4   :  { %v7068_v15 = vpack.c.bf16 %v123_v12, %v122_v9  ;;  %v119_v16 = vld [vmem:[%s9945_s1] sm:$0x3]  ;;  %v5494_v17 = vld [vmem:[%s9945_s1 + $0x4] sm:$0x3]  ;;  %v124_v18 = vld [vmem:[%s9946_s0 + $0x31] sm:$0xff]  ;;  %v201_v19 = vpack.c.bf16 %v155_v14, %v154_v13 }
   0x5   :  { %6410 = vmatprep.mubr.msk.bf16.mxu0 %vm218_vm2, %v184_v6  ;;  %6408 = vmatprep.subr.bf16.mxu0 %v320_v10  ;;  %v708_v20 = vand.u32 %v7046_v5, %v119_v16  ;;  %v1194_v21 = vand.u32 %v5494_v17, %v7046_v5  ;;  %v125_v22 = vld [vmem:[%s9946_s0 + $0x39] sm:$0xff]  ;;  %v156_v23 = vld [vmem:[%s9946_s0 + $0x1e1] sm:$0xff]  ;;  %v157_v24 = vld [vmem:[%s9946_s0 + $0x1e9] sm:$0xff] }
   0x6   :  { %7002 = vmatprep.subr.bf16.mxu1 %v320_v10  ;;  %6409 = vmatpush3.bf16.msra.mxu0 %v320_v10  ;;  %v7091_v25 = vpack.c.bf16 %v125_v22, %v124_v18  ;;  %v202_v26 = vpack.c.bf16 %v157_v24, %v156_v23  ;;  %v126_v27 = vld [vmem:[%s9946_s0 + $0x49] sm:$0xff]  ;;  %v127_v28 = vld [vmem:[%s9946_s0 + $0x51] sm:$0xff]  ;;  %v158_v29 = vld [vmem:[%s9946_s0 + $0x1f9] sm:$0xff] }
   0x7   :  { %7003 = vmatpush3.bf16.msra.mxu1 %v320_v10  ;;  %6442 = vmatprep.mubr.msk.bf16.mxu1 %vm218_vm2, %v200_v11  ;;  %v159_v30 = vld [vmem:[%s9946_s0 + $0x201] sm:$0xff]  ;;  %v129_v32 = vld [vmem:[%s9946_s0 + $0x69] sm:$0xff]  ;;  %v160_v33 = vld [vmem:[%s9946_s0 + $0x211] sm:$0xff]  ;;  %v7123_v35 = vpack.c.bf16 %v127_v28, %v126_v27 }
   0x8   :  { %6474 = vmatprep.subr.bf16.mxu1 %v708_v20  ;;  %6540 = vmatprep.subr.bf16.mxu0 %v1194_v21  ;;  %v128_v31 = vld [vmem:[%s9946_s0 + $0x61] sm:$0xff]  ;;  %v161_v34 = vld [vmem:[%s9946_s0 + $0x219] sm:$0xff]  ;;  %v203_v36 = vpack.c.bf16 %v159_v30, %v158_v29  ;;  %v162_v41 = vld [vmem:[%s9946_s0 + $0x229] sm:$0xff] }
   0x9   :  { %6411 = vmatmul.mubr.msk.bf16.vlgmr.msra.gmra.mxu0 %vm218_vm2, %v7068_v15  ;;  %v7125_v37 = vpack.c.bf16 %v129_v32, %v128_v31  ;;  %v204_v38 = vpack.c.bf16 %v161_v34, %v160_v33  ;;  %v130_v39 = vld [vmem:[%s9946_s0 + $0x79] sm:$0xff]  ;;  %v131_v40 = vld [vmem:[%s9946_s0 + $0x81] sm:$0xff]  ;;  %v163_v42 = vld [vmem:[%s9946_s0 + $0x231] sm:$0xff] }
   0xa   :  { %6443 = vmatmul.mubr.msk.bf16.vlgmr.msra.gmra.mxu1 %vm218_vm2, %v201_v19  ;;  %6541 = vmatpush3.bf16.msra.mxu0 %v1194_v21  ;;  %v132_v43 = vld [vmem:[%s9946_s0 + $0x91] sm:$0xff]  ;;  %v133_v44 = vld [vmem:[%s9946_s0 + $0x99] sm:$0xff]  ;;  %v164_v45 = vld [vmem:[%s9946_s0 + $0x241] sm:$0xff]  ;;  %v7157_v47 = vpack.c.bf16 %v131_v40, %v130_v39  ;;  %v205_v48 = vpack.c.bf16 %v163_v42, %v162_v41 }
   0xb   :  { %6475 = vmatpush3.bf16.msra.mxu1 %v708_v20  ;;  %6414 = vmatprep.mubr.msk.bf16.mxu0 %vm218_vm2, %v7091_v25  ;;  %v165_v46 = vld [vmem:[%s9946_s0 + $0x249] sm:$0xff]  ;;  %v7159_v49 = vpack.c.bf16 %v133_v44, %v132_v43  ;;  %v135_v52 = vld [vmem:[%s9946_s0 + $0xb1] sm:$0xff]  ;;  %v166_v53 = vld [vmem:[%s9946_s0 + $0x259] sm:$0xff] }
   0xc   :  { %6446 = vmatprep.mubr.msk.bf16.mxu1 %vm218_vm2, %v202_v26  ;;  %v206_v50 = vpack.c.bf16 %v165_v46, %v164_v45  ;;  %v134_v51 = vld [vmem:[%s9946_s0 + $0xa9] sm:$0xff]  ;;  %v167_v54 = vld [vmem:[%s9946_s0 + $0x261] sm:$0xff]  ;;  %v168_v59 = vld [vmem:[%s9946_s0 + $0x271] sm:$0xff] }
   0xd   :  { %v136_v55 = vld [vmem:[%s9946_s0 + $0xc1] sm:$0xff]  ;;  %v137_v58 = vld [vmem:[%s9946_s0 + $0xc9] sm:$0xff]  ;;  %v169_v60 = vld [vmem:[%s9946_s0 + $0x279] sm:$0xff]  ;;  %v7203_v63 = vpack.c.bf16 %v135_v52, %v134_v51  ;;  %v207_v0 = vpack.c.bf16 %v167_v54, %v166_v53 }
   0xe   :  { %v5591_v56 = vld [vmem:[%s9945_s1 + $0x6] sm:$0x3]  ;;  %v5688_v57 = vld [vmem:[%s9945_s1 + $0x8] sm:$0x3]  ;;  %v7207_v1 = vpack.c.bf16 %v137_v58, %v136_v55  ;;  %v208_v2 = vpack.c.bf16 %v169_v60, %v168_v59  ;;  %v138_v3 = vld [vmem:[%s9946_s0 + $0xd9] sm:$0xff] }
   0xf   :  { %v7198_v61 = vand.u32 %v5591_v56, %v7046_v5  ;;  %v7201_v62 = vand.u32 %v5688_v57, %v7046_v5  ;;  %v139_v4 = vld [vmem:[%s9946_s0 + $0xe1] sm:$0xff]  ;;  %v170_v6 = vld [vmem:[%s9946_s0 + $0x289] sm:$0xff]  ;;  %v171_v7 = vld [vmem:[%s9946_s0 + $0x291] sm:$0xff] }
  0x10   :  { %v140_v8 = vld [vmem:[%s9946_s0 + $0xf1] sm:$0xff]  ;;  %v141_v9 = vld [vmem:[%s9946_s0 + $0xf9] sm:$0xff]  ;;  %v172_v10 = vld [vmem:[%s9946_s0 + $0x2a1] sm:$0xff]  ;;  %v7239_v12 = vpack.c.bf16 %v139_v4, %v138_v3  ;;  %v209_v13 = vpack.c.bf16 %v171_v7, %v170_v6 }
  0x11   :  { %6415 = vmatmul.mubr.msk.bf16.gmra.mxu0 %vm218_vm2, %v7123_v35  ;;  %6606 = vmatprep.subr.bf16.mxu1 %v7198_v61  ;;  %v173_v11 = vld [vmem:[%s9946_s0 + $0x2a9] sm:$0xff]  ;;  %v7241_v14 = vpack.c.bf16 %v141_v9, %v140_v8  ;;  %v143_v18 = vld [vmem:[%s9946_s0 + $0x111] sm:$0xff]  ;;  %v174_v19 = vld [vmem:[%s9946_s0 + $0x2b9] sm:$0xff] }
  0x12   :  { %6447 = vmatmul.mubr.msk.bf16.gmra.mxu1 %vm218_vm2, %v203_v36  ;;  %6418 = vmatprep.mubr.msk.bf16.mxu0 %vm218_vm2, %v7125_v37  ;;  %v210_v16 = vpack.c.bf16 %v173_v11, %v172_v10  ;;  %v142_v17 = vld [vmem:[%s9946_s0 + $0x109] sm:$0xff]  ;;  %v175_v20 = vld [vmem:[%s9946_s0 + $0x2c1] sm:$0xff]  ;;  %v176_v23 = vld [vmem:[%s9946_s0 + $0x2d1] sm:$0xff] }
  0x13   :  { %6450 = vmatprep.mubr.msk.bf16.mxu1 %vm218_vm2, %v204_v38  ;;  %6672 = vmatprep.subr.bf16.mxu0 %v7201_v62  ;;  %v144_v21 = vld [vmem:[%s9946_s0 + $0x121] sm:$0xff]  ;;  %v145_v22 = vld [vmem:[%s9946_s0 + $0x129] sm:$0xff]  ;;  %v177_v24 = vld [vmem:[%s9946_s0 + $0x2d9] sm:$0xff]  ;;  %v7273_v26 = vpack.c.bf16 %v143_v18, %v142_v17  ;;  %v211_v27 = vpack.c.bf16 %v175_v20, %v174_v19 }
  0x14   :  { %v7275_v28 = vpack.c.bf16 %v145_v22, %v144_v21  ;;  %v212_v29 = vpack.c.bf16 %v177_v24, %v176_v23  ;;  %v146_v30 = vld [vmem:[%s9946_s0 + $0x139] sm:$0xff]  ;;  %v147_v31 = vld [vmem:[%s9946_s0 + $0x141] sm:$0xff]  ;;  %v178_v32 = vld [vmem:[%s9946_s0 + $0x2e9] sm:$0xff] }
  0x15   :  { %v179_v33 = vld [vmem:[%s9946_s0 + $0x2f1] sm:$0xff]  ;;  %v149_v36 = vld [vmem:[%s9946_s0 + $0x159] sm:$0xff]  ;;  %v180_v38 = vld [vmem:[%s9946_s0 + $0x301] sm:$0xff]  ;;  %v7307_v40 = vpack.c.bf16 %v147_v31, %v146_v30 }
  0x16   :  { %v148_v34 = vld [vmem:[%s9946_s0 + $0x151] sm:$0xff]  ;;  %v181_v39 = vld [vmem:[%s9946_s0 + $0x309] sm:$0xff]  ;;  %v213_v41 = vpack.c.bf16 %v179_v33, %v178_v32  ;;  %v182_v46 = vld [vmem:[%s9946_s0 + $0x319] sm:$0xff] }
  0x17   :  { %v7309_v42 = vpack.c.bf16 %v149_v36, %v148_v34  ;;  %v214_v43 = vpack.c.bf16 %v181_v39, %v180_v38  ;;  %v150_v44 = vld [vmem:[%s9946_s0 + $0x169] sm:$0xff]  ;;  %v151_v45 = vld [vmem:[%s9946_s0 + $0x171] sm:$0xff]  ;;  %v26_v59 = vld [vmem:[%s9946_s0 + $0x20] sm:$0xff] }
  0x18   :  { %v24_v51 = vld [vmem:[%s9946_s0 + $0x8] sm:$0xff]  ;;  %v7341_v54 = vpack.c.bf16 %v151_v45, %v150_v44  ;;  %v25_v58 = vld [vmem:[%s9946_s0 + $0x18] sm:$0xff]  ;;  %v31_v19 = vld [vmem:[%s9946_s0 + $0x60] sm:$0xff] }
  0x19   :  { %6419 = vmatmul.mubr.msk.bf16.gmra.mxu0 %vm218_vm2, %v7157_v47  ;;  %v999_v52 = vld [vmem:[%s9946_s0 + $0x2] sm:$0xff]  ;;  %v1000_v53 = vld [vmem:[%s9946_s0 + $0xa] sm:$0xff]  ;;  %v1001_v60 = vld [vmem:[%s9946_s0 + $0x1a] sm:$0xff]  ;;  %v7372_v7 = vpack.c.bf16 %v26_v59, %v25_v58 }
  0x1a   :  { %6451 = vmatmul.mubr.msk.bf16.gmra.mxu1 %vm218_vm2, %v205_v48  ;;  %6422 = vmatprep.mubr.msk.bf16.mxu0 %vm218_vm2, %v7159_v49  ;;  %v183_v48 = vld [vmem:[%s9946_s0 + $0x321] sm:$0xff]  ;;  %v1063_v57 = vpack.c.bf16 %v1000_v53, %v999_v52  ;;  %v28_v3 = vld [vmem:[%s9946_s0 + $0x38] sm:$0xff]  ;;  %v5785_v17 = vld [vmem:[%s9945_s1 + $0xa] sm:$0x3] }
  0x1b   :  { %6454 = vmatprep.mubr.msk.bf16.mxu1 %vm218_vm2, %v206_v50  ;;  %v23_v50 = vld [vmem:[%s9946_s0] sm:$0xff]  ;;  %v215_v55 = vpack.c.bf16 %v183_v48, %v182_v46  ;;  %v1003_v4 = vld [vmem:[%s9946_s0 + $0x32] sm:$0xff]  ;;  %v29_v11 = vld [vmem:[%s9946_s0 + $0x48] sm:$0xff]  ;;  %v7403_v21 = vand.u32 %v5785_v17, %v7046_v5 }
  0x1c   :  { %v87_v56 = vpack.c.bf16 %v24_v51, %v23_v50  ;;  %v1004_v6 = vld [vmem:[%s9946_s0 + $0x3a] sm:$0xff]  ;;  %v1006_v18 = vld [vmem:[%s9946_s0 + $0x52] sm:$0xff]  ;;  %v32_v20 = vld [vmem:[%s9946_s0 + $0x68] sm:$0xff] }
  0x1d   :  { %v1065_v10 = vpack.c.bf16 %v1004_v6, %v1003_v4  ;;  %v5882_v22 = vld [vmem:[%s9945_s1 + $0xc] sm:$0x3]  ;;  %v33_v31 = vld [vmem:[%s9946_s0 + $0x78] sm:$0xff]  ;;  %v34_v32 = vld [vmem:[%s9946_s0 + $0x80] sm:$0xff] }
  0x1e   :  { %v7419_v23 = vand.u32 %v5882_v22, %v7046_v5  ;;  %v1009_v33 = vld [vmem:[%s9946_s0 + $0x7a] sm:$0xff]  ;;  %v1010_v34 = vld [vmem:[%s9946_s0 + $0x82] sm:$0xff]  ;;  %v35_v36 = vld [vmem:[%s9946_s0 + $0x90] sm:$0xff] }
  0x1f   :  { %v36_v38 = vld [vmem:[%s9946_s0 + $0x98] sm:$0xff]  ;;  %v1068_v44 = vpack.c.bf16 %v1010_v34, %v1009_v33  ;;  %v37_v48 = vld [vmem:[%s9946_s0 + $0xa8] sm:$0xff]  ;;  %v38_v50 = vld [vmem:[%s9946_s0 + $0xb0] sm:$0xff] }
  0x20   :  { %v1011_v39 = vld [vmem:[%s9946_s0 + $0x92] sm:$0xff]  ;;  %v7458_v45 = vpack.c.bf16 %v36_v38, %v35_v36  ;;  %v1013_v51 = vld [vmem:[%s9946_s0 + $0xaa] sm:$0xff]  ;;  %v39_v53 = vld [vmem:[%s9946_s0 + $0xc0] sm:$0xff]  ;;  %v7490_v58 = vpack.c.bf16 %v38_v50, %v37_v48 }
  0x21   :  { %6423 = vmatmul.mubr.msk.bf16.gmra.mxu0 %vm218_vm2, %v7203_v63  ;;  %v1014_v52 = vld [vmem:[%s9946_s0 + $0xb2] sm:$0xff]  ;;  %v1017_v4 = vld [vmem:[%s9946_s0 + $0xda] sm:$0xff]  ;;  %v1018_v6 = vld [vmem:[%s9946_s0 + $0xe2] sm:$0xff] }
  0x22   :  { %6455 = vmatmul.mubr.msk.bf16.gmra.mxu1 %vm218_vm2, %v207_v0  ;;  %6426 = vmatprep.mubr.msk.bf16.mxu0 %vm218_vm2, %v7207_v1  ;;  %v1002_v0 = vld [vmem:[%s9946_s0 + $0x22] sm:$0xff]  ;;  %v1070_v59 = vpack.c.bf16 %v1014_v52, %v1013_v51  ;;  %v1072_v17 = vpack.c.bf16 %v1018_v6, %v1017_v4  ;;  %v1022_v22 = vld [vmem:[%s9946_s0 + $0x112] sm:$0xff]  ;;  %v1028_v52 = vld [vmem:[%s9946_s0 + $0x15a] sm:$0xff] }
  0x23   :  { %6458 = vmatprep.mubr.msk.bf16.mxu1 %vm218_vm2, %v208_v2  ;;  %v27_v2 = vld [vmem:[%s9946_s0 + $0x30] sm:$0xff]  ;;  %v1064_v8 = vpack.c.bf16 %v1002_v0, %v1001_v60  ;;  %v52_v50 = vld [vmem:[%s9946_s0 + $0x158] sm:$0xff] }
  0x24   :  { %v7374_v9 = vpack.c.bf16 %v28_v3, %v27_v2  ;;  %v41_v2 = vld [vmem:[%s9946_s0 + $0xd8] sm:$0xff]  ;;  %v42_v3 = vld [vmem:[%s9946_s0 + $0xe0] sm:$0xff]  ;;  %v51_v48 = vld [vmem:[%s9946_s0 + $0x150] sm:$0xff] }
  0x25   :  { %v1027_v51 = vld [vmem:[%s9946_s0 + $0x152] sm:$0xff] }
  0x26   :  { %v55_v4 = vld [vmem:[%s9946_s0 + $0x1b0] sm:$0xff]  ;;  %v56_v6 = vld [vmem:[%s9946_s0 + $0x1b8] sm:$0xff] }
  0x29   :  { %6427 = vmatmul.mubr.msk.bf16.gmra.mxu0 %vm218_vm2, %v7239_v12 }
  0x2a   :  { %6459 = vmatmul.mubr.msk.bf16.gmra.mxu1 %vm218_vm2, %v209_v13  ;;  %6430 = vmatprep.mubr.msk.bf16.mxu0 %vm218_vm2, %v7241_v14  ;;  %v30_v13 = vld [vmem:[%s9946_s0 + $0x50] sm:$0xff] }
  0x2b   :  { %6462 = vmatprep.mubr.msk.bf16.mxu1 %vm218_vm2, %v210_v16  ;;  %v1005_v16 = vld [vmem:[%s9946_s0 + $0x4a] sm:$0xff]  ;;  %v7421_v24 = vpack.c.bf16 %v30_v13, %v29_v11  ;;  %v1019_v11 = vld [vmem:[%s9946_s0 + $0xf2] sm:$0xff]  ;;  %v1020_v13 = vld [vmem:[%s9946_s0 + $0xfa] sm:$0xff] }
  0x31   :  { %6431 = vmatmul.mubr.msk.bf16.gmra.mxu0 %vm218_vm2, %v7273_v26 }
  0x32   :  { %6463 = vmatmul.mubr.msk.bf16.gmra.mxu1 %vm218_vm2, %v211_v27  ;;  %6434 = vmatprep.mubr.msk.bf16.mxu0 %vm218_vm2, %v7275_v28  ;;  %v1066_v27 = vpack.c.bf16 %v1006_v18, %v1005_v16  ;;  %v7524_v16 = vpack.c.bf16 %v42_v3, %v41_v2  ;;  %v1029_v2 = vld [vmem:[%s9946_s0 + $0x16a] sm:$0xff]  ;;  %v1030_v3 = vld [vmem:[%s9946_s0 + $0x172] sm:$0xff] }
  0x33   :  { %6466 = vmatprep.mubr.msk.bf16.mxu1 %vm218_vm2, %v212_v29  ;;  %v7423_v29 = vpack.c.bf16 %v32_v20, %v31_v19  ;;  %v1073_v19 = vpack.c.bf16 %v1020_v13, %v1019_v11  ;;  %v45_v20 = vld [vmem:[%s9946_s0 + $0x108] sm:$0xff]  ;;  %v1078_v13 = vpack.c.bf16 %v1030_v3, %v1029_v2 }
  0x39   :  { %6435 = vmatmul.mubr.msk.bf16.gmra.mxu0 %vm218_vm2, %v7307_v40 }
  0x3a   :  { %6467 = vmatmul.mubr.msk.bf16.gmra.mxu1 %vm218_vm2, %v213_v41  ;;  %6438 = vmatprep.mubr.msk.bf16.mxu0 %vm218_vm2, %v7309_v42  ;;  %v1012_v41 = vld [vmem:[%s9946_s0 + $0x9a] sm:$0xff] }
  0x3b   :  { %6470 = vmatprep.mubr.msk.bf16.mxu1 %vm218_vm2, %v214_v43  ;;  %v7456_v43 = vpack.c.bf16 %v34_v32, %v33_v31  ;;  %v1069_v46 = vpack.c.bf16 %v1012_v41, %v1011_v39  ;;  %v1023_v31 = vld [vmem:[%s9946_s0 + $0x122] sm:$0xff]  ;;  %v1024_v32 = vld [vmem:[%s9946_s0 + $0x12a] sm:$0xff]  ;;  %v49_v39 = vld [vmem:[%s9946_s0 + $0x138] sm:$0xff] }
  0x3c   :  { %v1075_v38 = vpack.c.bf16 %v1024_v32, %v1023_v31  ;;  %v50_v41 = vld [vmem:[%s9946_s0 + $0x140] sm:$0xff]  ;;  %v1036_v32 = vld [vmem:[%s9946_s0 + $0x1ea] sm:$0xff] }
  0x3d   :  { %v1035_v31 = vld [vmem:[%s9946_s0 + $0x1e2] sm:$0xff] }
  0x41   :  { %6439 = vmatmul.mubr.msk.bf16.gmra.mxu0 %vm218_vm2, %v7341_v54 }
  0x42   :  { %6471 = vmatmul.mubr.msk.bf16.gmra.mxu1 %vm218_vm2, %v215_v55  ;;  %6542 = vmatprep.mubr.msk.bf16.mxu0 %vm218_vm2, %v1063_v57  ;;  %v40_v55 = vld [vmem:[%s9946_s0 + $0xc8] sm:$0xff] }
  0x43   :  { %6476 = vmatprep.mubr.msk.bf16.mxu1 %vm218_vm2, %v87_v56  ;;  %v1015_v56 = vld [vmem:[%s9946_s0 + $0xc2] sm:$0xff]  ;;  %v1016_v57 = vld [vmem:[%s9946_s0 + $0xca] sm:$0xff]  ;;  %v7492_v60 = vpack.c.bf16 %v40_v55, %v39_v53  ;;  %v7592_v53 = vpack.c.bf16 %v50_v41, %v49_v39  ;;  %v1081_v41 = vpack.c.bf16 %v1036_v32, %v1035_v31  ;;  %v1045_v32 = vld [vmem:[%s9946_s0 + $0x25a] sm:$0xff] }
  0x44   :  { %v1071_v0 = vpack.c.bf16 %v1016_v57, %v1015_v56  ;;  %v7594_v56 = vpack.c.bf16 %v52_v50, %v51_v48  ;;  %v1077_v57 = vpack.c.bf16 %v1028_v52, %v1027_v51  ;;  %v1037_v48 = vld [vmem:[%s9946_s0 + $0x1fa] sm:$0xff]  ;;  %v1038_v50 = vld [vmem:[%s9946_s0 + $0x202] sm:$0xff]  ;;  %v63_v51 = vld [vmem:[%s9946_s0 + $0x210] sm:$0xff] }
  0x45   :  { %v64_v52 = vld [vmem:[%s9946_s0 + $0x218] sm:$0xff]  ;;  %v70_v31 = vld [vmem:[%s9946_s0 + $0x260] sm:$0xff] }
  0x46   :  { %v7693_v2 = vpack.c.bf16 %v64_v52, %v63_v51 }
  0x49   :  { %6543 = vmatmul.mubr.msk.bf16.vlgmr.msra.gmra.mxu0 %vm218_vm2, %v1064_v8  ;;  %v43_v8 = vld [vmem:[%s9946_s0 + $0xf0] sm:$0xff] }
  0x4a   :  { %6477 = vmatmul.mubr.msk.bf16.vlgmr.msra.gmra.mxu1 %vm218_vm2, %v7372_v7  ;;  %6673 = vmatpush3.bf16.msra.mxu0 %v7201_v62  ;;  %v1008_v62 = vld [vmem:[%s9946_s0 + $0x6a] sm:$0xff] }
  0x4b   :  { %6607 = vmatpush3.bf16.msra.mxu1 %v7198_v61  ;;  %6480 = vmatprep.mubr.msk.bf16.mxu1 %vm218_vm2, %v7374_v9  ;;  %v1007_v61 = vld [vmem:[%s9946_s0 + $0x62] sm:$0xff] }
  0x4c   :  { %6546 = vmatprep.mubr.msk.bf16.mxu0 %vm218_vm2, %v1065_v10  ;;  %6738 = vmatprep.subr.bf16.mxu1 %v7403_v21  ;;  %v1067_v30 = vpack.c.bf16 %v1008_v62, %v1007_v61  ;;  %v44_v10 = vld [vmem:[%s9946_s0 + $0xf8] sm:$0xff]  ;;  %v46_v61 = vld [vmem:[%s9946_s0 + $0x110] sm:$0xff] }
  0x4d   :  { %6804 = vmatprep.subr.bf16.mxu0 %v7419_v23  ;;  %v7526_v18 = vpack.c.bf16 %v44_v10, %v43_v8  ;;  %v1021_v62 = vld [vmem:[%s9946_s0 + $0x10a] sm:$0xff]  ;;  %v7558_v33 = vpack.c.bf16 %v46_v61, %v45_v20  ;;  %v1031_v8 = vld [vmem:[%s9946_s0 + $0x1b2] sm:$0xff]  ;;  %v1032_v10 = vld [vmem:[%s9946_s0 + $0x1ba] sm:$0xff] }
  0x4e   :  { %v1074_v34 = vpack.c.bf16 %v1022_v22, %v1021_v62  ;;  %v57_v20 = vld [vmem:[%s9946_s0 + $0x1c8] sm:$0xff]  ;;  %v58_v61 = vld [vmem:[%s9946_s0 + $0x1d0] sm:$0xff] }
  0x4f   :  { %v1033_v62 = vld [vmem:[%s9946_s0 + $0x1ca] sm:$0xff]  ;;  %v1034_v22 = vld [vmem:[%s9946_s0 + $0x1d2] sm:$0xff] }
  0x51   :  { %6547 = vmatmul.mubr.msk.bf16.gmra.mxu0 %vm218_vm2, %v1066_v27  ;;  %v47_v27 = vld [vmem:[%s9946_s0 + $0x120] sm:$0xff] }
  0x52   :  { %6481 = vmatmul.mubr.msk.bf16.gmra.mxu1 %vm218_vm2, %v7421_v24  ;;  %6550 = vmatprep.mubr.msk.bf16.mxu0 %vm218_vm2, %v1067_v30  ;;  %v48_v30 = vld [vmem:[%s9946_s0 + $0x128] sm:$0xff] }
  0x53   :  { %6484 = vmatprep.mubr.msk.bf16.mxu1 %vm218_vm2, %v7423_v29  ;;  %v7560_v36 = vpack.c.bf16 %v48_v30, %v47_v27  ;;  %v59_v27 = vld [vmem:[%s9946_s0 + $0x1e0] sm:$0xff]  ;;  %v60_v30 = vld [vmem:[%s9946_s0 + $0x1e8] sm:$0xff] }
  0x54   :  { %v7659_v39 = vpack.c.bf16 %v60_v30, %v59_v27  ;;  %v69_v30 = vld [vmem:[%s9946_s0 + $0x258] sm:$0xff] }
  0x59   :  { %6551 = vmatmul.mubr.msk.bf16.gmra.mxu0 %vm218_vm2, %v1068_v44  ;;  %v1025_v44 = vld [vmem:[%s9946_s0 + $0x13a] sm:$0xff] }
  0x5a   :  { %6485 = vmatmul.mubr.msk.bf16.gmra.mxu1 %vm218_vm2, %v7456_v43  ;;  %6554 = vmatprep.mubr.msk.bf16.mxu0 %vm218_vm2, %v1069_v46  ;;  %v1026_v46 = vld [vmem:[%s9946_s0 + $0x142] sm:$0xff] }
  0x5b   :  { %6488 = vmatprep.mubr.msk.bf16.mxu1 %vm218_vm2, %v7458_v45  ;;  %v1076_v55 = vpack.c.bf16 %v1026_v46, %v1025_v44  ;;  %v61_v44 = vld [vmem:[%s9946_s0 + $0x1f8] sm:$0xff]  ;;  %v62_v46 = vld [vmem:[%s9946_s0 + $0x200] sm:$0xff] }
  0x61   :  { %6555 = vmatmul.mubr.msk.bf16.gmra.mxu0 %vm218_vm2, %v1070_v59  ;;  %v53_v59 = vld [vmem:[%s9946_s0 + $0x168] sm:$0xff] }
  0x62   :  { %6489 = vmatmul.mubr.msk.bf16.gmra.mxu1 %vm218_vm2, %v7490_v58  ;;  %6558 = vmatprep.mubr.msk.bf16.mxu0 %vm218_vm2, %v1071_v0  ;;  %v54_v0 = vld [vmem:[%s9946_s0 + $0x170] sm:$0xff] }
  0x63   :  { %6492 = vmatprep.mubr.msk.bf16.mxu1 %vm218_vm2, %v7492_v60  ;;  %v7626_v11 = vpack.c.bf16 %v54_v0, %v53_v59  ;;  %v7691_v59 = vpack.c.bf16 %v62_v46, %v61_v44  ;;  %v1082_v0 = vpack.c.bf16 %v1038_v50, %v1037_v48  ;;  %v72_v44 = vld [vmem:[%s9946_s0 + $0x278] sm:$0xff]  ;;  %v7759_v50 = vpack.c.bf16 %v70_v31, %v69_v30  ;;  %v78_v30 = vld [vmem:[%s9946_s0 + $0x2c0] sm:$0xff] }
  0x64   :  { %v1047_v46 = vld [vmem:[%s9946_s0 + $0x272] sm:$0xff]  ;;  %v1048_v48 = vld [vmem:[%s9946_s0 + $0x27a] sm:$0xff] }
  0x65   :  { %v1053_v31 = vld [vmem:[%s9946_s0 + $0x2ba] sm:$0xff] }
  0x69   :  { %6559 = vmatmul.mubr.msk.bf16.gmra.mxu0 %vm218_vm2, %v1072_v17  ;;  %v103_v17 = vpack.c.bf16 %v56_v6, %v55_v4  ;;  %v65_v4 = vld [vmem:[%s9946_s0 + $0x228] sm:$0xff]  ;;  %v66_v6 = vld [vmem:[%s9946_s0 + $0x230] sm:$0xff] }
  0x6a   :  { %6493 = vmatmul.mubr.msk.bf16.gmra.mxu1 %vm218_vm2, %v7524_v16  ;;  %6562 = vmatprep.mubr.msk.bf16.mxu0 %vm218_vm2, %v1073_v19  ;;  %v1079_v19 = vpack.c.bf16 %v1032_v10, %v1031_v8  ;;  %v1041_v8 = vld [vmem:[%s9946_s0 + $0x22a] sm:$0xff]  ;;  %v1042_v10 = vld [vmem:[%s9946_s0 + $0x232] sm:$0xff] }
  0x6b   :  { %6496 = vmatprep.mubr.msk.bf16.mxu1 %vm218_vm2, %v7526_v18 }
  0x71   :  { %6563 = vmatmul.mubr.msk.bf16.gmra.mxu0 %vm218_vm2, %v1074_v34  ;;  %v7657_v34 = vpack.c.bf16 %v58_v61, %v57_v20  ;;  %v1044_v20 = vld [vmem:[%s9946_s0 + $0x24a] sm:$0xff]  ;;  %v7725_v61 = vpack.c.bf16 %v66_v6, %v65_v4  ;;  %v1050_v4 = vld [vmem:[%s9946_s0 + $0x292] sm:$0xff]  ;;  %v75_v6 = vld [vmem:[%s9946_s0 + $0x2a0] sm:$0xff] }
  0x72   :  { %6497 = vmatmul.mubr.msk.bf16.gmra.mxu1 %vm218_vm2, %v7558_v33  ;;  %6566 = vmatprep.mubr.msk.bf16.mxu0 %vm218_vm2, %v1075_v38  ;;  %v1080_v38 = vpack.c.bf16 %v1034_v22, %v1033_v62  ;;  %v1084_v62 = vpack.c.bf16 %v1042_v10, %v1041_v8  ;;  %v76_v8 = vld [vmem:[%s9946_s0 + $0x2a8] sm:$0xff] }
  0x73   :  { %6500 = vmatprep.mubr.msk.bf16.mxu1 %vm218_vm2, %v7560_v36  ;;  %v1051_v10 = vld [vmem:[%s9946_s0 + $0x2a2] sm:$0xff] }
  0x79   :  { %6567 = vmatmul.mubr.msk.bf16.gmra.mxu0 %vm218_vm2, %v1076_v55  ;;  %v1039_v55 = vld [vmem:[%s9946_s0 + $0x212] sm:$0xff] }
  0x7a   :  { %6501 = vmatmul.mubr.msk.bf16.gmra.mxu1 %vm218_vm2, %v7592_v53  ;;  %6570 = vmatprep.mubr.msk.bf16.mxu0 %vm218_vm2, %v1077_v57  ;;  %v1040_v57 = vld [vmem:[%s9946_s0 + $0x21a] sm:$0xff] }
  0x7b   :  { %6504 = vmatprep.mubr.msk.bf16.mxu1 %vm218_vm2, %v7594_v56  ;;  %v1083_v3 = vpack.c.bf16 %v1040_v57, %v1039_v55  ;;  %v1087_v55 = vpack.c.bf16 %v1048_v48, %v1047_v46  ;;  %v73_v57 = vld [vmem:[%s9946_s0 + $0x288] sm:$0xff]  ;;  %v1056_v46 = vld [vmem:[%s9946_s0 + $0x2da] sm:$0xff] }
  0x81   :  { %6571 = vmatmul.mubr.msk.bf16.gmra.mxu0 %vm218_vm2, %v1078_v13  ;;  %v67_v13 = vld [vmem:[%s9946_s0 + $0x240] sm:$0xff] }
  0x82   :  { %6505 = vmatmul.mubr.msk.bf16.gmra.mxu1 %vm218_vm2, %v7626_v11  ;;  %6574 = vmatprep.mubr.msk.bf16.mxu0 %vm218_vm2, %v1079_v19  ;;  %v1043_v19 = vld [vmem:[%s9946_s0 + $0x242] sm:$0xff] }
  0x83   :  { %6508 = vmatprep.mubr.msk.bf16.mxu1 %vm218_vm2, %v103_v17  ;;  %v68_v17 = vld [vmem:[%s9946_s0 + $0x248] sm:$0xff]  ;;  %v1085_v27 = vpack.c.bf16 %v1044_v20, %v1043_v19  ;;  %v7795_v20 = vpack.c.bf16 %v76_v8, %v75_v6  ;;  %v1058_v6 = vld [vmem:[%s9946_s0 + $0x2f2] sm:$0xff]  ;;  %v83_v8 = vld [vmem:[%s9946_s0 + $0x300] sm:$0xff] }
  0x84   :  { %v7727_v22 = vpack.c.bf16 %v68_v17, %v67_v13  ;;  %v1052_v13 = vld [vmem:[%s9946_s0 + $0x2aa] sm:$0xff] }
  0x89   :  { %6575 = vmatmul.mubr.msk.bf16.gmra.mxu0 %vm218_vm2, %v1080_v38  ;;  %v1046_v38 = vld [vmem:[%s9946_s0 + $0x262] sm:$0xff] }
  0x8a   :  { %6509 = vmatmul.mubr.msk.bf16.gmra.mxu1 %vm218_vm2, %v7657_v34  ;;  %6578 = vmatprep.mubr.msk.bf16.mxu0 %vm218_vm2, %v1081_v41  ;;  %v71_v41 = vld [vmem:[%s9946_s0 + $0x270] sm:$0xff]  ;;  %v1086_v51 = vpack.c.bf16 %v1046_v38, %v1045_v32  ;;  %v1054_v32 = vld [vmem:[%s9946_s0 + $0x2c2] sm:$0xff] }
  0x8b   :  { %6512 = vmatprep.mubr.msk.bf16.mxu1 %vm218_vm2, %v7659_v39  ;;  %v7761_v52 = vpack.c.bf16 %v72_v44, %v71_v41  ;;  %v79_v38 = vld [vmem:[%s9946_s0 + $0x2d0] sm:$0xff]  ;;  %v80_v41 = vld [vmem:[%s9946_s0 + $0x2d8] sm:$0xff] }
  0x8c   :  { %v1055_v44 = vld [vmem:[%s9946_s0 + $0x2d2] sm:$0xff] }
  0x91   :  { %6579 = vmatmul.mubr.msk.bf16.gmra.mxu0 %vm218_vm2, %v1082_v0  ;;  %v74_v0 = vld [vmem:[%s9946_s0 + $0x290] sm:$0xff] }
  0x92   :  { %6513 = vmatmul.mubr.msk.bf16.gmra.mxu1 %vm218_vm2, %v7691_v59  ;;  %6582 = vmatprep.mubr.msk.bf16.mxu0 %vm218_vm2, %v1083_v3  ;;  %v1049_v3 = vld [vmem:[%s9946_s0 + $0x28a] sm:$0xff]  ;;  %v7793_v17 = vpack.c.bf16 %v74_v0, %v73_v57  ;;  %v1091_v57 = vpack.c.bf16 %v1056_v46, %v1055_v44  ;;  %v1062_v44 = vld [vmem:[%s9946_s0 + $0x322] sm:$0xff] }
  0x93   :  { %6516 = vmatprep.mubr.msk.bf16.mxu1 %vm218_vm2, %v7693_v2  ;;  %v1088_v19 = vpack.c.bf16 %v1050_v4, %v1049_v3  ;;  %v81_v0 = vld [vmem:[%s9946_s0 + $0x2e8] sm:$0xff]  ;;  %v82_v3 = vld [vmem:[%s9946_s0 + $0x2f0] sm:$0xff] }
  0x94   :  { %v1057_v4 = vld [vmem:[%s9946_s0 + $0x2ea] sm:$0xff] }
  0x99   :  { %6583 = vmatmul.mubr.msk.bf16.gmra.mxu0 %vm218_vm2, %v1084_v62  ;;  %v1089_v62 = vpack.c.bf16 %v1052_v13, %v1051_v10  ;;  %v84_v10 = vld [vmem:[%s9946_s0 + $0x308] sm:$0xff] }
  0x9a   :  { %6517 = vmatmul.mubr.msk.bf16.gmra.mxu1 %vm218_vm2, %v7725_v61  ;;  %6586 = vmatprep.mubr.msk.bf16.mxu0 %vm218_vm2, %v1085_v27  ;;  %v77_v27 = vld [vmem:[%s9946_s0 + $0x2b8] sm:$0xff]  ;;  %v1059_v13 = vld [vmem:[%s9946_s0 + $0x302] sm:$0xff] }
  0x9b   :  { %6520 = vmatprep.mubr.msk.bf16.mxu1 %vm218_vm2, %v7727_v22  ;;  %v7827_v48 = vpack.c.bf16 %v78_v30, %v77_v27  ;;  %v1092_v27 = vpack.c.bf16 %v1058_v6, %v1057_v4  ;;  %v7863_v30 = vpack.c.bf16 %v84_v10, %v83_v8 }
  0xa1   :  { %6587 = vmatmul.mubr.msk.bf16.gmra.mxu0 %vm218_vm2, %v1086_v51  ;;  %v1090_v51 = vpack.c.bf16 %v1054_v32, %v1053_v31  ;;  %v85_v32 = vld [vmem:[%s9946_s0 + $0x318] sm:$0xff] }
  0xa2   :  { %6521 = vmatmul.mubr.msk.bf16.gmra.mxu1 %vm218_vm2, %v7759_v50  ;;  %6590 = vmatprep.mubr.msk.bf16.mxu0 %vm218_vm2, %v1087_v55  ;;  %v7829_v55 = vpack.c.bf16 %v80_v41, %v79_v38  ;;  %v86_v38 = vld [vmem:[%s9946_s0 + $0x320] sm:$0xff] }
  0xa3   :  { %6524 = vmatprep.mubr.msk.bf16.mxu1 %vm218_vm2, %v7761_v52  ;;  %v1061_v41 = vld [vmem:[%s9946_s0 + $0x31a] sm:$0xff]  ;;  %v7883_v46 = vpack.c.bf16 %v86_v38, %v85_v32 }
  0xa9   :  { %6591 = vmatmul.mubr.msk.bf16.gmra.mxu0 %vm218_vm2, %v1088_v19  ;;  %v1060_v19 = vld [vmem:[%s9946_s0 + $0x30a] sm:$0xff] }
  0xaa   :  { %6525 = vmatmul.mubr.msk.bf16.gmra.mxu1 %vm218_vm2, %v7793_v17  ;;  %6594 = vmatprep.mubr.msk.bf16.mxu0 %vm218_vm2, %v1089_v62  ;;  %v7861_v62 = vpack.c.bf16 %v82_v3, %v81_v0  ;;  %v1093_v31 = vpack.c.bf16 %v1060_v19, %v1059_v13 }
  0xab   :  { %6528 = vmatprep.mubr.msk.bf16.mxu1 %vm218_vm2, %v7795_v20 }
  0xb1   :  { %6595 = vmatmul.mubr.msk.bf16.gmra.mxu0 %vm218_vm2, %v1090_v51  ;;  %v1094_v51 = vpack.c.bf16 %v1062_v44, %v1061_v41 }
  0xb2   :  { %6529 = vmatmul.mubr.msk.bf16.gmra.mxu1 %vm218_vm2, %v7827_v48  ;;  %6598 = vmatprep.mubr.msk.bf16.mxu0 %vm218_vm2, %v1091_v57 }
  0xb3   :  { %6532 = vmatprep.mubr.msk.bf16.mxu1 %vm218_vm2, %v7829_v55 }
  0xb9   :  { %6599 = vmatmul.mubr.msk.bf16.gmra.mxu0 %vm218_vm2, %v1092_v27 }
  0xba   :  { %6533 = vmatmul.mubr.msk.bf16.gmra.mxu1 %vm218_vm2, %v7861_v62  ;;  %6602 = vmatprep.mubr.msk.bf16.mxu0 %vm218_vm2, %v1093_v31 }
  0xbb   :  { %6536 = vmatprep.mubr.msk.bf16.mxu1 %vm218_vm2, %v7863_v30 }
  0xc1   :  { %6603 = vmatmul.mubr.msk.bf16.gmra.mxu0 %vm218_vm2, %v1094_v51 }
  0xc2   :  { %6537 = vmatmul.mubr.msk.bf16.gmra.mxu1 %vm218_vm2, %v7883_v46  ;;  %6674 = vmatprep.mubr.msk.bf16.mxu0 %vm218_vm2, %v7068_v15  ;;  %v5979_v15 = vld [vmem:[%s9945_s1 + $0xe] sm:$0x3] }
  0xc3   :  { %6608 = vmatprep.mubr.msk.bf16.mxu1 %vm218_vm2, %v7372_v7 }
  0xc9   :  { %v7892_v57 = vpop.f32.mrf.mxu0  ;;  %6675 = vmatmul.mubr.msk.bf16.vlgmr.msra.gmra.mxu0 %vm218_vm2, %v7091_v25 }
  0xca   :  { %v7894_v0 = vpop.f32.mrf.mxu1  ;;  %6609 = vmatmul.mubr.msk.bf16.vlgmr.msra.gmra.mxu1 %vm218_vm2, %v7374_v9  ;;  %6805 = vmatpush3.bf16.msra.mxu0 %v7419_v23  ;;  %v6076_v23 = vld [vmem:[%s9945_s1 + $0x10] sm:$0x3] }
  0xcb   :  { %9972 = vst [vmem:[#allocation4_spill] sm:$0xff] %v7894_v0  ;;  %6739 = vmatpush3.bf16.msra.mxu1 %v7403_v21  ;;  %v7902_v3 = vpop.f32.mrf.mxu0  ;;  %6612 = vmatprep.mubr.msk.bf16.mxu1 %vm218_vm2, %v7421_v24  ;;  %v7918_v21 = vand.u32 %v5979_v15, %v7046_v5 }
  0xcc   :  { %v7904_v7 = vpop.f32.mrf.mxu1  ;;  %6678 = vmatprep.mubr.msk.bf16.mxu0 %vm218_vm2, %v7123_v35  ;;  %v7929_v35 = vand.u32 %v6076_v23, %v7046_v5 }
  0xcd   :  { %9973 = vst [vmem:[#allocation5_spill] sm:$0xff] %v7904_v7  ;;  %v7913_v9 = vpop.f32.mrf.mxu0  ;;  %9975 = vst [vmem:[#allocation7_spill] sm:$0xff] %v7918_v21  ;;  %6870 = vmatprep.subr.bf16.mxu1 %v7918_v21 }
  0xce   :  { %v7915_v25 = vpop.f32.mrf.mxu1  ;;  %9977 = vst [vmem:[#allocation9_spill] sm:$0xff] %v7929_v35  ;;  %6936 = vmatprep.subr.bf16.mxu0 %v7929_v35 }
  0xcf   :  { %9974 = vst [vmem:[#allocation6_spill] sm:$0xff] %v7915_v25  ;;  %v7923_v4 = vpop.f32.mrf.mxu0 }
  0xd0   :  { %v7925_v24 = vpop.f32.mrf.mxu1 }
  0xd1   :  { %9976 = vst [vmem:[#allocation8_spill] sm:$0xff] %v7925_v24  ;;  %v7931_v6 = vpop.f32.mrf.mxu0  ;;  %6679 = vmatmul.mubr.msk.bf16.gmra.mxu0 %vm218_vm2, %v7125_v37 }
  0xd2   :  { %v7933_v8 = vpop.f32.mrf.mxu1  ;;  %6613 = vmatmul.mubr.msk.bf16.gmra.mxu1 %vm218_vm2, %v7423_v29  ;;  %6682 = vmatprep.mubr.msk.bf16.mxu0 %vm218_vm2, %v7157_v47 }
  0xd3   :  { %9978 = vst [vmem:[#allocation10_spill] sm:$0xff] %v7933_v8  ;;  %6616 = vmatprep.mubr.msk.bf16.mxu1 %vm218_vm2, %v7456_v43  ;;  %v7943_v10 = vpop.f32.mrf.mxu0 }
  0xd4   :  { %v7945_v5 = vpop.f32.mrf.mxu1 }
  0xd5   :  { %9979 = vst [vmem:[#allocation11_spill] sm:$0xff] %v7945_v5  ;;  %v7948_v13 = vpop.f32.mrf.mxu0 }
  0xd6   :  { %v7950_v19 = vpop.f32.mrf.mxu1 }
  0xd7   :  { %9980 = vst [vmem:[#allocation12_spill] sm:$0xff] %v7950_v19  ;;  %v7952_v29 = vpop.f32.mrf.mxu0 }
  0xd8   :  { %v7954_v27 = vpop.f32.mrf.mxu1 }
  0xd9   :  { %9981 = vst [vmem:[#allocation13_spill] sm:$0xff] %v7954_v27  ;;  %v7956_v37 = vpop.f32.mrf.mxu0  ;;  %6683 = vmatmul.mubr.msk.bf16.gmra.mxu0 %vm218_vm2, %v7159_v49 }
  0xda   :  { %v7958_v43 = vpop.f32.mrf.mxu1  ;;  %6617 = vmatmul.mubr.msk.bf16.gmra.mxu1 %vm218_vm2, %v7458_v45  ;;  %6686 = vmatprep.mubr.msk.bf16.mxu0 %vm218_vm2, %v7203_v63 }
  0xdb   :  { %9982 = vst [vmem:[#allocation14_spill] sm:$0xff] %v7958_v43  ;;  %6620 = vmatprep.mubr.msk.bf16.mxu1 %vm218_vm2, %v7490_v58  ;;  %v7968_v47 = vpop.f32.mrf.mxu0 }
  0xdc   :  { %v7970_v31 = vpop.f32.mrf.mxu1 }
  0xdd   :  { %9983 = vst [vmem:[#allocation15_spill] sm:$0xff] %v7970_v31  ;;  %v7972_v32 = vpop.f32.mrf.mxu0 }
  0xde   :  { %v7974_v38 = vpop.f32.mrf.mxu1 }
  0xdf   :  { %9984 = vst [vmem:[#allocation16_spill] sm:$0xff] %v7974_v38  ;;  %v7976_v41 = vpop.f32.mrf.mxu0 }
  0xe0   :  { %v7978_v45 = vpop.f32.mrf.mxu1 }
  0xe1   :  { %9985 = vst [vmem:[#allocation17_spill] sm:$0xff] %v7978_v45  ;;  %v7980_v44 = vpop.f32.mrf.mxu0  ;;  %6687 = vmatmul.mubr.msk.bf16.gmra.mxu0 %vm218_vm2, %v7207_v1 }
  0xe2   :  { %v7982_v49 = vpop.f32.mrf.mxu1  ;;  %6621 = vmatmul.mubr.msk.bf16.gmra.mxu1 %vm218_vm2, %v7492_v60  ;;  %6690 = vmatprep.mubr.msk.bf16.mxu0 %vm218_vm2, %v7239_v12 }
  0xe3   :  { %9986 = vst [vmem:[#allocation18_spill] sm:$0xff] %v7982_v49  ;;  %6624 = vmatprep.mubr.msk.bf16.mxu1 %vm218_vm2, %v7524_v16  ;;  %v7992_v63 = vpop.f32.mrf.mxu0 }
  0xe4   :  { %v7994_v58 = vpop.f32.mrf.mxu1 }
  0xe5   :  { %9987 = vst [vmem:[#allocation19_spill] sm:$0xff] %v7994_v58  ;;  %v7996_v51 = vpop.f32.mrf.mxu0 }
  0xe6   :  { %v7998_v15 = vpop.f32.mrf.mxu1 }
  0xe7   :  { %9988 = vst [vmem:[#allocation20_spill] sm:$0xff] %v7998_v15  ;;  %v8000_v23 = vpop.f32.mrf.mxu0 }
  0xe8   :  { %v8002_v60 = vpop.f32.mrf.mxu1 }
  0xe9   :  { %9989 = vst [vmem:[#allocation21_spill] sm:$0xff] %v8002_v60  ;;  %v8004_v49 = vpop.f32.mrf.mxu0  ;;  %6691 = vmatmul.mubr.msk.bf16.gmra.mxu0 %vm218_vm2, %v7241_v14 }
  0xea   :  { %v8006_v1 = vpop.f32.mrf.mxu1  ;;  %6625 = vmatmul.mubr.msk.bf16.gmra.mxu1 %vm218_vm2, %v7526_v18  ;;  %6694 = vmatprep.mubr.msk.bf16.mxu0 %vm218_vm2, %v7273_v26 }
  0xeb   :  { %9990 = vst [vmem:[#allocation22_spill] sm:$0xff] %v8006_v1  ;;  %6628 = vmatprep.mubr.msk.bf16.mxu1 %vm218_vm2, %v7558_v33  ;;  %v8016_v12 = vpop.f32.mrf.mxu0 }
  0xec   :  { %v8018_v16 = vpop.f32.mrf.mxu1 }
  0xed   :  { %9991 = vst [vmem:[#allocation23_spill] sm:$0xff] %v8018_v16  ;;  %v8020_v60 = vpop.f32.mrf.mxu0 }
  0xee   :  { %v8022_v15 = vpop.f32.mrf.mxu1 }
  0xef   :  { %9992 = vst [vmem:[#allocation24_spill] sm:$0xff] %v8022_v15  ;;  %v8024_v1 = vpop.f32.mrf.mxu0 }
  0xf0   :  { %v8026_v18 = vpop.f32.mrf.mxu1 }
  0xf1   :  { %9993 = vst [vmem:[#allocation25_spill] sm:$0xff] %v8026_v18  ;;  %v8028_v58 = vpop.f32.mrf.mxu0  ;;  %6695 = vmatmul.mubr.msk.bf16.gmra.mxu0 %vm218_vm2, %v7275_v28 }
  0xf2   :  { %v8030_v14 = vpop.f32.mrf.mxu1  ;;  %6629 = vmatmul.mubr.msk.bf16.gmra.mxu1 %vm218_vm2, %v7560_v36  ;;  %6698 = vmatprep.mubr.msk.bf16.mxu0 %vm218_vm2, %v7307_v40  ;;  %v5557_v40 = vld [vmem:[%s9946_s0 + $0x180] sm:$0xff] }
  0xf3   :  { %9994 = vst [vmem:[#allocation26_spill] sm:$0xff] %v8030_v14  ;;  %6632 = vmatprep.mubr.msk.bf16.mxu1 %vm218_vm2, %v7592_v53  ;;  %v8040_v26 = vpop.f32.mrf.mxu0  ;;  %v5558_v53 = vld [vmem:[%s9946_s0 + $0x188] sm:$0xff] }
  0xf4   :  { %v8042_v33 = vpop.f32.mrf.mxu1  ;;  %v8090_v45 = vpack.c.bf16 %v5558_v53, %v5557_v40  ;;  %v5658_v40 = vld [vmem:[%s9946_s0 + $0x1e1] sm:$0xff]  ;;  %v5659_v53 = vld [vmem:[%s9946_s0 + $0x1e9] sm:$0xff] }
  0xf5   :  { %9995 = vst [vmem:[#allocation27_spill] sm:$0xff] %v8042_v33  ;;  %v8044_v18 = vpop.f32.mrf.mxu0 }
  0xf6   :  { %v8046_v15 = vpop.f32.mrf.mxu1  ;;  %10001 = vst [vmem:[#allocation33_spill] sm:$0xff] %v8090_v45 }
  0xf7   :  { %9996 = vst [vmem:[#allocation28_spill] sm:$0xff] %v8046_v15  ;;  %v8048_v14 = vpop.f32.mrf.mxu0 }
  0xf8   :  { %v8050_v36 = vpop.f32.mrf.mxu1 }
  0xf9   :  { %9997 = vst [vmem:[#allocation29_spill] sm:$0xff] %v8050_v36  ;;  %v8052_v16 = vpop.f32.mrf.mxu0  ;;  %6699 = vmatmul.mubr.msk.bf16.gmra.mxu0 %vm218_vm2, %v7309_v42  ;;  %v5655_v42 = vld [vmem:[%s9946_s0 + $0x189] sm:$0xff] }
  0xfa   :  { %v8054_v28 = vpop.f32.mrf.mxu1  ;;  %6633 = vmatmul.mubr.msk.bf16.gmra.mxu1 %vm218_vm2, %v7594_v56  ;;  %6702 = vmatprep.mubr.msk.bf16.mxu0 %vm218_vm2, %v7341_v54  ;;  %v5654_v56 = vld [vmem:[%s9946_s0 + $0x181] sm:$0xff]  ;;  %v5656_v54 = vld [vmem:[%s9946_s0 + $0x1c9] sm:$0xff] }
  0xfb   :  { %9998 = vst [vmem:[#allocation30_spill] sm:$0xff] %v8054_v28  ;;  %6636 = vmatprep.mubr.msk.bf16.mxu1 %vm218_vm2, %v7626_v11  ;;  %v8076_v28 = vpop.f32.mrf.mxu0  ;;  %v5657_v11 = vld [vmem:[%s9946_s0 + $0x1d1] sm:$0xff]  ;;  %v2179_v38 = vpack.c.bf16 %v5655_v42, %v5654_v56 }
  0xfc   :  { %v8078_v36 = vpop.f32.mrf.mxu1  ;;  %v2180_v31 = vpack.c.bf16 %v5657_v11, %v5656_v54  ;;  %v2181_v11 = vpack.c.bf16 %v5659_v53, %v5658_v40  ;;  %v5662_v40 = vld [vmem:[%s9946_s0 + $0x211] sm:$0xff]  ;;  %v5663_v53 = vld [vmem:[%s9946_s0 + $0x219] sm:$0xff] }
  0xfd   :  { %9999 = vst [vmem:[#allocation31_spill] sm:$0xff] %v8078_v36  ;;  %v8086_v15 = vpop.f32.mrf.mxu0 }
  0xfe   :  { %v8088_v33 = vpop.f32.mrf.mxu1 }
  0xff   :  { %10000 = vst [vmem:[#allocation32_spill] sm:$0xff] %v8088_v33  ;;  %v8092_v43 = vpop.f32.mrf.mxu0 }
 0x100   :  { %v8094_v27 = vpop.f32.mrf.mxu1 }
 0x101   :  { %10002 = vst [vmem:[#allocation34_spill] sm:$0xff] %v8094_v27  ;;  %v8096_v36 = vpop.f32.mrf.mxu0  ;;  %6703 = vmatmul.mubr.msk.bf16.gmra.mxu0 %vm218_vm2, %v2179_v38  ;;  %v5660_v38 = vld [vmem:[%s9946_s0 + $0x1f9] sm:$0xff] }
 0x102   :  { %v8098_v19 = vpop.f32.mrf.mxu1  ;;  %6637 = vmatmul.mubr.msk.bf16.gmra.mxu1 %vm218_vm2, %v8090_v45  ;;  %6706 = vmatprep.mubr.msk.bf16.mxu0 %vm218_vm2, %v2180_v31 }
 0x103   :  { %10003 = vst [vmem:[#allocation35_spill] sm:$0xff] %v8098_v19  ;;  %6640 = vmatprep.mubr.msk.bf16.mxu1 %vm218_vm2, %v7657_v34  ;;  %v8112_v56 = vpop.f32.mrf.mxu0  ;;  %v5661_v34 = vld [vmem:[%s9946_s0 + $0x201] sm:$0xff] }
 0x104   :  { %v8114_v42 = vpop.f32.mrf.mxu1  ;;  %v2182_v19 = vpack.c.bf16 %v5661_v34, %v5660_v38 }
 0x105   :  { %10004 = vst [vmem:[#allocation36_spill] sm:$0xff] %v8114_v42  ;;  %v8122_v31 = vpop.f32.mrf.mxu0 }
 0x106   :  { %v8124_v54 = vpop.f32.mrf.mxu1 }
 0x107   :  { %10005 = vst [vmem:[#allocation37_spill] sm:$0xff] %v8124_v54  ;;  %v8126_v27 = vpop.f32.mrf.mxu0 }
 0x108   :  { %10006 = vst [vmem:[#allocation38_spill] sm:$0xff] %v8126_v27  ;;  %v8128_v33 = vpop.f32.mrf.mxu1 }
 0x109   :  { %10007 = vst [vmem:[#allocation39_spill] sm:$0xff] %v8128_v33  ;;  %v6544_v42 = vpop.f32.mrf.mxu0  ;;  %6707 = vmatmul.mubr.msk.bf16.gmra.mxu0 %vm218_vm2, %v2181_v11  ;;  %v2183_v33 = vpack.c.bf16 %v5663_v53, %v5662_v40 }
 0x10a   :  { %v6478_v45 = vpop.f32.mrf.mxu1  ;;  %6641 = vmatmul.mubr.msk.bf16.gmra.mxu1 %vm218_vm2, %v7659_v39  ;;  %6710 = vmatprep.mubr.msk.bf16.mxu0 %vm218_vm2, %v2182_v19  ;;  %v5664_v39 = vld [vmem:[%s9946_s0 + $0x229] sm:$0xff] }
 0x10b   :  { %v753_v5 = vadd.f32 %v6478_v45, %v7892_v57  ;;  %6644 = vmatprep.mubr.msk.bf16.mxu1 %vm218_vm2, %v7691_v59  ;;  %v1230_v34 = vpop.f32.mrf.mxu0  ;;  %v5665_v59 = vld [vmem:[%s9946_s0 + $0x231] sm:$0xff] }
 0x10c   :  { %v744_v38 = vpop.f32.mrf.mxu1  ;;  %v2184_v24 = vpack.c.bf16 %v5665_v59, %v5664_v39 }
 0x10d   :  { %v8149_v57 = vadd.f32 %v6544_v42, %v753_v5  ;;  %v745_v19 = vadd.f32 %v744_v38, %v7902_v3  ;;  %v6545_v11 = vpop.f32.mrf.mxu0 }
 0x10e   :  { %v6479_v45 = vpop.f32.mrf.mxu1 }
 0x10f   :  { %v8152_v54 = vadd.f32 %v1230_v34, %v745_v19  ;;  %v756_v8 = vadd.f32 %v6479_v45, %v7913_v9  ;;  %v1233_v7 = vpop.f32.mrf.mxu0  ;;  %v5666_v9 = vld [vmem:[%s9946_s0 + $0x241] sm:$0xff] }
 0x110   :  { %v747_v25 = vpop.f32.mrf.mxu1 }
 0x111   :  { %v8155_v35 = vadd.f32 %v6545_v11, %v756_v8  ;;  %v748_v21 = vadd.f32 %v747_v25, %v7923_v4  ;;  %v6548_v27 = vpop.f32.mrf.mxu0  ;;  %6711 = vmatmul.mubr.msk.bf16.gmra.mxu0 %vm218_vm2, %v2183_v33  ;;  %v5667_v25 = vld [vmem:[%s9946_s0 + $0x249] sm:$0xff] }
 0x112   :  { %v6482_v0 = vpop.f32.mrf.mxu1  ;;  %6645 = vmatmul.mubr.msk.bf16.gmra.mxu1 %vm218_vm2, %v7693_v2  ;;  %6714 = vmatprep.mubr.msk.bf16.mxu0 %vm218_vm2, %v2184_v24  ;;  %v2185_v8 = vpack.c.bf16 %v5667_v25, %v5666_v9  ;;  %v5672_v11 = vld [vmem:[%s9946_s0 + $0x289] sm:$0xff] }
 0x113   :  { %v8161_v3 = vadd.f32 %v1233_v7, %v748_v21  ;;  %v769_v5 = vadd.f32 %v6482_v0, %v7931_v6  ;;  %6648 = vmatprep.mubr.msk.bf16.mxu1 %vm218_vm2, %v7725_v61  ;;  %v1246_v4 = vpop.f32.mrf.mxu0  ;;  %v5668_v7 = vld [vmem:[%s9946_s0 + $0x259] sm:$0xff]  ;;  %v5669_v61 = vld [vmem:[%s9946_s0 + $0x261] sm:$0xff] }
 0x114   :  { %v760_v2 = vpop.f32.mrf.mxu1  ;;  %v2186_v40 = vpack.c.bf16 %v5669_v61, %v5668_v7 }
 0x115   :  { %v8179_v0 = vadd.f32 %v6548_v27, %v769_v5  ;;  %v761_v21 = vadd.f32 %v760_v2, %v7943_v10  ;;  %v6549_v6 = vpop.f32.mrf.mxu0 }
 0x116   :  { %v6483_v24 = vpop.f32.mrf.mxu1 }
 0x117   :  { %v8182_v33 = vadd.f32 %v1246_v4, %v761_v21  ;;  %v772_v42 = vadd.f32 %v6483_v24, %v7948_v13  ;;  %v1249_v38 = vpop.f32.mrf.mxu0  ;;  %v5670_v13 = vld [vmem:[%s9946_s0 + $0x271] sm:$0xff] }
 0x118   :  { %v763_v53 = vpop.f32.mrf.mxu1 }
 0x119   :  { %v8185_v34 = vadd.f32 %v6549_v6, %v772_v42  ;;  %v764_v39 = vadd.f32 %v763_v53, %v7952_v29  ;;  %v6552_v19 = vpop.f32.mrf.mxu0  ;;  %6715 = vmatmul.mubr.msk.bf16.gmra.mxu0 %vm218_vm2, %v2185_v8  ;;  %v5671_v29 = vld [vmem:[%s9946_s0 + $0x279] sm:$0xff] }
 0x11a   :  { %v6486_v59 = vpop.f32.mrf.mxu1  ;;  %6649 = vmatmul.mubr.msk.bf16.gmra.mxu1 %vm218_vm2, %v7727_v22  ;;  %6718 = vmatprep.mubr.msk.bf16.mxu0 %vm218_vm2, %v2186_v40  ;;  %v2187_v2 = vpack.c.bf16 %v5671_v29, %v5670_v13 }
 0x11b   :  { %v8191_v10 = vadd.f32 %v1249_v38, %v764_v39  ;;  %v785_v27 = vadd.f32 %v6486_v59, %v7956_v37  ;;  %6652 = vmatprep.mubr.msk.bf16.mxu1 %vm218_vm2, %v7759_v50  ;;  %v1262_v45 = vpop.f32.mrf.mxu0  ;;  %v5673_v50 = vld [vmem:[%s9946_s0 + $0x291] sm:$0xff]  ;;  %v5676_v39 = vld [vmem:[%s9946_s0 + $0x2b9] sm:$0xff] }
 0x11c   :  { %v776_v22 = vpop.f32.mrf.mxu1  ;;  %v2188_v61 = vpack.c.bf16 %v5673_v50, %v5672_v11 }
 0x11d   :  { %v8209_v37 = vadd.f32 %v6552_v19, %v785_v27  ;;  %v777_v5 = vadd.f32 %v776_v22, %v7968_v47  ;;  %v6553_v25 = vpop.f32.mrf.mxu0 }
 0x11e   :  { %v6487_v9 = vpop.f32.mrf.mxu1 }
 0x11f   :  { %v8212_v4 = vadd.f32 %v1262_v45, %v777_v5  ;;  %v788_v7 = vadd.f32 %v6487_v9, %v7972_v32  ;;  %v1265_v24 = vpop.f32.mrf.mxu0  ;;  %v5674_v32 = vld [vmem:[%s9946_s0 + $0x2a1] sm:$0xff] }
 0x120   :  { %v779_v21 = vpop.f32.mrf.mxu1 }
 0x121   :  { %v8215_v6 = vadd.f32 %v6553_v25, %v788_v7  ;;  %v780_v8 = vadd.f32 %v779_v21, %v7976_v41  ;;  %v6556_v40 = vpop.f32.mrf.mxu0  ;;  %6719 = vmatmul.mubr.msk.bf16.gmra.mxu0 %vm218_vm2, %v2187_v2  ;;  %v5675_v41 = vld [vmem:[%s9946_s0 + $0x2a9] sm:$0xff] }
 0x122   :  { %v6490_v42 = vpop.f32.mrf.mxu1  ;;  %6653 = vmatmul.mubr.msk.bf16.gmra.mxu1 %vm218_vm2, %v7761_v52  ;;  %6722 = vmatprep.mubr.msk.bf16.mxu0 %vm218_vm2, %v2188_v61  ;;  %v2189_v13 = vpack.c.bf16 %v5675_v41, %v5674_v32  ;;  %v5680_v21 = vld [vmem:[%s9946_s0 + $0x2e9] sm:$0xff] }
 0x123   :  { %v8221_v47 = vadd.f32 %v1265_v24, %v780_v8  ;;  %v801_v53 = vadd.f32 %v6490_v42, %v7980_v44  ;;  %6656 = vmatprep.mubr.msk.bf16.mxu1 %vm218_vm2, %v7793_v17  ;;  %v1278_v38 = vpop.f32.mrf.mxu0  ;;  %v5677_v17 = vld [vmem:[%s9946_s0 + $0x2c1] sm:$0xff] }
 0x124   :  { %v792_v52 = vpop.f32.mrf.mxu1  ;;  %v2190_v45 = vpack.c.bf16 %v5677_v17, %v5676_v39 }
 0x125   :  { %v8239_v44 = vadd.f32 %v6556_v40, %v801_v53  ;;  %v793_v59 = vadd.f32 %v792_v52, %v7992_v63  ;;  %v6557_v27 = vpop.f32.mrf.mxu0 }
 0x126   :  { %v6491_v19 = vpop.f32.mrf.mxu1 }
 0x127   :  { %v8242_v29 = vadd.f32 %v1278_v38, %v793_v59  ;;  %v804_v22 = vadd.f32 %v6491_v19, %v7996_v51  ;;  %v1281_v50 = vpop.f32.mrf.mxu0  ;;  %v5678_v51 = vld [vmem:[%s9946_s0 + $0x2d1] sm:$0xff] }
 0x128   :  { %v795_v11 = vpop.f32.mrf.mxu1 }
 0x129   :  { %v8245_v5 = vadd.f32 %v6557_v27, %v804_v22  ;;  %v796_v9 = vadd.f32 %v795_v11, %v8000_v23  ;;  %v6560_v2 = vpop.f32.mrf.mxu0  ;;  %6723 = vmatmul.mubr.msk.bf16.gmra.mxu0 %vm218_vm2, %v2189_v13  ;;  %v5679_v23 = vld [vmem:[%s9946_s0 + $0x2d9] sm:$0xff] }
 0x12a   :  { %v6494_v25 = vpop.f32.mrf.mxu1  ;;  %6657 = vmatmul.mubr.msk.bf16.gmra.mxu1 %vm218_vm2, %v7795_v20  ;;  %6726 = vmatprep.mubr.msk.bf16.mxu0 %vm218_vm2, %v2190_v45  ;;  %v2191_v40 = vpack.c.bf16 %v5679_v23, %v5678_v51  ;;  %v5684_v22 = vld [vmem:[%s9946_s0 + $0x319] sm:$0xff] }
 0x12b   :  { %v8251_v63 = vadd.f32 %v1281_v50, %v796_v9  ;;  %v817_v7 = vadd.f32 %v6494_v25, %v8004_v49  ;;  %6660 = vmatprep.mubr.msk.bf16.mxu1 %vm218_vm2, %v7827_v48  ;;  %v1294_v61 = vpop.f32.mrf.mxu0  ;;  %v5681_v48 = vld [vmem:[%s9946_s0 + $0x2f1] sm:$0xff] }
 0x12c   :  { %v808_v20 = vpop.f32.mrf.mxu1  ;;  %v2192_v41 = vpack.c.bf16 %v5681_v48, %v5680_v21 }
 0x12d   :  { %v8269_v49 = vadd.f32 %v6560_v2, %v817_v7  ;;  %v809_v24 = vadd.f32 %v808_v20, %v8016_v12  ;;  %v6561_v42 = vpop.f32.mrf.mxu0 }
 0x12e   :  { %v6495_v8 = vpop.f32.mrf.mxu1 }
 0x12f   :  { %v8272_v53 = vadd.f32 %v1294_v61, %v809_v24  ;;  %v820_v32 = vadd.f32 %v6495_v8, %v8020_v60  ;;  %v1297_v38 = vpop.f32.mrf.mxu0  ;;  %v5682_v60 = vld [vmem:[%s9946_s0 + $0x301] sm:$0xff] }
 0x130   :  { %v811_v52 = vpop.f32.mrf.mxu1 }
 0x131   :  { %v8275_v39 = vadd.f32 %v6561_v42, %v820_v32  ;;  %v812_v17 = vadd.f32 %v811_v52, %v8024_v1  ;;  %v6564_v19 = vpop.f32.mrf.mxu0  ;;  %6727 = vmatmul.mubr.msk.bf16.gmra.mxu0 %vm218_vm2, %v2191_v40  ;;  %v5683_v1 = vld [vmem:[%s9946_s0 + $0x309] sm:$0xff]  ;;  %v5721_v42 = vld [vmem:[%s9946_s0 + $0x1a] sm:$0xff] }
 0x132   :  { %v6498_v59 = vpop.f32.mrf.mxu1  ;;  %6661 = vmatmul.mubr.msk.bf16.gmra.mxu1 %vm218_vm2, %v7829_v55  ;;  %6730 = vmatprep.mubr.msk.bf16.mxu0 %vm218_vm2, %v2192_v41  ;;  %v2193_v9 = vpack.c.bf16 %v5683_v1, %v5682_v60  ;;  %v5819_v41 = vld [vmem:[%s9946_s0 + $0x38] sm:$0xff] }
 0x133   :  { %v8281_v12 = vadd.f32 %v1297_v38, %v812_v17  ;;  %v833_v27 = vadd.f32 %v6498_v59, %v8028_v58  ;;  %6664 = vmatprep.mubr.msk.bf16.mxu1 %vm218_vm2, %v7861_v62  ;;  %v1310_v13 = vpop.f32.mrf.mxu0  ;;  %v5685_v62 = vld [vmem:[%s9946_s0 + $0x321] sm:$0xff] }
 0x134   :  { %v824_v55 = vpop.f32.mrf.mxu1  ;;  %v2194_v7 = vpack.c.bf16 %v5685_v62, %v5684_v22 }
 0x135   :  { %v8299_v58 = vadd.f32 %v6564_v19, %v833_v27  ;;  %v825_v45 = vadd.f32 %v824_v55, %v8040_v26  ;;  %v6565_v50 = vpop.f32.mrf.mxu0  ;;  %v5589_v26 = vld [vmem:[%s9946_s0 + $0x330] sm:$0xff] }
 0x136   :  { %v6499_v11 = vpop.f32.mrf.mxu1 }
 0x137   :  { %v8302_v25 = vadd.f32 %v1310_v13, %v825_v45  ;;  %v836_v2 = vadd.f32 %v6499_v11, %v8044_v18  ;;  %v1313_v23 = vpop.f32.mrf.mxu0  ;;  %v5590_v18 = vld [vmem:[%s9946_s0 + $0x338] sm:$0xff] }
 0x138   :  { %v827_v51 = vpop.f32.mrf.mxu1  ;;  %v8344_v19 = vpack.c.bf16 %v5590_v18, %v5589_v26  ;;  %v5726_v26 = vld [vmem:[%s9946_s0 + $0x52] sm:$0xff]  ;;  %v5822_v18 = vld [vmem:[%s9946_s0 + $0x60] sm:$0xff] }
 0x139   :  { %v8305_v20 = vadd.f32 %v6565_v50, %v836_v2  ;;  %v828_v61 = vadd.f32 %v827_v51, %v8048_v14  ;;  %v6568_v48 = vpop.f32.mrf.mxu0  ;;  %6731 = vmatmul.mubr.msk.bf16.gmra.mxu0 %vm218_vm2, %v2193_v9  ;;  %v5687_v14 = vld [vmem:[%s9946_s0 + $0x339] sm:$0xff]  ;;  %v5821_v51 = vld [vmem:[%s9946_s0 + $0x50] sm:$0xff] }
 0x13a   :  { %v6502_v21 = vpop.f32.mrf.mxu1  ;;  %6665 = vmatmul.mubr.msk.bf16.gmra.mxu1 %vm218_vm2, %v7863_v30  ;;  %6734 = vmatprep.mubr.msk.bf16.mxu0 %vm218_vm2, %v2194_v7  ;;  %v5686_v30 = vld [vmem:[%s9946_s0 + $0x331] sm:$0xff]  ;;  %v5820_v7 = vld [vmem:[%s9946_s0 + $0x48] sm:$0xff] }
 0x13b   :  { %v8317_v24 = vadd.f32 %v1313_v23, %v828_v61  ;;  %v849_v8 = vadd.f32 %v6502_v21, %v8052_v16  ;;  %6668 = vmatprep.mubr.msk.bf16.mxu1 %vm218_vm2, %v7883_v46  ;;  %v1326_v32 = vpop.f32.mrf.mxu0  ;;  %v5722_v46 = vld [vmem:[%s9946_s0 + $0x22] sm:$0xff]  ;;  %v5818_v16 = vld [vmem:[%s9946_s0 + $0x30] sm:$0xff]  ;;  %v2195_v27 = vpack.c.bf16 %v5687_v14, %v5686_v30 }
 0x13c   :  { %v840_v40 = vpop.f32.mrf.mxu1  ;;  %v2714_v55 = vpack.c.bf16 %v5722_v46, %v5721_v42  ;;  %v3265_v13 = vpack.c.bf16 %v5819_v41, %v5818_v16 }
 0x13d   :  { %v8341_v52 = vadd.f32 %v6568_v48, %v849_v8  ;;  %v841_v38 = vadd.f32 %v840_v40, %v8076_v28  ;;  %v6569_v59 = vpop.f32.mrf.mxu0  ;;  %v5723_v28 = vld [vmem:[%s9946_s0 + $0x32] sm:$0xff]  ;;  %v5823_v8 = vld [vmem:[%s9946_s0 + $0x68] sm:$0xff]  ;;  %v3266_v40 = vpack.c.bf16 %v5821_v51, %v5820_v7 }
 0x13e   :  { %v6503_v17 = vpop.f32.mrf.mxu1 }
 0x13f   :  { %v8346_v60 = vadd.f32 %v1326_v32, %v841_v38  ;;  %v852_v1 = vadd.f32 %v6503_v17, %v8086_v15  ;;  %v1329_v62 = vpop.f32.mrf.mxu0  ;;  %v3267_v38 = vpack.c.bf16 %v5823_v8, %v5822_v18 }
 0x140   :  { %v843_v22 = vpop.f32.mrf.mxu1 }
 0x141   :  { %v8349_v45 = vadd.f32 %v6569_v59, %v852_v1  ;;  %v844_v11 = vadd.f32 %v843_v22, %v8092_v43  ;;  %v6572_v9 = vpop.f32.mrf.mxu0  ;;  %6735 = vmatmul.mubr.msk.bf16.gmra.mxu0 %vm218_vm2, %v2195_v27  ;;  %v5724_v43 = vld [vmem:[%s9946_s0 + $0x3a] sm:$0xff]  ;;  %v10008_v59 = vld [vmem:[#allocation38_spill] sm:$0xff] }
 0x142   :  { %v6506_v50 = vpop.f32.mrf.mxu1  ;;  %6669 = vmatmul.mubr.msk.bf16.gmra.mxu1 %vm218_vm2, %v8344_v19  ;;  %6806 = vmatprep.mubr.msk.bf16.mxu0 %vm218_vm2, %v3265_v13  ;;  %v8387_v42 = vpack.c.bf16 %v5724_v43, %v5723_v28  ;;  %v5728_v13 = vld [vmem:[%s9946_s0 + $0x6a] sm:$0xff]  ;;  %v5824_v28 = vld [vmem:[%s9946_s0 + $0x78] sm:$0xff] }
 0x143   :  { %v8358_v15 = vadd.f32 %v1329_v62, %v844_v11  ;;  %v865_v2 = vadd.f32 %v6506_v50, %v8096_v36  ;;  %6740 = vmatprep.mubr.msk.bf16.mxu1 %vm218_vm2, %v2714_v55  ;;  %v1342_v61 = vpop.f32.mrf.mxu0  ;;  %v5725_v36 = vld [vmem:[%s9946_s0 + $0x4a] sm:$0xff]  ;;  %v10009_v62 = vld [vmem:[#allocation4_spill] sm:$0xff]  ;;  %v10010_v50 = vld [vmem:[#allocation7_spill] sm:$0xff] }
 0x144   :  { %v856_v23 = vpop.f32.mrf.mxu1  ;;  %v8392_v41 = vpack.c.bf16 %v5726_v26, %v5725_v36  ;;  %v5729_v43 = vld [vmem:[%s9946_s0 + $0x7a] sm:$0xff]  ;;  %v10012_v26 = vld [vmem:[#allocation5_spill] sm:$0xff] }
 0x145   :  { %v8375_v21 = vadd.f32 %v6572_v9, %v865_v2  ;;  %v857_v48 = vadd.f32 %v856_v23, %v8112_v56  ;;  %v6573_v14 = vpop.f32.mrf.mxu0  ;;  %v10011_v9 = vld [vmem:[#allocation9_spill] sm:$0xff]  ;;  %v5825_v2 = vld [vmem:[%s9946_s0 + $0x80] sm:$0xff]  ;;  %v5827_v36 = vld [vmem:[%s9946_s0 + $0x98] sm:$0xff] }
 0x146   :  { %v6507_v30 = vpop.f32.mrf.mxu1  ;;  %v5730_v23 = vld [vmem:[%s9946_s0 + $0x82] sm:$0xff] }
 0x147   :  { %v8389_v32 = vadd.f32 %v1342_v61, %v857_v48  ;;  %v868_v56 = vadd.f32 %v6507_v30, %v8122_v31  ;;  %v1345_v16 = vpop.f32.mrf.mxu0  ;;  %v5727_v31 = vld [vmem:[%s9946_s0 + $0x62] sm:$0xff]  ;;  %v5826_v61 = vld [vmem:[%s9946_s0 + $0x90] sm:$0xff] }
 0x148   :  { %v859_v46 = vpop.f32.mrf.mxu1 }
 0x149   :  { %v8394_v17 = vadd.f32 %v6573_v14, %v868_v56  ;;  %v860_v27 = vadd.f32 %v859_v46, %v10008_v59  ;;  %v6576_v55 = vpop.f32.mrf.mxu0  ;;  %6807 = vmatmul.mubr.msk.bf16.vlgmr.msra.gmra.mxu0 %vm218_vm2, %v3266_v40  ;;  %v8435_v14 = vpack.c.bf16 %v5728_v13, %v5727_v31  ;;  %v3268_v40 = vpack.c.bf16 %v5825_v2, %v5824_v28  ;;  %v10015_v46 = vld [vmem:[#allocation6_spill] sm:$0xff]  ;;  %v5732_v13 = vld [vmem:[%s9946_s0 + $0x9a] sm:$0xff] }
 0x14a   :  { %v6510_v1 = vpop.f32.mrf.mxu1  ;;  %6741 = vmatmul.mubr.msk.bf16.vlgmr.msra.gmra.mxu1 %vm218_vm2, %v8387_v42  ;;  %6937 = vmatpush3.bf16.msra.mxu0 %v10011_v9  ;;  %v3269_v59 = vpack.c.bf16 %v5827_v36, %v5826_v61  ;;  %v5731_v31 = vld [vmem:[%s9946_s0 + $0x92] sm:$0xff] }
 0x14b   :  { %v8406_v22 = vadd.f32 %v1345_v16, %v860_v27  ;;  %v881_v11 = vadd.f32 %v6510_v1, %v10009_v62  ;;  %6871 = vmatpush3.bf16.msra.mxu1 %v10010_v50  ;;  %v1358_v51 = vpop.f32.mrf.mxu0  ;;  %6744 = vmatprep.mubr.msk.bf16.mxu1 %vm218_vm2, %v8392_v41  ;;  %10013 = vst [vmem:[#allocation38_spill] sm:$0xff] %v8435_v14  ;;  %v10020_v2 = vld [vmem:[#allocation10_spill] sm:$0xff] }
 0x14c   :  { %v872_v7 = vpop.f32.mrf.mxu1  ;;  %6810 = vmatprep.mubr.msk.bf16.mxu0 %vm218_vm2, %v3267_v38  ;;  %v8440_v38 = vpack.c.bf16 %v5730_v23, %v5729_v43  ;;  %v5733_v23 = vld [vmem:[%s9946_s0 + $0xaa] sm:$0xff] }
 0x14d   :  { %v8432_v48 = vadd.f32 %v6576_v55, %v881_v11  ;;  %v873_v18 = vadd.f32 %v872_v7, %v10012_v26  ;;  %v6577_v30 = vpop.f32.mrf.mxu0  ;;  %v10018_v55 = vld [vmem:[#allocation8_spill] sm:$0xff]  ;;  %v5734_v26 = vld [vmem:[%s9946_s0 + $0xb2] sm:$0xff] }
 0x14e   :  { %v6511_v8 = vpop.f32.mrf.mxu1  ;;  %10016 = vst [vmem:[#allocation7_spill] sm:$0xff] %v8440_v38  ;;  %v5828_v7 = vld [vmem:[%s9946_s0 + $0xa8] sm:$0xff] }
 0x14f   :  { %v8437_v56 = vadd.f32 %v1358_v51, %v873_v18  ;;  %v884_v16 = vadd.f32 %v6511_v8, %v10015_v46  ;;  %v1361_v1 = vpop.f32.mrf.mxu0  ;;  %v5829_v51 = vld [vmem:[%s9946_s0 + $0xb0] sm:$0xff]  ;;  %v5830_v18 = vld [vmem:[%s9946_s0 + $0xc0] sm:$0xff]  ;;  %v5831_v8 = vld [vmem:[%s9946_s0 + $0xc8] sm:$0xff] }
 0x150   :  { %v875_v27 = vpop.f32.mrf.mxu1 }
 0x151   :  { %10014 = vst [vmem:[#allocation4_spill] sm:$0xff] %v8437_v56  ;;  %v8442_v62 = vadd.f32 %v6577_v30, %v884_v16  ;;  %v876_v11 = vadd.f32 %v875_v27, %v10018_v55  ;;  %v6580_v9 = vpop.f32.mrf.mxu0  ;;  %6811 = vmatmul.mubr.msk.bf16.gmra.mxu0 %vm218_vm2, %v3268_v40  ;;  %v10022_v40 = vld [vmem:[#allocation11_spill] sm:$0xff]  ;;  %v8481_v27 = vpack.c.bf16 %v5732_v13, %v5731_v31  ;;  %v5735_v31 = vld [vmem:[%s9946_s0 + $0xc2] sm:$0xff]  ;;  %v5736_v13 = vld [vmem:[%s9946_s0 + $0xca] sm:$0xff] }
 0x152   :  { %v6514_v50 = vpop.f32.mrf.mxu1  ;;  %6745 = vmatmul.mubr.msk.bf16.gmra.mxu1 %vm218_vm2, %v8435_v14  ;;  %6814 = vmatprep.mubr.msk.bf16.mxu0 %vm218_vm2, %v3269_v59  ;;  %v10077_v14 = vld [vmem:[#allocation34_spill] sm:$0xff] }
 0x153   :  { %10017 = vst [vmem:[#allocation9_spill] sm:$0xff] %v8442_v62  ;;  %v8454_v28 = vadd.f32 %v1361_v1, %v876_v11  ;;  %v897_v43 = vadd.f32 %v6514_v50, %v10020_v2  ;;  %6748 = vmatprep.mubr.msk.bf16.mxu1 %vm218_vm2, %v8440_v38  ;;  %v1374_v36 = vpop.f32.mrf.mxu0  ;;  %10023 = vst [vmem:[#allocation8_spill] sm:$0xff] %v8481_v27  ;;  %v3270_v1 = vpack.c.bf16 %v5829_v51, %v5828_v7  ;;  %v10025_v11 = vld [vmem:[#allocation12_spill] sm:$0xff]  ;;  %v10030_v51 = vld [vmem:[#allocation14_spill] sm:$0xff] }
 0x154   :  { %v888_v61 = vpop.f32.mrf.mxu1  ;;  %v8486_v2 = vpack.c.bf16 %v5734_v26, %v5733_v23  ;;  %v3271_v38 = vpack.c.bf16 %v5831_v8, %v5830_v18  ;;  %v5738_v8 = vld [vmem:[%s9946_s0 + $0xe2] sm:$0xff] }
 0x155   :  { %10019 = vst [vmem:[#allocation5_spill] sm:$0xff] %v8454_v28  ;;  %v8478_v30 = vadd.f32 %v6580_v9, %v897_v43  ;;  %v889_v46 = vadd.f32 %v888_v61, %v10022_v40  ;;  %v6581_v59 = vpop.f32.mrf.mxu0  ;;  %v10028_v9 = vld [vmem:[#allocation13_spill] sm:$0xff] }
 0x156   :  { %v6515_v16 = vpop.f32.mrf.mxu1  ;;  %10026 = vst [vmem:[#allocation11_spill] sm:$0xff] %v8486_v2 }
 0x157   :  { %10021 = vst [vmem:[#allocation6_spill] sm:$0xff] %v8478_v30  ;;  %v8483_v55 = vadd.f32 %v1374_v36, %v889_v46  ;;  %v900_v50 = vadd.f32 %v6515_v16, %v10025_v11  ;;  %v1377_v62 = vpop.f32.mrf.mxu0  ;;  %v5833_v36 = vld [vmem:[%s9946_s0 + $0xe0] sm:$0xff]  ;;  %v8527_v11 = vpack.c.bf16 %v5736_v13, %v5735_v31  ;;  %v5739_v31 = vld [vmem:[%s9946_s0 + $0xf2] sm:$0xff] }
 0x158   :  { %v891_v28 = vpop.f32.mrf.mxu1  ;;  %v10032_v46 = vld [vmem:[#allocation15_spill] sm:$0xff] }
 0x159   :  { %10024 = vst [vmem:[#allocation10_spill] sm:$0xff] %v8483_v55  ;;  %v8488_v56 = vadd.f32 %v6581_v59, %v900_v50  ;;  %v892_v43 = vadd.f32 %v891_v28, %v10028_v9  ;;  %v6584_v61 = vpop.f32.mrf.mxu0  ;;  %6815 = vmatmul.mubr.msk.bf16.gmra.mxu0 %vm218_vm2, %v3270_v1  ;;  %v5832_v28 = vld [vmem:[%s9946_s0 + $0xd8] sm:$0xff]  ;;  %10033 = vst [vmem:[#allocation15_spill] sm:$0xff] %v8527_v11 }
 0x15a   :  { %v6518_v30 = vpop.f32.mrf.mxu1  ;;  %6749 = vmatmul.mubr.msk.bf16.gmra.mxu1 %vm218_vm2, %v8481_v27  ;;  %6818 = vmatprep.mubr.msk.bf16.mxu0 %vm218_vm2, %v3271_v38  ;;  %v5834_v38 = vld [vmem:[%s9946_s0 + $0xf0] sm:$0xff]  ;;  %v3272_v50 = vpack.c.bf16 %v5833_v36, %v5832_v28  ;;  %v5740_v13 = vld [vmem:[%s9946_s0 + $0xfa] sm:$0xff] }
 0x15b   :  { %10027 = vst [vmem:[#allocation12_spill] sm:$0xff] %v8488_v56  ;;  %v8500_v7 = vadd.f32 %v1377_v62, %v892_v43  ;;  %v913_v23 = vadd.f32 %v6518_v30, %v10030_v51  ;;  %6752 = vmatprep.mubr.msk.bf16.mxu1 %vm218_vm2, %v8486_v2  ;;  %v5737_v62 = vld [vmem:[%s9946_s0 + $0xda] sm:$0xff]  ;;  %v1390_v18 = vpop.f32.mrf.mxu0  ;;  %v10040_v36 = vld [vmem:[#allocation18_spill] sm:$0xff] }
 0x15c   :  { %v904_v26 = vpop.f32.mrf.mxu1  ;;  %v5835_v30 = vld [vmem:[%s9946_s0 + $0xf8] sm:$0xff]  ;;  %v10035_v43 = vld [vmem:[#allocation16_spill] sm:$0xff]  ;;  %v8532_v2 = vpack.c.bf16 %v5738_v8, %v5737_v62 }
 0x15d   :  { %10029 = vst [vmem:[#allocation13_spill] sm:$0xff] %v8500_v7  ;;  %v8524_v40 = vadd.f32 %v6584_v61, %v913_v23  ;;  %v905_v16 = vadd.f32 %v904_v26, %v10032_v46  ;;  %v6585_v1 = vpop.f32.mrf.mxu0  ;;  %v3273_v7 = vpack.c.bf16 %v5835_v30, %v5834_v38  ;;  %v10038_v61 = vld [vmem:[#allocation17_spill] sm:$0xff]  ;;  %v5742_v30 = vld [vmem:[%s9946_s0 + $0x112] sm:$0xff] }
 0x15e   :  { %v6519_v59 = vpop.f32.mrf.mxu1  ;;  %10036 = vst [vmem:[#allocation16_spill] sm:$0xff] %v8532_v2 }
 0x15f   :  { %10031 = vst [vmem:[#allocation14_spill] sm:$0xff] %v8524_v40  ;;  %v8529_v9 = vadd.f32 %v1390_v18, %v905_v16  ;;  %v916_v51 = vadd.f32 %v6519_v59, %v10035_v43  ;;  %v1393_v55 = vpop.f32.mrf.mxu0  ;;  %v5837_v18 = vld [vmem:[%s9946_s0 + $0x110] sm:$0xff]  ;;  %v10042_v16 = vld [vmem:[#allocation19_spill] sm:$0xff]  ;;  %v8573_v43 = vpack.c.bf16 %v5740_v13, %v5739_v31  ;;  %v5743_v31 = vld [vmem:[%s9946_s0 + $0x122] sm:$0xff] }
 0x160   :  { %v907_v56 = vpop.f32.mrf.mxu1  ;;  %v5744_v13 = vld [vmem:[%s9946_s0 + $0x12a] sm:$0xff] }
 0x161   :  { %10034 = vst [vmem:[#allocation40_spill] sm:$0xff] %v8529_v9  ;;  %v8534_v27 = vadd.f32 %v6585_v1, %v916_v51  ;;  %v908_v23 = vadd.f32 %v907_v56, %v10038_v61  ;;  %v6588_v26 = vpop.f32.mrf.mxu0  ;;  %6819 = vmatmul.mubr.msk.bf16.gmra.mxu0 %vm218_vm2, %v3272_v50  ;;  %v5836_v56 = vld [vmem:[%s9946_s0 + $0x108] sm:$0xff]  ;;  %10043 = vst [vmem:[#allocation19_spill] sm:$0xff] %v8573_v43 }
 0x162   :  { %v6522_v40 = vpop.f32.mrf.mxu1  ;;  %6753 = vmatmul.mubr.msk.bf16.gmra.mxu1 %vm218_vm2, %v8527_v11  ;;  %6822 = vmatprep.mubr.msk.bf16.mxu0 %vm218_vm2, %v3273_v7  ;;  %v5838_v7 = vld [vmem:[%s9946_s0 + $0x120] sm:$0xff]  ;;  %v3274_v51 = vpack.c.bf16 %v5837_v18, %v5836_v56  ;;  %v10050_v18 = vld [vmem:[#allocation22_spill] sm:$0xff] }
 0x163   :  { %10037 = vst [vmem:[#allocation41_spill] sm:$0xff] %v8534_v27  ;;  %v8546_v28 = vadd.f32 %v1393_v55, %v908_v23  ;;  %v929_v62 = vadd.f32 %v6522_v40, %v10040_v36  ;;  %6756 = vmatprep.mubr.msk.bf16.mxu1 %vm218_vm2, %v8532_v2  ;;  %v5741_v55 = vld [vmem:[%s9946_s0 + $0x10a] sm:$0xff]  ;;  %v1406_v38 = vpop.f32.mrf.mxu0  ;;  %v10045_v23 = vld [vmem:[#allocation20_spill] sm:$0xff] }
 0x164   :  { %v920_v8 = vpop.f32.mrf.mxu1  ;;  %v5839_v40 = vld [vmem:[%s9946_s0 + $0x128] sm:$0xff]  ;;  %v8578_v2 = vpack.c.bf16 %v5742_v30, %v5741_v55 }
 0x165   :  { %10039 = vst [vmem:[#allocation17_spill] sm:$0xff] %v8546_v28  ;;  %v8570_v46 = vadd.f32 %v6588_v26, %v929_v62  ;;  %v921_v59 = vadd.f32 %v920_v8, %v10042_v16  ;;  %v6589_v50 = vpop.f32.mrf.mxu0  ;;  %v3275_v28 = vpack.c.bf16 %v5839_v40, %v5838_v7  ;;  %v10048_v26 = vld [vmem:[#allocation21_spill] sm:$0xff] }
 0x166   :  { %v6523_v1 = vpop.f32.mrf.mxu1  ;;  %10046 = vst [vmem:[#allocation20_spill] sm:$0xff] %v8578_v2  ;;  %v5746_v40 = vld [vmem:[%s9946_s0 + $0x142] sm:$0xff] }
 0x167   :  { %10041 = vst [vmem:[#allocation18_spill] sm:$0xff] %v8570_v46  ;;  %v8575_v61 = vadd.f32 %v1406_v38, %v921_v59  ;;  %v932_v36 = vadd.f32 %v6523_v1, %v10045_v23  ;;  %v1409_v9 = vpop.f32.mrf.mxu0  ;;  %v5841_v38 = vld [vmem:[%s9946_s0 + $0x140] sm:$0xff]  ;;  %v8619_v23 = vpack.c.bf16 %v5744_v13, %v5743_v31  ;;  %v5747_v31 = vld [vmem:[%s9946_s0 + $0x152] sm:$0xff] }
 0x168   :  { %v923_v27 = vpop.f32.mrf.mxu1  ;;  %v10052_v59 = vld [vmem:[#allocation23_spill] sm:$0xff] }
 0x169   :  { %10044 = vst [vmem:[#allocation42_spill] sm:$0xff] %v8575_v61  ;;  %v8580_v11 = vadd.f32 %v6589_v50, %v932_v36  ;;  %v924_v62 = vadd.f32 %v923_v27, %v10048_v26  ;;  %v6592_v8 = vpop.f32.mrf.mxu0  ;;  %6823 = vmatmul.mubr.msk.bf16.gmra.mxu0 %vm218_vm2, %v3274_v51  ;;  %v5840_v27 = vld [vmem:[%s9946_s0 + $0x138] sm:$0xff]  ;;  %10053 = vst [vmem:[#allocation23_spill] sm:$0xff] %v8619_v23 }
 0x16a   :  { %v6526_v46 = vpop.f32.mrf.mxu1  ;;  %6757 = vmatmul.mubr.msk.bf16.gmra.mxu1 %vm218_vm2, %v8573_v43  ;;  %6826 = vmatprep.mubr.msk.bf16.mxu0 %vm218_vm2, %v3275_v28  ;;  %v5842_v28 = vld [vmem:[%s9946_s0 + $0x150] sm:$0xff]  ;;  %v3276_v36 = vpack.c.bf16 %v5841_v38, %v5840_v27 }
 0x16b   :  { %10047 = vst [vmem:[#allocation43_spill] sm:$0xff] %v8580_v11  ;;  %v8592_v56 = vadd.f32 %v1409_v9, %v924_v62  ;;  %v945_v55 = vadd.f32 %v6526_v46, %v10050_v18  ;;  %6760 = vmatprep.mubr.msk.bf16.mxu1 %vm218_vm2, %v8578_v2  ;;  %v5745_v9 = vld [vmem:[%s9946_s0 + $0x13a] sm:$0xff]  ;;  %v1422_v7 = vpop.f32.mrf.mxu0  ;;  %v10060_v27 = vld [vmem:[#allocation26_spill] sm:$0xff] }
 0x16c   :  { %v936_v30 = vpop.f32.mrf.mxu1  ;;  %v5843_v46 = vld [vmem:[%s9946_s0 + $0x158] sm:$0xff]  ;;  %v10055_v62 = vld [vmem:[#allocation24_spill] sm:$0xff]  ;;  %v8624_v2 = vpack.c.bf16 %v5746_v40, %v5745_v9 }
 0x16d   :  { %10049 = vst [vmem:[#allocation21_spill] sm:$0xff] %v8592_v56  ;;  %v8616_v16 = vadd.f32 %v6592_v8, %v945_v55  ;;  %v937_v1 = vadd.f32 %v936_v30, %v10052_v59  ;;  %v6593_v51 = vpop.f32.mrf.mxu0  ;;  %v3277_v56 = vpack.c.bf16 %v5843_v46, %v5842_v28  ;;  %v10058_v8 = vld [vmem:[#allocation25_spill] sm:$0xff] }
 0x16e   :  { %v6527_v50 = vpop.f32.mrf.mxu1  ;;  %10056 = vst [vmem:[#allocation24_spill] sm:$0xff] %v8624_v2  ;;  %v5844_v9 = vld [vmem:[%s9946_s0 + $0x168] sm:$0xff] }
 0x16f   :  { %10051 = vst [vmem:[#allocation22_spill] sm:$0xff] %v8616_v16  ;;  %v8621_v26 = vadd.f32 %v1422_v7, %v937_v1  ;;  %v948_v18 = vadd.f32 %v6527_v50, %v10055_v62  ;;  %v1425_v61 = vpop.f32.mrf.mxu0  ;;  %v5749_v28 = vld [vmem:[%s9946_s0 + $0x16a] sm:$0xff] }
 0x170   :  { %v939_v11 = vpop.f32.mrf.mxu1 }
 0x171   :  { %10054 = vst [vmem:[#allocation44_spill] sm:$0xff] %v8621_v26  ;;  %v8626_v43 = vadd.f32 %v6593_v51, %v948_v18  ;;  %v940_v55 = vadd.f32 %v939_v11, %v10058_v8  ;;  %v6596_v30 = vpop.f32.mrf.mxu0  ;;  %6827 = vmatmul.mubr.msk.bf16.gmra.mxu0 %vm218_vm2, %v3276_v36  ;;  %v5748_v11 = vld [vmem:[%s9946_s0 + $0x15a] sm:$0xff] }
 0x172   :  { %v6530_v16 = vpop.f32.mrf.mxu1  ;;  %6761 = vmatmul.mubr.msk.bf16.gmra.mxu1 %vm218_vm2, %v8619_v23  ;;  %6830 = vmatprep.mubr.msk.bf16.mxu0 %vm218_vm2, %v3277_v56  ;;  %v5750_v56 = vld [vmem:[%s9946_s0 + $0x172] sm:$0xff]  ;;  %v8659_v51 = vpack.c.bf16 %v5748_v11, %v5747_v31  ;;  %v10065_v18 = vld [vmem:[#allocation28_spill] sm:$0xff]  ;;  %v5752_v11 = vld [vmem:[%s9946_s0 + $0x18a] sm:$0xff] }
 0x173   :  { %10057 = vst [vmem:[#allocation45_spill] sm:$0xff] %v8626_v43  ;;  %v8635_v13 = vadd.f32 %v1425_v61, %v940_v55  ;;  %v961_v38 = vadd.f32 %v6530_v16, %v10060_v27  ;;  %6764 = vmatprep.mubr.msk.bf16.mxu1 %vm218_vm2, %v8624_v2  ;;  %v5845_v61 = vld [vmem:[%s9946_s0 + $0x170] sm:$0xff]  ;;  %v1438_v40 = vpop.f32.mrf.mxu0  ;;  %v10062_v16 = vld [vmem:[#allocation27_spill] sm:$0xff]  ;;  %v8664_v55 = vpack.c.bf16 %v5750_v56, %v5749_v28  ;;  %v5751_v31 = vld [vmem:[%s9946_s0 + $0x182] sm:$0xff] }
 0x174   :  { %v952_v7 = vpop.f32.mrf.mxu1  ;;  %10063 = vst [vmem:[#allocation27_spill] sm:$0xff] %v8659_v51  ;;  %v3278_v36 = vpack.c.bf16 %v5845_v61, %v5844_v9  ;;  %v10068_v43 = vld [vmem:[#allocation29_spill] sm:$0xff]  ;;  %v10070_v61 = vld [vmem:[#allocation30_spill] sm:$0xff]  ;;  %v5849_v28 = vld [vmem:[%s9946_s0 + $0x1a0] sm:$0xff] }
 0x175   :  { %10059 = vst [vmem:[#allocation25_spill] sm:$0xff] %v8635_v13  ;;  %v8656_v46 = vadd.f32 %v6596_v30, %v961_v38  ;;  %v953_v59 = vadd.f32 %v952_v7, %v10062_v16  ;;  %v6597_v50 = vpop.f32.mrf.mxu0  ;;  %10066 = vst [vmem:[#allocation28_spill] sm:$0xff] %v8664_v55 }
 0x176   :  { %v6531_v1 = vpop.f32.mrf.mxu1 }
 0x177   :  { %10061 = vst [vmem:[#allocation26_spill] sm:$0xff] %v8656_v46  ;;  %v8661_v62 = vadd.f32 %v1438_v40, %v953_v59  ;;  %v964_v8 = vadd.f32 %v6531_v1, %v10065_v18  ;;  %v1441_v2 = vpop.f32.mrf.mxu0  ;;  %v5848_v40 = vld [vmem:[%s9946_s0 + $0x198] sm:$0xff]  ;;  %v5850_v1 = vld [vmem:[%s9946_s0 + $0x1e0] sm:$0xff] }
 0x178   :  { %v955_v27 = vpop.f32.mrf.mxu1  ;;  %v5754_v59 = vld [vmem:[%s9946_s0 + $0x1d2] sm:$0xff] }
 0x179   :  { %10064 = vst [vmem:[#allocation46_spill] sm:$0xff] %v8661_v62  ;;  %v8666_v13 = vadd.f32 %v6597_v50, %v964_v8  ;;  %v956_v30 = vadd.f32 %v955_v27, %v10068_v43  ;;  %v6600_v46 = vpop.f32.mrf.mxu0  ;;  %6831 = vmatmul.mubr.msk.bf16.gmra.mxu0 %vm218_vm2, %v3278_v36  ;;  %v10071_v43 = vld [vmem:[#allocation33_spill] sm:$0xff]  ;;  %v10073_v18 = vld [vmem:[#allocation31_spill] sm:$0xff] }
 0x17a   :  { %v6534_v38 = vpop.f32.mrf.mxu1  ;;  %6765 = vmatmul.mubr.msk.bf16.gmra.mxu1 %vm218_vm2, %v8659_v51  ;;  %6834 = vmatprep.mubr.msk.bf16.mxu0 %vm218_vm2, %v10071_v43  ;;  %v5851_v50 = vld [vmem:[%s9946_s0 + $0x1e8] sm:$0xff] }
 0x17b   :  { %10067 = vst [vmem:[#allocation47_spill] sm:$0xff] %v8666_v13  ;;  %v8678_v9 = vadd.f32 %v1441_v2, %v956_v30  ;;  %v977_v7 = vadd.f32 %v6534_v38, %v10070_v61  ;;  %6768 = vmatprep.mubr.msk.bf16.mxu1 %vm218_vm2, %v8664_v55  ;;  %v5753_v2 = vld [vmem:[%s9946_s0 + $0x1ca] sm:$0xff]  ;;  %v1454_v16 = vpop.f32.mrf.mxu0  ;;  %v8706_v38 = vpack.c.bf16 %v5752_v11, %v5751_v31  ;;  %v10075_v55 = vld [vmem:[#allocation32_spill] sm:$0xff] }
 0x17c   :  { %v968_v56 = vpop.f32.mrf.mxu1  ;;  %v3280_v61 = vpack.c.bf16 %v5849_v28, %v5848_v40  ;;  %v2730_v13 = vpack.c.bf16 %v5754_v59, %v5753_v2  ;;  %v3281_v62 = vpack.c.bf16 %v5851_v50, %v5850_v1  ;;  %v5755_v31 = vld [vmem:[%s9946_s0 + $0x1e2] sm:$0xff]  ;;  %v5757_v28 = vld [vmem:[%s9946_s0 + $0x1fa] sm:$0xff] }
 0x17d   :  { %10069 = vst [vmem:[#allocation29_spill] sm:$0xff] %v8678_v9  ;;  %v8703_v36 = vadd.f32 %v6600_v46, %v977_v7  ;;  %v969_v8 = vadd.f32 %v968_v56, %v10073_v18  ;;  %v6601_v30 = vpop.f32.mrf.mxu0  ;;  %v5855_v56 = vld [vmem:[%s9946_s0 + $0x218] sm:$0xff]  ;;  %v10081_v59 = vld [vmem:[#allocation36_spill] sm:$0xff] }
 0x17e   :  { %v6535_v27 = vpop.f32.mrf.mxu1 }
 0x17f   :  { %10072 = vst [vmem:[#allocation30_spill] sm:$0xff] %v8703_v36  ;;  %v8708_v43 = vadd.f32 %v1454_v16, %v969_v8  ;;  %v980_v9 = vadd.f32 %v6535_v27, %v10075_v55  ;;  %v1457_v26 = vpop.f32.mrf.mxu0  ;;  %v5756_v55 = vld [vmem:[%s9946_s0 + $0x1ea] sm:$0xff] }
 0x180   :  { %v971_v51 = vpop.f32.mrf.mxu1  ;;  %v8749_v8 = vpack.c.bf16 %v5756_v55, %v5755_v31  ;;  %v5759_v31 = vld [vmem:[%s9946_s0 + $0x212] sm:$0xff]  ;;  %v5760_v55 = vld [vmem:[%s9946_s0 + $0x21a] sm:$0xff] }
 0x181   :  { %10074 = vst [vmem:[#allocation33_spill] sm:$0xff] %v8708_v43  ;;  %v8711_v23 = vadd.f32 %v6601_v30, %v980_v9  ;;  %v972_v46 = vadd.f32 %v971_v51, %v10077_v14  ;;  %v6604_v36 = vpop.f32.mrf.mxu0  ;;  %6835 = vmatmul.mubr.msk.bf16.gmra.mxu0 %vm218_vm2, %v3280_v61  ;;  %v10079_v9 = vld [vmem:[#allocation35_spill] sm:$0xff]  ;;  %v10082_v61 = vld [vmem:[#allocation37_spill] sm:$0xff] }
 0x182   :  { %v6538_v7 = vpop.f32.mrf.mxu1  ;;  %6769 = vmatmul.mubr.msk.bf16.gmra.mxu1 %vm218_vm2, %v8706_v38  ;;  %6838 = vmatprep.mubr.msk.bf16.mxu0 %vm218_vm2, %v3281_v62  ;;  %v5852_v14 = vld [vmem:[%s9946_s0 + $0x1f8] sm:$0xff]  ;;  %v5853_v51 = vld [vmem:[%s9946_s0 + $0x200] sm:$0xff]  ;;  %v5854_v62 = vld [vmem:[%s9946_s0 + $0x210] sm:$0xff] }
 0x183   :  { %10076 = vst [vmem:[#allocation31_spill] sm:$0xff] %v8711_v23  ;;  %v8723_v11 = vadd.f32 %v1457_v26, %v972_v46  ;;  %v993_v40 = vadd.f32 %v6538_v7, %v10079_v9  ;;  %6772 = vmatprep.mubr.msk.bf16.mxu1 %vm218_vm2, %v2730_v13  ;;  %v1470_v2 = vpop.f32.mrf.mxu0  ;;  %v5758_v13 = vld [vmem:[%s9946_s0 + $0x202] sm:$0xff]  ;;  %v3282_v27 = vpack.c.bf16 %v5853_v51, %v5852_v14 }
 0x184   :  { %v984_v26 = vpop.f32.mrf.mxu1  ;;  %v8754_v7 = vpack.c.bf16 %v5758_v13, %v5757_v28  ;;  %v3283_v9 = vpack.c.bf16 %v5855_v56, %v5854_v62  ;;  %v5857_v28 = vld [vmem:[%s9946_s0 + $0x230] sm:$0xff]  ;;  %v5858_v62 = vld [vmem:[%s9946_s0 + $0x240] sm:$0xff]  ;;  %v5859_v56 = vld [vmem:[%s9946_s0 + $0x248] sm:$0xff] }
 0x185   :  { %10078 = vst [vmem:[#allocation32_spill] sm:$0xff] %v8723_v11  ;;  %v8746_v16 = vadd.f32 %v6604_v36, %v993_v40  ;;  %v985_v1 = vadd.f32 %v984_v26, %v10081_v59  ;;  %v6605_v18 = vpop.f32.mrf.mxu0  ;;  %v10084_v36 = vld [vmem:[#allocation39_spill] sm:$0xff] }
 0x186   :  { %v6539_v50 = vpop.f32.mrf.mxu1  ;;  %10083 = vst [vmem:[#allocation35_spill] sm:$0xff] %v8754_v7 }
 0x187   :  { %10080 = vst [vmem:[#allocation34_spill] sm:$0xff] %v8746_v16  ;;  %v8751_v30 = vadd.f32 %v1470_v2, %v985_v1  ;;  %v996_v46 = vadd.f32 %v6539_v50, %v10082_v61  ;;  %v1473_v23 = vpop.f32.mrf.mxu0 }
 0x188   :  { %v987_v11 = vpop.f32.mrf.mxu1 }
 0x189   :  { %v8756_v43 = vadd.f32 %v6605_v18, %v996_v46  ;;  %v988_v40 = vadd.f32 %v987_v11, %v10084_v36  ;;  %v6676_v26 = vpop.f32.mrf.mxu0  ;;  %6839 = vmatmul.mubr.msk.bf16.gmra.mxu0 %vm218_vm2, %v3282_v27  ;;  %v5856_v11 = vld [vmem:[%s9946_s0 + $0x228] sm:$0xff]  ;;  %v8795_v18 = vpack.c.bf16 %v5760_v55, %v5759_v31  ;;  %v3285_v36 = vpack.c.bf16 %v5859_v56, %v5858_v62 }
 0x18a   :  { %v6610_v16 = vpop.f32.mrf.mxu1  ;;  %6773 = vmatmul.mubr.msk.bf16.gmra.mxu1 %vm218_vm2, %v8749_v8  ;;  %6842 = vmatprep.mubr.msk.bf16.mxu0 %vm218_vm2, %v3283_v9  ;;  %v3284_v27 = vpack.c.bf16 %v5857_v28, %v5856_v11  ;;  %v5764_v31 = vld [vmem:[%s9946_s0 + $0x24a] sm:$0xff]  ;;  %v5861_v28 = vld [vmem:[%s9946_s0 + $0x260] sm:$0xff] }
 0x18b   :  { %v8768_v14 = vadd.f32 %v1473_v23, %v988_v40  ;;  %v2038_v51 = vadd.f32 %v6610_v16, %v8149_v57  ;;  %6776 = vmatprep.mubr.msk.bf16.mxu1 %vm218_vm2, %v8754_v7  ;;  %v5761_v23 = vld [vmem:[%s9946_s0 + $0x22a] sm:$0xff]  ;;  %v2331_v13 = vpop.f32.mrf.mxu0  ;;  %v5762_v57 = vld [vmem:[%s9946_s0 + $0x232] sm:$0xff] }
 0x18c   :  { %v1781_v2 = vpop.f32.mrf.mxu1  ;;  %v8800_v9 = vpack.c.bf16 %v5762_v57, %v5761_v23  ;;  %v5863_v57 = vld [vmem:[%s9946_s0 + $0x278] sm:$0xff] }
 0x18d   :  { %10085 = vst [vmem:[#allocation36_spill] sm:$0xff] %v8768_v14  ;;  %v8792_v16 = vadd.f32 %v6676_v26, %v2038_v51  ;;  %v2036_v59 = vadd.f32 %v1781_v2, %v8152_v54  ;;  %v6677_v50 = vpop.f32.mrf.mxu0 }
 0x18e   :  { %v6611_v1 = vpop.f32.mrf.mxu1  ;;  %10086 = vst [vmem:[#allocation37_spill] sm:$0xff] %v8800_v9 }
 0x18f   :  { %v8797_v61 = vadd.f32 %v2331_v13, %v2036_v59  ;;  %v2039_v46 = vadd.f32 %v6611_v1, %v8155_v35  ;;  %v2334_v7 = vpop.f32.mrf.mxu0  ;;  %v5763_v35 = vld [vmem:[%s9946_s0 + $0x242] sm:$0xff]  ;;  %v5862_v13 = vld [vmem:[%s9946_s0 + $0x270] sm:$0xff] }
 0x190   :  { %v1784_v40 = vpop.f32.mrf.mxu1 }
 0x191   :  { %v8802_v14 = vadd.f32 %v6677_v50, %v2039_v46  ;;  %v2037_v26 = vadd.f32 %v1784_v40, %v8161_v3  ;;  %v6680_v54 = vpop.f32.mrf.mxu0  ;;  %6843 = vmatmul.mubr.msk.bf16.gmra.mxu0 %vm218_vm2, %v3284_v27  ;;  %v5860_v3 = vld [vmem:[%s9946_s0 + $0x258] sm:$0xff]  ;;  %v8841_v50 = vpack.c.bf16 %v5764_v31, %v5763_v35 }
 0x192   :  { %v6614_v51 = vpop.f32.mrf.mxu1  ;;  %6777 = vmatmul.mubr.msk.bf16.gmra.mxu1 %vm218_vm2, %v8795_v18  ;;  %6846 = vmatprep.mubr.msk.bf16.mxu0 %vm218_vm2, %v3285_v36  ;;  %v3286_v27 = vpack.c.bf16 %v5861_v28, %v5860_v3  ;;  %v5768_v35 = vld [vmem:[%s9946_s0 + $0x27a] sm:$0xff]  ;;  %v5865_v28 = vld [vmem:[%s9946_s0 + $0x290] sm:$0xff] }
 0x193   :  { %v8814_v55 = vadd.f32 %v2334_v7, %v2037_v26  ;;  %v2042_v11 = vadd.f32 %v6614_v51, %v8179_v0  ;;  %6780 = vmatprep.mubr.msk.bf16.mxu1 %vm218_vm2, %v8800_v9  ;;  %v5765_v7 = vld [vmem:[%s9946_s0 + $0x25a] sm:$0xff]  ;;  %v2347_v2 = vpop.f32.mrf.mxu0  ;;  %v5766_v0 = vld [vmem:[%s9946_s0 + $0x262] sm:$0xff]  ;;  %v3287_v26 = vpack.c.bf16 %v5863_v57, %v5862_v13 }
 0x194   :  { %v1797_v23 = vpop.f32.mrf.mxu1  ;;  %v8846_v40 = vpack.c.bf16 %v5766_v0, %v5765_v7  ;;  %v5867_v0 = vld [vmem:[%s9946_s0 + $0x2a8] sm:$0xff] }
 0x195   :  { %10087 = vst [vmem:[#allocation39_spill] sm:$0xff] %v8814_v55  ;;  %v8838_v62 = vadd.f32 %v6680_v54, %v2042_v11  ;;  %v2040_v56 = vadd.f32 %v1797_v23, %v8182_v33  ;;  %v6681_v1 = vpop.f32.mrf.mxu0 }
 0x196   :  { %v6615_v59 = vpop.f32.mrf.mxu1  ;;  %10088 = vst [vmem:[#allocation48_spill] sm:$0xff] %v8846_v40 }
 0x197   :  { %v8843_v46 = vadd.f32 %v2347_v2, %v2040_v56  ;;  %v2043_v36 = vadd.f32 %v6615_v59, %v8185_v34  ;;  %v2350_v9 = vpop.f32.mrf.mxu0  ;;  %v5767_v34 = vld [vmem:[%s9946_s0 + $0x272] sm:$0xff]  ;;  %v5866_v2 = vld [vmem:[%s9946_s0 + $0x2a0] sm:$0xff] }
 0x198   :  { %v1800_v51 = vpop.f32.mrf.mxu1 }
 0x199   :  { %v8848_v55 = vadd.f32 %v6681_v1, %v2043_v36  ;;  %v2041_v54 = vadd.f32 %v1800_v51, %v8191_v10  ;;  %v6684_v33 = vpop.f32.mrf.mxu0  ;;  %6847 = vmatmul.mubr.msk.bf16.gmra.mxu0 %vm218_vm2, %v3286_v27  ;;  %v5864_v10 = vld [vmem:[%s9946_s0 + $0x288] sm:$0xff]  ;;  %v8887_v1 = vpack.c.bf16 %v5768_v35, %v5767_v34 }
 0x19a   :  { %v6618_v11 = vpop.f32.mrf.mxu1  ;;  %6781 = vmatmul.mubr.msk.bf16.gmra.mxu1 %vm218_vm2, %v8841_v50  ;;  %6850 = vmatprep.mubr.msk.bf16.mxu0 %vm218_vm2, %v3287_v26  ;;  %v3288_v27 = vpack.c.bf16 %v5865_v28, %v5864_v10  ;;  %v5772_v34 = vld [vmem:[%s9946_s0 + $0x2aa] sm:$0xff]  ;;  %v5869_v28 = vld [vmem:[%s9946_s0 + $0x2c0] sm:$0xff] }
 0x19b   :  { %v8860_v31 = vadd.f32 %v2350_v9, %v2041_v54  ;;  %v2046_v3 = vadd.f32 %v6618_v11, %v8209_v37  ;;  %6784 = vmatprep.mubr.msk.bf16.mxu1 %vm218_vm2, %v8846_v40  ;;  %v5769_v9 = vld [vmem:[%s9946_s0 + $0x28a] sm:$0xff]  ;;  %v2363_v23 = vpop.f32.mrf.mxu0  ;;  %v5770_v37 = vld [vmem:[%s9946_s0 + $0x292] sm:$0xff]  ;;  %v3289_v54 = vpack.c.bf16 %v5867_v0, %v5866_v2 }
 0x19c   :  { %v1813_v7 = vpop.f32.mrf.mxu1  ;;  %v8892_v51 = vpack.c.bf16 %v5770_v37, %v5769_v9  ;;  %v5871_v37 = vld [vmem:[%s9946_s0 + $0x2d8] sm:$0xff] }
 0x19d   :  { %10089 = vst [vmem:[#allocation49_spill] sm:$0xff] %v8860_v31  ;;  %v8884_v13 = vadd.f32 %v6684_v33, %v2046_v3  ;;  %v2044_v57 = vadd.f32 %v1813_v7, %v8212_v4  ;;  %v6685_v59 = vpop.f32.mrf.mxu0 }
 0x19e   :  { %v6619_v56 = vpop.f32.mrf.mxu1  ;;  %10090 = vst [vmem:[#allocation50_spill] sm:$0xff] %v8892_v51 }
 0x19f   :  { %v8889_v36 = vadd.f32 %v2363_v23, %v2044_v57  ;;  %v2047_v26 = vadd.f32 %v6619_v56, %v8215_v6  ;;  %v2366_v40 = vpop.f32.mrf.mxu0  ;;  %v5771_v6 = vld [vmem:[%s9946_s0 + $0x2a2] sm:$0xff]  ;;  %v5870_v23 = vld [vmem:[%s9946_s0 + $0x2d0] sm:$0xff] }
 0x1a0   :  { %v1816_v11 = vpop.f32.mrf.mxu1 }
 0x1a1   :  { %v8894_v31 = vadd.f32 %v6685_v59, %v2047_v26  ;;  %v2045_v33 = vadd.f32 %v1816_v11, %v8221_v47  ;;  %v6688_v4 = vpop.f32.mrf.mxu0  ;;  %6851 = vmatmul.mubr.msk.bf16.gmra.mxu0 %vm218_vm2, %v3288_v27  ;;  %v5868_v47 = vld [vmem:[%s9946_s0 + $0x2b8] sm:$0xff]  ;;  %v8933_v59 = vpack.c.bf16 %v5772_v34, %v5771_v6 }
 0x1a2   :  { %v6622_v3 = vpop.f32.mrf.mxu1  ;;  %6785 = vmatmul.mubr.msk.bf16.gmra.mxu1 %vm218_vm2, %v8887_v1  ;;  %6854 = vmatprep.mubr.msk.bf16.mxu0 %vm218_vm2, %v3289_v54  ;;  %v3290_v27 = vpack.c.bf16 %v5869_v28, %v5868_v47  ;;  %v5776_v6 = vld [vmem:[%s9946_s0 + $0x2da] sm:$0xff]  ;;  %v5873_v28 = vld [vmem:[%s9946_s0 + $0x2f0] sm:$0xff] }
 0x1a3   :  { %v8906_v35 = vadd.f32 %v2366_v40, %v2045_v33  ;;  %v2050_v10 = vadd.f32 %v6622_v3, %v8239_v44  ;;  %6788 = vmatprep.mubr.msk.bf16.mxu1 %vm218_vm2, %v8892_v51  ;;  %v5773_v40 = vld [vmem:[%s9946_s0 + $0x2ba] sm:$0xff]  ;;  %v2379_v7 = vpop.f32.mrf.mxu0  ;;  %v5774_v44 = vld [vmem:[%s9946_s0 + $0x2c2] sm:$0xff]  ;;  %v3291_v33 = vpack.c.bf16 %v5871_v37, %v5870_v23 }
 0x1a4   :  { %v1829_v9 = vpop.f32.mrf.mxu1  ;;  %v8938_v11 = vpack.c.bf16 %v5774_v44, %v5773_v40  ;;  %v5875_v44 = vld [vmem:[%s9946_s0 + $0x308] sm:$0xff] }
 0x1a5   :  { %10091 = vst [vmem:[#allocation51_spill] sm:$0xff] %v8906_v35  ;;  %v8930_v2 = vadd.f32 %v6688_v4, %v2050_v10  ;;  %v2048_v0 = vadd.f32 %v1829_v9, %v8242_v29  ;;  %v6689_v56 = vpop.f32.mrf.mxu0 }
 0x1a6   :  { %v6623_v57 = vpop.f32.mrf.mxu1  ;;  %10092 = vst [vmem:[#allocation52_spill] sm:$0xff] %v8938_v11 }
 0x1a7   :  { %v8935_v26 = vadd.f32 %v2379_v7, %v2048_v0  ;;  %v2051_v54 = vadd.f32 %v6623_v57, %v8245_v5  ;;  %v2382_v51 = vpop.f32.mrf.mxu0  ;;  %v5775_v5 = vld [vmem:[%s9946_s0 + $0x2d2] sm:$0xff]  ;;  %v5874_v7 = vld [vmem:[%s9946_s0 + $0x300] sm:$0xff] }
 0x1a8   :  { %v1832_v3 = vpop.f32.mrf.mxu1 }
 0x1a9   :  { %v8940_v35 = vadd.f32 %v6689_v56, %v2051_v54  ;;  %v2049_v4 = vadd.f32 %v1832_v3, %v8251_v63  ;;  %v6692_v29 = vpop.f32.mrf.mxu0  ;;  %6855 = vmatmul.mubr.msk.bf16.gmra.mxu0 %vm218_vm2, %v3290_v27  ;;  %v5872_v63 = vld [vmem:[%s9946_s0 + $0x2e8] sm:$0xff]  ;;  %v8979_v56 = vpack.c.bf16 %v5776_v6, %v5775_v5 }
 0x1aa   :  { %v6626_v10 = vpop.f32.mrf.mxu1  ;;  %6789 = vmatmul.mubr.msk.bf16.gmra.mxu1 %vm218_vm2, %v8933_v59  ;;  %6858 = vmatprep.mubr.msk.bf16.mxu0 %vm218_vm2, %v3291_v33  ;;  %v3292_v27 = vpack.c.bf16 %v5873_v28, %v5872_v63  ;;  %v5876_v63 = vld [vmem:[%s9946_s0 + $0x318] sm:$0xff] }
 0x1ab   :  { %v8952_v34 = vadd.f32 %v2382_v51, %v2049_v4  ;;  %v2054_v47 = vadd.f32 %v6626_v10, %v8269_v49  ;;  %6792 = vmatprep.mubr.msk.bf16.mxu1 %vm218_vm2, %v8938_v11  ;;  %v5777_v51 = vld [vmem:[%s9946_s0 + $0x2ea] sm:$0xff]  ;;  %v2395_v9 = vpop.f32.mrf.mxu0  ;;  %v5778_v49 = vld [vmem:[%s9946_s0 + $0x2f2] sm:$0xff]  ;;  %v3293_v4 = vpack.c.bf16 %v5875_v44, %v5874_v7 }
 0x1ac   :  { %v1845_v40 = vpop.f32.mrf.mxu1  ;;  %v8984_v3 = vpack.c.bf16 %v5778_v49, %v5777_v51 }
 0x1ad   :  { %10093 = vst [vmem:[#allocation53_spill] sm:$0xff] %v8952_v34  ;;  %v8976_v23 = vadd.f32 %v6692_v29, %v2054_v47  ;;  %v2052_v37 = vadd.f32 %v1845_v40, %v8272_v53  ;;  %v6693_v57 = vpop.f32.mrf.mxu0  ;;  %v5782_v40 = vld [vmem:[%s9946_s0 + $0x322] sm:$0xff] }
 0x1ae   :  { %v6627_v0 = vpop.f32.mrf.mxu1 }
 0x1af   :  { %v8981_v54 = vadd.f32 %v2395_v9, %v2052_v37  ;;  %v2055_v33 = vadd.f32 %v6627_v0, %v8275_v39  ;;  %v2398_v11 = vpop.f32.mrf.mxu0  ;;  %v5779_v39 = vld [vmem:[%s9946_s0 + $0x302] sm:$0xff] }
 0x1b0   :  { %v1848_v10 = vpop.f32.mrf.mxu1 }
 0x1b1   :  { %v8986_v34 = vadd.f32 %v6693_v57, %v2055_v33  ;;  %v2053_v29 = vadd.f32 %v1848_v10, %v8281_v12  ;;  %v6696_v53 = vpop.f32.mrf.mxu0  ;;  %6859 = vmatmul.mubr.msk.bf16.gmra.mxu0 %vm218_vm2, %v3292_v27  ;;  %v5780_v12 = vld [vmem:[%s9946_s0 + $0x30a] sm:$0xff] }
 0x1b2   :  { %v6630_v47 = vpop.f32.mrf.mxu1  ;;  %6793 = vmatmul.mubr.msk.bf16.gmra.mxu1 %vm218_vm2, %v8979_v56  ;;  %6862 = vmatprep.mubr.msk.bf16.mxu0 %vm218_vm2, %v3293_v4  ;;  %v9019_v37 = vpack.c.bf16 %v5780_v12, %v5779_v39  ;;  %v5880_v12 = vld [vmem:[%s9946_s0 + $0x348] sm:$0xff] }
 0x1b3   :  { %v8995_v5 = vadd.f32 %v2398_v11, %v2053_v29  ;;  %v2058_v6 = vadd.f32 %v6630_v47, %v8299_v58  ;;  %6796 = vmatprep.mubr.msk.bf16.mxu1 %vm218_vm2, %v8984_v3  ;;  %v5877_v11 = vld [vmem:[%s9946_s0 + $0x320] sm:$0xff]  ;;  %v2411_v51 = vpop.f32.mrf.mxu0 }
 0x1b4   :  { %v1861_v28 = vpop.f32.mrf.mxu1  ;;  %v5781_v58 = vld [vmem:[%s9946_s0 + $0x31a] sm:$0xff]  ;;  %v3294_v0 = vpack.c.bf16 %v5877_v11, %v5876_v63  ;;  %v5881_v63 = vld [vmem:[%s9946_s0 + $0x350] sm:$0xff] }
 0x1b5   :  { %v9016_v9 = vadd.f32 %v6696_v53, %v2058_v6  ;;  %v2056_v49 = vadd.f32 %v1861_v28, %v8302_v25  ;;  %v6697_v44 = vpop.f32.mrf.mxu0  ;;  %v9024_v33 = vpack.c.bf16 %v5782_v40, %v5781_v58  ;;  %v5783_v25 = vld [vmem:[%s9946_s0 + $0x332] sm:$0xff] }
 0x1b6   :  { %v6631_v7 = vpop.f32.mrf.mxu1  ;;  %v5915_v28 = vld [vmem:[%s9946_s0 + $0x31] sm:$0xff] }
 0x1b7   :  { %v9021_v57 = vadd.f32 %v2411_v51, %v2056_v49  ;;  %v2059_v27 = vadd.f32 %v6631_v7, %v8305_v20  ;;  %10094 = vst [vmem:[#allocation54_spill] sm:$0xff] %v9024_v33  ;;  %v2414_v10 = vpop.f32.mrf.mxu0 }
 0x1b8   :  { %v1864_v4 = vpop.f32.mrf.mxu1 }
 0x1b9   :  { %v9026_v29 = vadd.f32 %v6697_v44, %v2059_v27  ;;  %v2057_v47 = vadd.f32 %v1864_v4, %v8317_v24  ;;  %v6700_v6 = vpop.f32.mrf.mxu0  ;;  %6863 = vmatmul.mubr.msk.bf16.gmra.mxu0 %vm218_vm2, %v3294_v0  ;;  %v5784_v24 = vld [vmem:[%s9946_s0 + $0x33a] sm:$0xff]  ;;  %v3296_v44 = vpack.c.bf16 %v5881_v63, %v5880_v12 }
 0x1ba   :  { %v6634_v53 = vpop.f32.mrf.mxu1  ;;  %6797 = vmatmul.mubr.msk.bf16.gmra.mxu1 %vm218_vm2, %v9019_v37  ;;  %6866 = vmatprep.mubr.msk.bf16.mxu0 %vm218_vm2, %v8344_v19  ;;  %v5916_v19 = vld [vmem:[%s9946_s0 + $0x39] sm:$0xff]  ;;  %v9060_v7 = vpack.c.bf16 %v5784_v24, %v5783_v25 }
 0x1bb   :  { %v9035_v20 = vadd.f32 %v2414_v10, %v2057_v47  ;;  %v2062_v39 = vadd.f32 %v6634_v53, %v8341_v52  ;;  %6800 = vmatprep.mubr.msk.bf16.mxu1 %vm218_vm2, %v9024_v33  ;;  %v2427_v52 = vpop.f32.mrf.mxu0  ;;  %v3815_v4 = vpack.c.bf16 %v5916_v19, %v5915_v28 }
 0x1bc   :  { %v1877_v11 = vpop.f32.mrf.mxu1 }
 0x1bd   :  { %v9057_v51 = vadd.f32 %v6700_v6, %v2062_v39  ;;  %v2060_v58 = vadd.f32 %v1877_v11, %v8346_v60  ;;  %v6701_v49 = vpop.f32.mrf.mxu0 }
 0x1be   :  { %v6635_v40 = vpop.f32.mrf.mxu1 }
 0x1bf   :  { %v9062_v0 = vadd.f32 %v2427_v52, %v2060_v58  ;;  %v2063_v27 = vadd.f32 %v6635_v40, %v8349_v45  ;;  %v2430_v47 = vpop.f32.mrf.mxu0  ;;  %v5917_v45 = vld [vmem:[%s9946_s0 + $0x49] sm:$0xff] }
 0x1c0   :  { %v1880_v10 = vpop.f32.mrf.mxu1 }
 0x1c1   :  { %v9065_v53 = vadd.f32 %v6701_v49, %v2063_v27  ;;  %v2061_v33 = vadd.f32 %v1880_v10, %v8358_v15  ;;  %v6704_v39 = vpop.f32.mrf.mxu0  ;;  %6867 = vmatmul.mubr.msk.bf16.gmra.mxu0 %vm218_vm2, %v3296_v44  ;;  %v5918_v15 = vld [vmem:[%s9946_s0 + $0x51] sm:$0xff] }
 0x1c2   :  { %v6638_v6 = vpop.f32.mrf.mxu1  ;;  %6801 = vmatmul.mubr.msk.bf16.gmra.mxu1 %vm218_vm2, %v9060_v7  ;;  %6938 = vmatprep.mubr.msk.bf16.mxu0 %vm218_vm2, %v8387_v42  ;;  %v3816_v28 = vpack.c.bf16 %v5918_v15, %v5917_v45 }
 0x1c3   :  { %v9071_v60 = vadd.f32 %v2430_v47, %v2061_v33  ;;  %v2066_v25 = vadd.f32 %v6638_v6, %v8375_v21  ;;  %6872 = vmatprep.mubr.msk.bf16.mxu1 %vm218_vm2, %v3815_v4  ;;  %v2443_v12 = vpop.f32.mrf.mxu0  ;;  %v5919_v33 = vld [vmem:[%s9946_s0 + $0x61] sm:$0xff]  ;;  %v5920_v21 = vld [vmem:[%s9946_s0 + $0x69] sm:$0xff] }
 0x1c4   :  { %v1893_v24 = vpop.f32.mrf.mxu1  ;;  %v3817_v40 = vpack.c.bf16 %v5920_v21, %v5919_v33 }
 0x1c5   :  { %v9089_v63 = vadd.f32 %v6704_v39, %v2066_v25  ;;  %v2064_v42 = vadd.f32 %v1893_v24, %v8389_v32  ;;  %v6705_v52 = vpop.f32.mrf.mxu0  ;;  %v5922_v39 = vld [vmem:[%s9946_s0 + $0x81] sm:$0xff] }
 0x1c6   :  { %v6639_v11 = vpop.f32.mrf.mxu1  ;;  %v10099_v24 = vld [vmem:[#allocation4_spill] sm:$0xff] }
 0x1c7   :  { %v9092_v19 = vadd.f32 %v2443_v12, %v2064_v42  ;;  %v2067_v58 = vadd.f32 %v6639_v11, %v8394_v17  ;;  %v2446_v44 = vpop.f32.mrf.mxu0  ;;  %v10097_v17 = vld [vmem:[#allocation38_spill] sm:$0xff] }
 0x1c8   :  { %v1896_v49 = vpop.f32.mrf.mxu1 }
 0x1c9   :  { %v9095_v27 = vadd.f32 %v6705_v52, %v2067_v58  ;;  %v2065_v4 = vadd.f32 %v1896_v49, %v8406_v22  ;;  %v6708_v47 = vpop.f32.mrf.mxu0  ;;  %6939 = vmatmul.mubr.msk.bf16.vlgmr.msra.gmra.mxu0 %vm218_vm2, %v8392_v41  ;;  %v5921_v22 = vld [vmem:[%s9946_s0 + $0x79] sm:$0xff]  ;;  %v5923_v41 = vld [vmem:[%s9946_s0 + $0x91] sm:$0xff]  ;;  %v10101_v52 = vld [vmem:[#allocation9_spill] sm:$0xff] }
 0x1ca   :  { %v6642_v10 = vpop.f32.mrf.mxu1  ;;  %6873 = vmatmul.mubr.msk.bf16.vlgmr.msra.gmra.mxu1 %vm218_vm2, %v3816_v28  ;;  %6942 = vmatprep.mubr.msk.bf16.mxu0 %vm218_vm2, %v10097_v17  ;;  %v3818_v42 = vpack.c.bf16 %v5922_v39, %v5921_v22  ;;  %v10106_v22 = vld [vmem:[#allocation6_spill] sm:$0xff] }
 0x1cb   :  { %10095 = vst [vmem:[#allocation55_spill] sm:$0xff] %v9095_v27  ;;  %v9101_v32 = vadd.f32 %v2446_v44, %v2065_v4  ;;  %v2070_v6 = vadd.f32 %v6642_v10, %v8432_v48  ;;  %6876 = vmatprep.mubr.msk.bf16.mxu1 %vm218_vm2, %v3817_v40  ;;  %v2459_v45 = vpop.f32.mrf.mxu0  ;;  %v5924_v48 = vld [vmem:[%s9946_s0 + $0x99] sm:$0xff]  ;;  %v10103_v4 = vld [vmem:[#allocation5_spill] sm:$0xff] }
 0x1cc   :  { %v1909_v25 = vpop.f32.mrf.mxu1  ;;  %v3819_v58 = vpack.c.bf16 %v5924_v48, %v5923_v41  ;;  %v5926_v41 = vld [vmem:[%s9946_s0 + $0xb1] sm:$0xff] }
 0x1cd   :  { %10096 = vst [vmem:[#allocation56_spill] sm:$0xff] %v9101_v32  ;;  %v9119_v15 = vadd.f32 %v6708_v47, %v2070_v6  ;;  %v2068_v12 = vadd.f32 %v1909_v25, %v10099_v24  ;;  %v6709_v21 = vpop.f32.mrf.mxu0  ;;  %v10104_v47 = vld [vmem:[#allocation7_spill] sm:$0xff]  ;;  %v10107_v25 = vld [vmem:[#allocation8_spill] sm:$0xff] }
 0x1ce   :  { %v6643_v33 = vpop.f32.mrf.mxu1 }
 0x1cf   :  { %10098 = vst [vmem:[#allocation38_spill] sm:$0xff] %v9119_v15  ;;  %v9122_v11 = vadd.f32 %v2459_v45, %v2068_v12  ;;  %v2071_v28 = vadd.f32 %v6643_v33, %v10101_v52  ;;  %v2462_v49 = vpop.f32.mrf.mxu0  ;;  %v5925_v45 = vld [vmem:[%s9946_s0 + $0xa9] sm:$0xff]  ;;  %v5927_v12 = vld [vmem:[%s9946_s0 + $0xc1] sm:$0xff] }
 0x1d0   :  { %v1912_v40 = vpop.f32.mrf.mxu1  ;;  %v5928_v33 = vld [vmem:[%s9946_s0 + $0xc9] sm:$0xff] }
 0x1d1   :  { %10100 = vst [vmem:[#allocation4_spill] sm:$0xff] %v9122_v11  ;;  %v9125_v44 = vadd.f32 %v6709_v21, %v2071_v28  ;;  %v2069_v10 = vadd.f32 %v1912_v40, %v10103_v4  ;;  %v6712_v32 = vpop.f32.mrf.mxu0  ;;  %6943 = vmatmul.mubr.msk.bf16.gmra.mxu0 %vm218_vm2, %v10104_v47  ;;  %v3820_v40 = vpack.c.bf16 %v5926_v41, %v5925_v45  ;;  %v10111_v4 = vld [vmem:[#allocation12_spill] sm:$0xff]  ;;  %v10116_v45 = vld [vmem:[#allocation14_spill] sm:$0xff] }
 0x1d2   :  { %v6646_v17 = vpop.f32.mrf.mxu1  ;;  %6877 = vmatmul.mubr.msk.bf16.gmra.mxu1 %vm218_vm2, %v3818_v42  ;;  %6946 = vmatprep.mubr.msk.bf16.mxu0 %vm218_vm2, %v10107_v25  ;;  %v10109_v42 = vld [vmem:[#allocation10_spill] sm:$0xff] }
 0x1d3   :  { %10102 = vst [vmem:[#allocation9_spill] sm:$0xff] %v9125_v44  ;;  %v9131_v6 = vadd.f32 %v2462_v49, %v2069_v10  ;;  %v2074_v39 = vadd.f32 %v6646_v17, %v10106_v22  ;;  %6880 = vmatprep.mubr.msk.bf16.mxu1 %vm218_vm2, %v3819_v58  ;;  %v2475_v24 = vpop.f32.mrf.mxu0  ;;  %v3821_v17 = vpack.c.bf16 %v5928_v33, %v5927_v12 }
 0x1d4   :  { %v1925_v48 = vpop.f32.mrf.mxu1 }
 0x1d5   :  { %10105 = vst [vmem:[#allocation5_spill] sm:$0xff] %v9131_v6  ;;  %v9149_v21 = vadd.f32 %v6712_v32, %v2074_v39  ;;  %v2072_v52 = vadd.f32 %v1925_v48, %v10109_v42  ;;  %v6713_v58 = vpop.f32.mrf.mxu0  ;;  %v10113_v6 = vld [vmem:[#allocation13_spill] sm:$0xff]  ;;  %v10114_v32 = vld [vmem:[#allocation11_spill] sm:$0xff] }
 0x1d6   :  { %v6647_v28 = vpop.f32.mrf.mxu1  ;;  %v10117_v48 = vld [vmem:[#allocation15_spill] sm:$0xff] }
 0x1d7   :  { %10108 = vst [vmem:[#allocation7_spill] sm:$0xff] %v9149_v21  ;;  %v9152_v49 = vadd.f32 %v2475_v24, %v2072_v52  ;;  %v2075_v10 = vadd.f32 %v6647_v28, %v10111_v4  ;;  %v2478_v22 = vpop.f32.mrf.mxu0  ;;  %v5930_v24 = vld [vmem:[%s9946_s0 + $0xe1] sm:$0xff] }
 0x1d8   :  { %v1928_v47 = vpop.f32.mrf.mxu1  ;;  %v10119_v52 = vld [vmem:[#allocation40_spill] sm:$0xff] }
 0x1d9   :  { %10110 = vst [vmem:[#allocation6_spill] sm:$0xff] %v9152_v49  ;;  %v9155_v25 = vadd.f32 %v6713_v58, %v2075_v10  ;;  %v2073_v44 = vadd.f32 %v1928_v47, %v10113_v6  ;;  %v6716_v15 = vpop.f32.mrf.mxu0  ;;  %6947 = vmatmul.mubr.msk.bf16.gmra.mxu0 %vm218_vm2, %v10114_v32  ;;  %v5929_v6 = vld [vmem:[%s9946_s0 + $0xd9] sm:$0xff] }
 0x1da   :  { %v6650_v11 = vpop.f32.mrf.mxu1  ;;  %6881 = vmatmul.mubr.msk.bf16.gmra.mxu1 %vm218_vm2, %v3820_v40  ;;  %6950 = vmatprep.mubr.msk.bf16.mxu0 %vm218_vm2, %v10117_v48  ;;  %v3822_v4 = vpack.c.bf16 %v5930_v24, %v5929_v6  ;;  %v10126_v6 = vld [vmem:[#allocation18_spill] sm:$0xff] }
 0x1db   :  { %10112 = vst [vmem:[#allocation8_spill] sm:$0xff] %v9155_v25  ;;  %v9161_v39 = vadd.f32 %v2478_v22, %v2073_v44  ;;  %v2078_v41 = vadd.f32 %v6650_v11, %v10116_v45  ;;  %6884 = vmatprep.mubr.msk.bf16.mxu1 %vm218_vm2, %v3821_v17  ;;  %v2491_v33 = vpop.f32.mrf.mxu0  ;;  %v5931_v44 = vld [vmem:[%s9946_s0 + $0xf1] sm:$0xff]  ;;  %v5932_v11 = vld [vmem:[%s9946_s0 + $0xf9] sm:$0xff]  ;;  %v10121_v17 = vld [vmem:[#allocation41_spill] sm:$0xff] }
 0x1dc   :  { %v1941_v12 = vpop.f32.mrf.mxu1  ;;  %v3823_v22 = vpack.c.bf16 %v5932_v11, %v5931_v44 }
 0x1dd   :  { %10115 = vst [vmem:[#allocation10_spill] sm:$0xff] %v9161_v39  ;;  %v9179_v42 = vadd.f32 %v6716_v15, %v2078_v41  ;;  %v2076_v28 = vadd.f32 %v1941_v12, %v10119_v52  ;;  %v6717_v40 = vpop.f32.mrf.mxu0  ;;  %v10123_v39 = vld [vmem:[#allocation17_spill] sm:$0xff]  ;;  %v10124_v15 = vld [vmem:[#allocation16_spill] sm:$0xff]  ;;  %v10127_v12 = vld [vmem:[#allocation19_spill] sm:$0xff] }
 0x1de   :  { %v6651_v58 = vpop.f32.mrf.mxu1 }
 0x1df   :  { %10118 = vst [vmem:[#allocation12_spill] sm:$0xff] %v9179_v42  ;;  %v9182_v10 = vadd.f32 %v2491_v33, %v2076_v28  ;;  %v2079_v47 = vadd.f32 %v6651_v58, %v10121_v17  ;;  %v2494_v45 = vpop.f32.mrf.mxu0  ;;  %v5934_v33 = vld [vmem:[%s9946_s0 + $0x111] sm:$0xff] }
 0x1e0   :  { %v1944_v32 = vpop.f32.mrf.mxu1  ;;  %v10129_v28 = vld [vmem:[#allocation42_spill] sm:$0xff] }
 0x1e1   :  { %10120 = vst [vmem:[#allocation13_spill] sm:$0xff] %v9182_v10  ;;  %v9185_v48 = vadd.f32 %v6717_v40, %v2079_v47  ;;  %v2077_v25 = vadd.f32 %v1944_v32, %v10123_v39  ;;  %v6720_v21 = vpop.f32.mrf.mxu0  ;;  %6951 = vmatmul.mubr.msk.bf16.gmra.mxu0 %vm218_vm2, %v10124_v15  ;;  %v5933_v39 = vld [vmem:[%s9946_s0 + $0x109] sm:$0xff] }
 0x1e2   :  { %v6654_v49 = vpop.f32.mrf.mxu1  ;;  %6885 = vmatmul.mubr.msk.bf16.gmra.mxu1 %vm218_vm2, %v3822_v4  ;;  %6954 = vmatprep.mubr.msk.bf16.mxu0 %vm218_vm2, %v10127_v12  ;;  %v3824_v17 = vpack.c.bf16 %v5934_v33, %v5933_v39  ;;  %v10136_v39 = vld [vmem:[#allocation22_spill] sm:$0xff] }
 0x1e3   :  { %10122 = vst [vmem:[#allocation11_spill] sm:$0xff] %v9185_v48  ;;  %v9191_v41 = vadd.f32 %v2494_v45, %v2077_v25  ;;  %v2082_v24 = vadd.f32 %v6654_v49, %v10126_v6  ;;  %6888 = vmatprep.mubr.msk.bf16.mxu1 %vm218_vm2, %v3823_v22  ;;  %v2507_v11 = vpop.f32.mrf.mxu0  ;;  %v5935_v25 = vld [vmem:[%s9946_s0 + $0x121] sm:$0xff]  ;;  %v5936_v49 = vld [vmem:[%s9946_s0 + $0x129] sm:$0xff]  ;;  %v10131_v22 = vld [vmem:[#allocation43_spill] sm:$0xff] }
 0x1e4   :  { %v1957_v44 = vpop.f32.mrf.mxu1  ;;  %v3825_v45 = vpack.c.bf16 %v5936_v49, %v5935_v25 }
 0x1e5   :  { %10125 = vst [vmem:[#allocation14_spill] sm:$0xff] %v9191_v41  ;;  %v9209_v52 = vadd.f32 %v6720_v21, %v2082_v24  ;;  %v2080_v58 = vadd.f32 %v1957_v44, %v10129_v28  ;;  %v6721_v4 = vpop.f32.mrf.mxu0  ;;  %v10133_v41 = vld [vmem:[#allocation21_spill] sm:$0xff]  ;;  %v10134_v21 = vld [vmem:[#allocation20_spill] sm:$0xff]  ;;  %v10137_v44 = vld [vmem:[#allocation23_spill] sm:$0xff] }
 0x1e6   :  { %v6655_v40 = vpop.f32.mrf.mxu1 }
 0x1e7   :  { %10128 = vst [vmem:[#allocation15_spill] sm:$0xff] %v9209_v52  ;;  %v9212_v47 = vadd.f32 %v2507_v11, %v2080_v58  ;;  %v2083_v32 = vadd.f32 %v6655_v40, %v10131_v22  ;;  %v2510_v6 = vpop.f32.mrf.mxu0  ;;  %v5938_v11 = vld [vmem:[%s9946_s0 + $0x141] sm:$0xff] }
 0x1e8   :  { %v1960_v15 = vpop.f32.mrf.mxu1  ;;  %v10139_v58 = vld [vmem:[#allocation44_spill] sm:$0xff] }
 0x1e9   :  { %10130 = vst [vmem:[#allocation40_spill] sm:$0xff] %v9212_v47  ;;  %v9215_v12 = vadd.f32 %v6721_v4, %v2083_v32  ;;  %v2081_v48 = vadd.f32 %v1960_v15, %v10133_v41  ;;  %v6724_v42 = vpop.f32.mrf.mxu0  ;;  %6955 = vmatmul.mubr.msk.bf16.gmra.mxu0 %vm218_vm2, %v10134_v21  ;;  %v5937_v41 = vld [vmem:[%s9946_s0 + $0x139] sm:$0xff] }
 0x1ea   :  { %v6658_v10 = vpop.f32.mrf.mxu1  ;;  %6889 = vmatmul.mubr.msk.bf16.gmra.mxu1 %vm218_vm2, %v3824_v17  ;;  %6958 = vmatprep.mubr.msk.bf16.mxu0 %vm218_vm2, %v10137_v44  ;;  %v3826_v22 = vpack.c.bf16 %v5938_v11, %v5937_v41  ;;  %v10146_v41 = vld [vmem:[#allocation26_spill] sm:$0xff] }
 0x1eb   :  { %10132 = vst [vmem:[#allocation41_spill] sm:$0xff] %v9215_v12  ;;  %v9221_v24 = vadd.f32 %v2510_v6, %v2081_v48  ;;  %v2086_v33 = vadd.f32 %v6658_v10, %v10136_v39  ;;  %6892 = vmatprep.mubr.msk.bf16.mxu1 %vm218_vm2, %v3825_v45  ;;  %v2523_v49 = vpop.f32.mrf.mxu0  ;;  %v5939_v48 = vld [vmem:[%s9946_s0 + $0x151] sm:$0xff]  ;;  %v5940_v10 = vld [vmem:[%s9946_s0 + $0x159] sm:$0xff]  ;;  %v10141_v45 = vld [vmem:[#allocation45_spill] sm:$0xff] }
 0x1ec   :  { %v1973_v25 = vpop.f32.mrf.mxu1  ;;  %v3827_v6 = vpack.c.bf16 %v5940_v10, %v5939_v48 }
 0x1ed   :  { %10135 = vst [vmem:[#allocation17_spill] sm:$0xff] %v9221_v24  ;;  %v9239_v28 = vadd.f32 %v6724_v42, %v2086_v33  ;;  %v2084_v40 = vadd.f32 %v1973_v25, %v10139_v58  ;;  %v6725_v17 = vpop.f32.mrf.mxu0  ;;  %v10143_v24 = vld [vmem:[#allocation25_spill] sm:$0xff]  ;;  %v10144_v42 = vld [vmem:[#allocation24_spill] sm:$0xff]  ;;  %v10147_v25 = vld [vmem:[#allocation27_spill] sm:$0xff] }
 0x1ee   :  { %v6659_v4 = vpop.f32.mrf.mxu1 }
 0x1ef   :  { %10138 = vst [vmem:[#allocation16_spill] sm:$0xff] %v9239_v28  ;;  %v9242_v32 = vadd.f32 %v2523_v49, %v2084_v40  ;;  %v2087_v15 = vadd.f32 %v6659_v4, %v10141_v45  ;;  %v2526_v39 = vpop.f32.mrf.mxu0  ;;  %v5942_v49 = vld [vmem:[%s9946_s0 + $0x171] sm:$0xff] }
 0x1f0   :  { %v1976_v21 = vpop.f32.mrf.mxu1  ;;  %v10149_v40 = vld [vmem:[#allocation46_spill] sm:$0xff] }
 0x1f1   :  { %10140 = vst [vmem:[#allocation18_spill] sm:$0xff] %v9242_v32  ;;  %v9245_v44 = vadd.f32 %v6725_v17, %v2087_v15  ;;  %v2085_v12 = vadd.f32 %v1976_v21, %v10143_v24  ;;  %v6728_v52 = vpop.f32.mrf.mxu0  ;;  %6959 = vmatmul.mubr.msk.bf16.gmra.mxu0 %vm218_vm2, %v10144_v42  ;;  %v5941_v24 = vld [vmem:[%s9946_s0 + $0x169] sm:$0xff] }
 0x1f2   :  { %v6662_v47 = vpop.f32.mrf.mxu1  ;;  %6893 = vmatmul.mubr.msk.bf16.gmra.mxu1 %vm218_vm2, %v3826_v22  ;;  %6962 = vmatprep.mubr.msk.bf16.mxu0 %vm218_vm2, %v10147_v25  ;;  %v3828_v45 = vpack.c.bf16 %v5942_v49, %v5941_v24  ;;  %v10156_v49 = vld [vmem:[#allocation30_spill] sm:$0xff] }
 0x1f3   :  { %10142 = vst [vmem:[#allocation19_spill] sm:$0xff] %v9245_v44  ;;  %v9251_v33 = vadd.f32 %v2526_v39, %v2085_v12  ;;  %v2090_v11 = vadd.f32 %v6662_v47, %v10146_v41  ;;  %6896 = vmatprep.mubr.msk.bf16.mxu1 %vm218_vm2, %v3827_v6  ;;  %v2539_v10 = vpop.f32.mrf.mxu0  ;;  %v5943_v12 = vld [vmem:[%s9946_s0 + $0x181] sm:$0xff]  ;;  %v5944_v47 = vld [vmem:[%s9946_s0 + $0x189] sm:$0xff]  ;;  %v10151_v6 = vld [vmem:[#allocation47_spill] sm:$0xff] }
 0x1f4   :  { %v1989_v48 = vpop.f32.mrf.mxu1  ;;  %v3829_v39 = vpack.c.bf16 %v5944_v47, %v5943_v12 }
 0x1f5   :  { %10145 = vst [vmem:[#allocation42_spill] sm:$0xff] %v9251_v33  ;;  %v9269_v58 = vadd.f32 %v6728_v52, %v2090_v11  ;;  %v2088_v4 = vadd.f32 %v1989_v48, %v10149_v40  ;;  %v6729_v22 = vpop.f32.mrf.mxu0  ;;  %v10153_v33 = vld [vmem:[#allocation29_spill] sm:$0xff]  ;;  %v10154_v52 = vld [vmem:[#allocation28_spill] sm:$0xff]  ;;  %v5945_v11 = vld [vmem:[%s9946_s0 + $0x199] sm:$0xff] }
 0x1f6   :  { %v6663_v17 = vpop.f32.mrf.mxu1 }
 0x1f7   :  { %10148 = vst [vmem:[#allocation43_spill] sm:$0xff] %v9269_v58  ;;  %v9272_v15 = vadd.f32 %v2539_v10, %v2088_v4  ;;  %v2091_v21 = vadd.f32 %v6663_v17, %v10151_v6  ;;  %v2542_v41 = vpop.f32.mrf.mxu0  ;;  %v6042_v10 = vld [vmem:[%s9946_s0 + $0x19a] sm:$0xff]  ;;  %v10157_v4 = vld [vmem:[#allocation33_spill] sm:$0xff] }
 0x1f8   :  { %v1992_v42 = vpop.f32.mrf.mxu1 }
 0x1f9   :  { %10150 = vst [vmem:[#allocation21_spill] sm:$0xff] %v9272_v15  ;;  %v9275_v25 = vadd.f32 %v6729_v22, %v2091_v21  ;;  %v2089_v44 = vadd.f32 %v1992_v42, %v10153_v33  ;;  %v6732_v28 = vpop.f32.mrf.mxu0  ;;  %6963 = vmatmul.mubr.msk.bf16.gmra.mxu0 %vm218_vm2, %v10154_v52  ;;  %v5946_v33 = vld [vmem:[%s9946_s0 + $0x1a1] sm:$0xff]  ;;  %v10158_v42 = vld [vmem:[#allocation31_spill] sm:$0xff] }
 0x1fa   :  { %v6666_v32 = vpop.f32.mrf.mxu1  ;;  %6897 = vmatmul.mubr.msk.bf16.gmra.mxu1 %vm218_vm2, %v3828_v45  ;;  %6966 = vmatprep.mubr.msk.bf16.mxu0 %vm218_vm2, %v8706_v38  ;;  %v5948_v38 = vld [vmem:[%s9946_s0 + $0x1e9] sm:$0xff]  ;;  %v3830_v6 = vpack.c.bf16 %v5946_v33, %v5945_v11  ;;  %v10159_v15 = vld [vmem:[#allocation32_spill] sm:$0xff]  ;;  %v10160_v11 = vld [vmem:[#allocation34_spill] sm:$0xff] }
 0x1fb   :  { %10152 = vst [vmem:[#allocation20_spill] sm:$0xff] %v9275_v25  ;;  %v9284_v24 = vadd.f32 %v2542_v41, %v2089_v44  ;;  %v2094_v48 = vadd.f32 %v6666_v32, %v10156_v49  ;;  %6900 = vmatprep.mubr.msk.bf16.mxu1 %vm218_vm2, %v3829_v39  ;;  %v6043_v44 = vld [vmem:[%s9946_s0 + $0x1a2] sm:$0xff]  ;;  %v2555_v47 = vpop.f32.mrf.mxu0 }
 0x1fc   :  { %v2005_v12 = vpop.f32.mrf.mxu1  ;;  %v5947_v32 = vld [vmem:[%s9946_s0 + $0x1e1] sm:$0xff]  ;;  %v4380_v21 = vpack.c.bf16 %v6043_v44, %v6042_v10  ;;  %v5949_v10 = vld [vmem:[%s9946_s0 + $0x1f9] sm:$0xff] }
 0x1fd   :  { %10155 = vst [vmem:[#allocation22_spill] sm:$0xff] %v9284_v24  ;;  %v9305_v40 = vadd.f32 %v6732_v28, %v2094_v48  ;;  %v2092_v17 = vadd.f32 %v2005_v12, %v10157_v4  ;;  %v6733_v45 = vpop.f32.mrf.mxu0  ;;  %v3831_v52 = vpack.c.bf16 %v5948_v38, %v5947_v32 }
 0x1fe   :  { %v6667_v22 = vpop.f32.mrf.mxu1 }
 0x1ff   :  { %v9308_v39 = vadd.f32 %v2555_v47, %v2092_v17  ;;  %v2095_v41 = vadd.f32 %v6667_v22, %v10158_v42  ;;  %v2558_v24 = vpop.f32.mrf.mxu0  ;;  %v10161_v42 = vld [vmem:[#allocation36_spill] sm:$0xff] }
 0x200   :  { %v2008_v49 = vpop.f32.mrf.mxu1 }
 0x201   :  { %v9311_v25 = vadd.f32 %v6733_v45, %v2095_v41  ;;  %v2093_v58 = vadd.f32 %v2008_v49, %v10159_v15  ;;  %v6736_v28 = vpop.f32.mrf.mxu0  ;;  %6967 = vmatmul.mubr.msk.bf16.gmra.mxu0 %vm218_vm2, %v4380_v21  ;;  %v5950_v15 = vld [vmem:[%s9946_s0 + $0x201] sm:$0xff] }
 0x202   :  { %v6670_v27 = vpop.f32.mrf.mxu1  ;;  %6901 = vmatmul.mubr.msk.bf16.gmra.mxu1 %vm218_vm2, %v3830_v6  ;;  %6970 = vmatprep.mubr.msk.bf16.mxu0 %vm218_vm2, %v8749_v8  ;;  %v3832_v38 = vpack.c.bf16 %v5950_v15, %v5949_v10 }
 0x203   :  { %v9316_v48 = vadd.f32 %v2558_v24, %v2093_v58  ;;  %v2098_v33 = vadd.f32 %v6670_v27, %v10160_v11  ;;  %6904 = vmatprep.mubr.msk.bf16.mxu1 %vm218_vm2, %v3831_v52  ;;  %v2571_v12 = vpop.f32.mrf.mxu0  ;;  %v5951_v58 = vld [vmem:[%s9946_s0 + $0x211] sm:$0xff]  ;;  %v5952_v27 = vld [vmem:[%s9946_s0 + $0x219] sm:$0xff] }
 0x204   :  { %v2021_v44 = vpop.f32.mrf.mxu1  ;;  %v3833_v22 = vpack.c.bf16 %v5952_v27, %v5951_v58 }
 0x205   :  { %v9334_v24 = vadd.f32 %v6736_v28, %v2098_v33  ;;  %v2096_v8 = vadd.f32 %v2021_v44, %v8751_v30  ;;  %v6737_v32 = vpop.f32.mrf.mxu0  ;;  %v10162_v28 = vld [vmem:[#allocation35_spill] sm:$0xff]  ;;  %v5954_v33 = vld [vmem:[%s9946_s0 + $0x231] sm:$0xff]  ;;  %v5955_v44 = vld [vmem:[%s9946_s0 + $0x241] sm:$0xff] }
 0x206   :  { %v6671_v47 = vpop.f32.mrf.mxu1 }
 0x207   :  { %v9337_v4 = vadd.f32 %v2571_v12, %v2096_v8  ;;  %v2099_v17 = vadd.f32 %v6671_v47, %v8756_v43  ;;  %v2574_v6 = vpop.f32.mrf.mxu0  ;;  %v5953_v43 = vld [vmem:[%s9946_s0 + $0x229] sm:$0xff] }
 0x208   :  { %v2024_v45 = vpop.f32.mrf.mxu1  ;;  %v3834_v8 = vpack.c.bf16 %v5954_v33, %v5953_v43 }
 0x209   :  { %v9340_v21 = vadd.f32 %v6737_v32, %v2099_v17  ;;  %v2097_v41 = vadd.f32 %v2024_v45, %v10161_v42  ;;  %v6808_v49 = vpop.f32.mrf.mxu0  ;;  %6971 = vmatmul.mubr.msk.bf16.gmra.mxu0 %vm218_vm2, %v10162_v28 }
 0x20a   :  { %v6742_v52 = vpop.f32.mrf.mxu1  ;;  %6905 = vmatmul.mubr.msk.bf16.gmra.mxu1 %vm218_vm2, %v3832_v38  ;;  %6974 = vmatprep.mubr.msk.bf16.mxu0 %vm218_vm2, %v8795_v18 }
 0x20b   :  { %v9346_v30 = vadd.f32 %v2574_v6, %v2097_v41  ;;  %v3138_v11 = vadd.f32 %v6742_v52, %v8792_v16  ;;  %6908 = vmatprep.mubr.msk.bf16.mxu1 %vm218_vm2, %v3833_v22  ;;  %v3432_v15 = vpop.f32.mrf.mxu0  ;;  %v5956_v16 = vld [vmem:[%s9946_s0 + $0x249] sm:$0xff]  ;;  %v10163_v6 = vld [vmem:[#allocation39_spill] sm:$0xff] }
 0x20c   :  { %v2881_v10 = vpop.f32.mrf.mxu1  ;;  %v3835_v38 = vpack.c.bf16 %v5956_v16, %v5955_v44 }
 0x20d   :  { %v9364_v12 = vadd.f32 %v6808_v49, %v3138_v11  ;;  %v3136_v18 = vadd.f32 %v2881_v10, %v8797_v61  ;;  %v6809_v27 = vpop.f32.mrf.mxu0  ;;  %v10164_v49 = vld [vmem:[#allocation37_spill] sm:$0xff]  ;;  %v5958_v11 = vld [vmem:[%s9946_s0 + $0x261] sm:$0xff]  ;;  %v5959_v10 = vld [vmem:[%s9946_s0 + $0x271] sm:$0xff] }
 0x20e   :  { %v6743_v58 = vpop.f32.mrf.mxu1 }
 0x20f   :  { %v9367_v47 = vadd.f32 %v3432_v15, %v3136_v18  ;;  %v3139_v32 = vadd.f32 %v6743_v58, %v8802_v14  ;;  %v3435_v22 = vpop.f32.mrf.mxu0  ;;  %v5957_v14 = vld [vmem:[%s9946_s0 + $0x259] sm:$0xff] }
 0x210   :  { %v2884_v17 = vpop.f32.mrf.mxu1  ;;  %v3836_v18 = vpack.c.bf16 %v5958_v11, %v5957_v14 }
 0x211   :  { %v9370_v45 = vadd.f32 %v6809_v27, %v3139_v32  ;;  %v3137_v42 = vadd.f32 %v2884_v17, %v10163_v6  ;;  %v6812_v52 = vpop.f32.mrf.mxu0  ;;  %6975 = vmatmul.mubr.msk.bf16.gmra.mxu0 %vm218_vm2, %v10164_v49 }
 0x212   :  { %v6746_v41 = vpop.f32.mrf.mxu1  ;;  %6909 = vmatmul.mubr.msk.bf16.gmra.mxu1 %vm218_vm2, %v3834_v8  ;;  %6978 = vmatprep.mubr.msk.bf16.mxu0 %vm218_vm2, %v8841_v50 }
 0x213   :  { %v9376_v61 = vadd.f32 %v3435_v22, %v3137_v42  ;;  %v3142_v28 = vadd.f32 %v6746_v41, %v8838_v62  ;;  %6912 = vmatprep.mubr.msk.bf16.mxu1 %vm218_vm2, %v3835_v38  ;;  %v3448_v33 = vpop.f32.mrf.mxu0  ;;  %v5960_v62 = vld [vmem:[%s9946_s0 + $0x279] sm:$0xff]  ;;  %v10165_v22 = vld [vmem:[#allocation49_spill] sm:$0xff] }
 0x214   :  { %v2897_v43 = vpop.f32.mrf.mxu1  ;;  %v3837_v8 = vpack.c.bf16 %v5960_v62, %v5959_v10 }
 0x215   :  { %v9394_v15 = vadd.f32 %v6812_v52, %v3142_v28  ;;  %v3140_v50 = vadd.f32 %v2897_v43, %v8843_v46  ;;  %v6813_v16 = vpop.f32.mrf.mxu0  ;;  %v10166_v52 = vld [vmem:[#allocation48_spill] sm:$0xff]  ;;  %v5962_v28 = vld [vmem:[%s9946_s0 + $0x291] sm:$0xff] }
 0x216   :  { %v6747_v44 = vpop.f32.mrf.mxu1  ;;  %v5963_v43 = vld [vmem:[%s9946_s0 + $0x2a1] sm:$0xff] }
 0x217   :  { %v9397_v58 = vadd.f32 %v3448_v33, %v3140_v50  ;;  %v3143_v27 = vadd.f32 %v6747_v44, %v8848_v55  ;;  %v3451_v38 = vpop.f32.mrf.mxu0  ;;  %v5961_v55 = vld [vmem:[%s9946_s0 + $0x289] sm:$0xff] }
 0x218   :  { %v2900_v32 = vpop.f32.mrf.mxu1  ;;  %v3838_v50 = vpack.c.bf16 %v5962_v28, %v5961_v55 }
 0x219   :  { %v9400_v17 = vadd.f32 %v6813_v16, %v3143_v27  ;;  %v3141_v6 = vadd.f32 %v2900_v32, %v10165_v22  ;;  %v6816_v41 = vpop.f32.mrf.mxu0  ;;  %6979 = vmatmul.mubr.msk.bf16.gmra.mxu0 %vm218_vm2, %v10166_v52 }
 0x21a   :  { %v6750_v42 = vpop.f32.mrf.mxu1  ;;  %6913 = vmatmul.mubr.msk.bf16.gmra.mxu1 %vm218_vm2, %v3836_v18  ;;  %6982 = vmatprep.mubr.msk.bf16.mxu0 %vm218_vm2, %v8887_v1 }
 0x21b   :  { %v9406_v46 = vadd.f32 %v3451_v38, %v3141_v6  ;;  %v3146_v49 = vadd.f32 %v6750_v42, %v8884_v13  ;;  %6916 = vmatprep.mubr.msk.bf16.mxu1 %vm218_vm2, %v3837_v8  ;;  %v3464_v11 = vpop.f32.mrf.mxu0  ;;  %v5964_v13 = vld [vmem:[%s9946_s0 + $0x2a9] sm:$0xff]  ;;  %v10167_v38 = vld [vmem:[#allocation51_spill] sm:$0xff] }
 0x21c   :  { %v2913_v14 = vpop.f32.mrf.mxu1  ;;  %v3839_v18 = vpack.c.bf16 %v5964_v13, %v5963_v43 }
 0x21d   :  { %v9424_v33 = vadd.f32 %v6816_v41, %v3146_v49  ;;  %v3144_v1 = vadd.f32 %v2913_v14, %v8889_v36  ;;  %v6817_v62 = vpop.f32.mrf.mxu0  ;;  %v10168_v41 = vld [vmem:[#allocation50_spill] sm:$0xff]  ;;  %v5966_v49 = vld [vmem:[%s9946_s0 + $0x2c1] sm:$0xff] }
 0x21e   :  { %v6751_v10 = vpop.f32.mrf.mxu1  ;;  %v5967_v14 = vld [vmem:[%s9946_s0 + $0x2d1] sm:$0xff] }
 0x21f   :  { %v9427_v44 = vadd.f32 %v3464_v11, %v3144_v1  ;;  %v3147_v16 = vadd.f32 %v6751_v10, %v8894_v31  ;;  %v3467_v8 = vpop.f32.mrf.mxu0  ;;  %v5965_v31 = vld [vmem:[%s9946_s0 + $0x2b9] sm:$0xff] }
 0x220   :  { %v2916_v27 = vpop.f32.mrf.mxu1  ;;  %v3840_v1 = vpack.c.bf16 %v5966_v49, %v5965_v31 }
 0x221   :  { %v9430_v32 = vadd.f32 %v6817_v62, %v3147_v16  ;;  %v3145_v22 = vadd.f32 %v2916_v27, %v10167_v38  ;;  %v6820_v42 = vpop.f32.mrf.mxu0  ;;  %6983 = vmatmul.mubr.msk.bf16.gmra.mxu0 %vm218_vm2, %v10168_v41 }
 0x222   :  { %v6754_v6 = vpop.f32.mrf.mxu1  ;;  %6917 = vmatmul.mubr.msk.bf16.gmra.mxu1 %vm218_vm2, %v3838_v50  ;;  %6986 = vmatprep.mubr.msk.bf16.mxu0 %vm218_vm2, %v8933_v59 }
 0x223   :  { %v9436_v36 = vadd.f32 %v3467_v8, %v3145_v22  ;;  %v3150_v52 = vadd.f32 %v6754_v6, %v8930_v2  ;;  %6920 = vmatprep.mubr.msk.bf16.mxu1 %vm218_vm2, %v3839_v18  ;;  %v3480_v28 = vpop.f32.mrf.mxu0  ;;  %v5968_v2 = vld [vmem:[%s9946_s0 + $0x2d9] sm:$0xff]  ;;  %v10169_v8 = vld [vmem:[#allocation53_spill] sm:$0xff] }
 0x224   :  { %v2929_v55 = vpop.f32.mrf.mxu1  ;;  %v3841_v50 = vpack.c.bf16 %v5968_v2, %v5967_v14 }
 0x225   :  { %v9454_v11 = vadd.f32 %v6820_v42, %v3150_v52  ;;  %v3148_v59 = vadd.f32 %v2929_v55, %v8935_v26  ;;  %v6821_v13 = vpop.f32.mrf.mxu0  ;;  %v10170_v42 = vld [vmem:[#allocation52_spill] sm:$0xff]  ;;  %v5970_v52 = vld [vmem:[%s9946_s0 + $0x2f1] sm:$0xff] }
 0x226   :  { %v6755_v43 = vpop.f32.mrf.mxu1  ;;  %v5971_v55 = vld [vmem:[%s9946_s0 + $0x301] sm:$0xff] }
 0x227   :  { %v9457_v10 = vadd.f32 %v3480_v28, %v3148_v59  ;;  %v3151_v62 = vadd.f32 %v6755_v43, %v8940_v35  ;;  %v3483_v18 = vpop.f32.mrf.mxu0  ;;  %v5969_v35 = vld [vmem:[%s9946_s0 + $0x2e9] sm:$0xff] }
 0x228   :  { %v2932_v16 = vpop.f32.mrf.mxu1  ;;  %v3842_v59 = vpack.c.bf16 %v5970_v52, %v5969_v35 }
 0x229   :  { %v9460_v27 = vadd.f32 %v6821_v13, %v3151_v62  ;;  %v3149_v38 = vadd.f32 %v2932_v16, %v10169_v8  ;;  %v6824_v6 = vpop.f32.mrf.mxu0  ;;  %6987 = vmatmul.mubr.msk.bf16.gmra.mxu0 %vm218_vm2, %v10170_v42 }
 0x22a   :  { %v6758_v22 = vpop.f32.mrf.mxu1  ;;  %6921 = vmatmul.mubr.msk.bf16.gmra.mxu1 %vm218_vm2, %v3840_v1  ;;  %6990 = vmatprep.mubr.msk.bf16.mxu0 %vm218_vm2, %v8979_v56 }
 0x22b   :  { %v9466_v26 = vadd.f32 %v3483_v18, %v3149_v38  ;;  %v3154_v41 = vadd.f32 %v6758_v22, %v8976_v23  ;;  %6924 = vmatprep.mubr.msk.bf16.mxu1 %vm218_vm2, %v3841_v50  ;;  %v3496_v49 = vpop.f32.mrf.mxu0  ;;  %v5972_v23 = vld [vmem:[%s9946_s0 + $0x309] sm:$0xff] }
 0x22c   :  { %v2945_v31 = vpop.f32.mrf.mxu1  ;;  %v3843_v1 = vpack.c.bf16 %v5972_v23, %v5971_v55 }
 0x22d   :  { %v9484_v28 = vadd.f32 %v6824_v6, %v3154_v41  ;;  %v3152_v56 = vadd.f32 %v2945_v31, %v8981_v54  ;;  %v6825_v2 = vpop.f32.mrf.mxu0 }
 0x22e   :  { %v6759_v14 = vpop.f32.mrf.mxu1 }
 0x22f   :  { %v9487_v43 = vadd.f32 %v3496_v49, %v3152_v56  ;;  %v3155_v13 = vadd.f32 %v6759_v14, %v8986_v34  ;;  %v3499_v50 = vpop.f32.mrf.mxu0  ;;  %v5973_v34 = vld [vmem:[%s9946_s0 + $0x319] sm:$0xff] }
 0x230   :  { %v2948_v62 = vpop.f32.mrf.mxu1 }
 0x231   :  { %v9490_v16 = vadd.f32 %v6825_v2, %v3155_v13  ;;  %v3153_v18 = vadd.f32 %v2948_v62, %v8995_v5  ;;  %v6828_v38 = vpop.f32.mrf.mxu0  ;;  %6991 = vmatmul.mubr.msk.bf16.gmra.mxu0 %vm218_vm2, %v8984_v3  ;;  %v5974_v5 = vld [vmem:[%s9946_s0 + $0x321] sm:$0xff]  ;;  %v5975_v3 = vld [vmem:[%s9946_s0 + $0x331] sm:$0xff] }
 0x232   :  { %v6762_v8 = vpop.f32.mrf.mxu1  ;;  %6925 = vmatmul.mubr.msk.bf16.gmra.mxu1 %vm218_vm2, %v3842_v59  ;;  %6994 = vmatprep.mubr.msk.bf16.mxu0 %vm218_vm2, %v9019_v37  ;;  %v3844_v31 = vpack.c.bf16 %v5974_v5, %v5973_v34  ;;  %v10171_v62 = vld [vmem:[#allocation54_spill] sm:$0xff] }
 0x233   :  { %v9496_v54 = vadd.f32 %v3499_v50, %v3153_v18  ;;  %v3158_v22 = vadd.f32 %v6762_v8, %v9016_v9  ;;  %6928 = vmatprep.mubr.msk.bf16.mxu1 %vm218_vm2, %v3843_v1  ;;  %v3512_v42 = vpop.f32.mrf.mxu0  ;;  %v5976_v9 = vld [vmem:[%s9946_s0 + $0x339] sm:$0xff]  ;;  %v6074_v18 = vld [vmem:[%s9946_s0 + $0x34a] sm:$0xff] }
 0x234   :  { %v2961_v6 = vpop.f32.mrf.mxu1  ;;  %v3845_v23 = vpack.c.bf16 %v5976_v9, %v5975_v3  ;;  %v6075_v8 = vld [vmem:[%s9946_s0 + $0x352] sm:$0xff] }
 0x235   :  { %v9514_v41 = vadd.f32 %v6828_v38, %v3158_v22  ;;  %v3156_v37 = vadd.f32 %v2961_v6, %v9021_v57  ;;  %v6829_v52 = vpop.f32.mrf.mxu0  ;;  %v5977_v57 = vld [vmem:[%s9946_s0 + $0x349] sm:$0xff] }
 0x236   :  { %v6763_v35 = vpop.f32.mrf.mxu1 }
 0x237   :  { %v9517_v49 = vadd.f32 %v3512_v42, %v3156_v37  ;;  %v3159_v55 = vadd.f32 %v6763_v35, %v9026_v29  ;;  %v3515_v14 = vpop.f32.mrf.mxu0  ;;  %v4396_v42 = vpack.c.bf16 %v6075_v8, %v6074_v18 }
 0x238   :  { %v2964_v56 = vpop.f32.mrf.mxu1 }
 0x239   :  { %v9520_v2 = vadd.f32 %v6829_v52, %v3159_v55  ;;  %v3157_v59 = vadd.f32 %v2964_v56, %v9035_v20  ;;  %v6832_v1 = vpop.f32.mrf.mxu0  ;;  %6995 = vmatmul.mubr.msk.bf16.gmra.mxu0 %vm218_vm2, %v10171_v62  ;;  %v5978_v20 = vld [vmem:[%s9946_s0 + $0x351] sm:$0xff] }
 0x23a   :  { %v6766_v13 = vpop.f32.mrf.mxu1  ;;  %6929 = vmatmul.mubr.msk.bf16.gmra.mxu1 %vm218_vm2, %v3844_v31  ;;  %6998 = vmatprep.mubr.msk.bf16.mxu0 %vm218_vm2, %v9060_v7  ;;  %v3846_v6 = vpack.c.bf16 %v5978_v20, %v5977_v57 }
 0x23b   :  { %v9529_v50 = vadd.f32 %v3515_v14, %v3157_v59  ;;  %v3162_v29 = vadd.f32 %v6766_v13, %v9057_v51  ;;  %6932 = vmatprep.mubr.msk.bf16.mxu1 %vm218_vm2, %v3845_v23  ;;  %v3528_v22 = vpop.f32.mrf.mxu0 }
 0x23c   :  { %v2977_v38 = vpop.f32.mrf.mxu1 }
 0x23d   :  { %v9544_v51 = vadd.f32 %v6832_v1, %v3162_v29  ;;  %v3160_v34 = vadd.f32 %v2977_v38, %v9062_v0  ;;  %v6833_v7 = vpop.f32.mrf.mxu0  ;;  %v10173_v38 = vld [vmem:[#allocation56_spill] sm:$0xff] }
 0x23e   :  { %v6767_v5 = vpop.f32.mrf.mxu1 }
 0x23f   :  { %v9547_v3 = vadd.f32 %v3528_v22, %v3160_v34  ;;  %v3163_v9 = vadd.f32 %v6767_v5, %v9065_v53  ;;  %v3531_v35 = vpop.f32.mrf.mxu0 }
 0x240   :  { %v2980_v37 = vpop.f32.mrf.mxu1 }
 0x241   :  { %v9550_v52 = vadd.f32 %v6833_v7, %v3163_v9  ;;  %v3161_v31 = vadd.f32 %v2980_v37, %v9071_v60  ;;  %v6836_v23 = vpop.f32.mrf.mxu0  ;;  %6999 = vmatmul.mubr.msk.bf16.gmra.mxu0 %vm218_vm2, %v4396_v42  ;;  %v10172_v60 = vld [vmem:[#allocation55_spill] sm:$0xff]  ;;  %v10174_v7 = vld [vmem:[#allocation38_spill] sm:$0xff]  ;;  %v10175_v37 = vld [vmem:[#allocation4_spill] sm:$0xff] }
 0x242   :  { %v6770_v55 = vpop.f32.mrf.mxu1  ;;  %6933 = vmatmul.mubr.msk.bf16.gmra.mxu1 %vm218_vm2, %v3846_v6 }
 0x243   :  { %v9555_v0 = vadd.f32 %v3531_v35, %v3161_v31  ;;  %v3166_v56 = vadd.f32 %v6770_v55, %v9089_v63  ;;  %v3544_v59 = vpop.f32.mrf.mxu0 }
 0x244   :  { %v2993_v14 = vpop.f32.mrf.mxu1 }
 0x245   :  { %v9558_v13 = vadd.f32 %v6836_v23, %v3166_v56  ;;  %v3164_v53 = vadd.f32 %v2993_v14, %v9092_v19  ;;  %v6837_v62 = vpop.f32.mrf.mxu0  ;;  %v10176_v56 = vld [vmem:[#allocation9_spill] sm:$0xff] }
 0x246   :  { %v6771_v1 = vpop.f32.mrf.mxu1 }
 0x247   :  { %v9561_v57 = vadd.f32 %v3544_v59, %v3164_v53  ;;  %v3167_v29 = vadd.f32 %v6771_v1, %v10172_v60  ;;  %v3547_v18 = vpop.f32.mrf.mxu0 }
 0x248   :  { %v2996_v20 = vpop.f32.mrf.mxu1 }
 0x249   :  { %v9564_v8 = vadd.f32 %v6837_v62, %v3167_v29  ;;  %v3165_v22 = vadd.f32 %v2996_v20, %v10173_v38  ;;  %v6840_v63 = vpop.f32.mrf.mxu0  ;;  %v10177_v62 = vld [vmem:[#allocation5_spill] sm:$0xff]  ;;  %v10178_v38 = vld [vmem:[#allocation7_spill] sm:$0xff] }
 0x24a   :  { %v6774_v34 = vpop.f32.mrf.mxu1 }
 0x24b   :  { %v9567_v5 = vadd.f32 %v3547_v18, %v3165_v22  ;;  %v3170_v6 = vadd.f32 %v6774_v34, %v10174_v7  ;;  %v3560_v19 = vpop.f32.mrf.mxu0 }
 0x24c   :  { %v3009_v42 = vpop.f32.mrf.mxu1 }
 0x24d   :  { %v9570_v9 = vadd.f32 %v6840_v63, %v3170_v6  ;;  %v3168_v35 = vadd.f32 %v3009_v42, %v10175_v37  ;;  %v6841_v55 = vpop.f32.mrf.mxu0  ;;  %v10180_v6 = vld [vmem:[#allocation6_spill] sm:$0xff] }
 0x24e   :  { %v6775_v31 = vpop.f32.mrf.mxu1 }
 0x24f   :  { %v9573_v23 = vadd.f32 %v3560_v19, %v3168_v35  ;;  %v3171_v14 = vadd.f32 %v6775_v31, %v10176_v56  ;;  %v3563_v53 = vpop.f32.mrf.mxu0  ;;  %v10182_v31 = vld [vmem:[#allocation8_spill] sm:$0xff] }
 0x250   :  { %v3012_v59 = vpop.f32.mrf.mxu1 }
 0x251   :  { %v9576_v1 = vadd.f32 %v6841_v55, %v3171_v14  ;;  %v3169_v60 = vadd.f32 %v3012_v59, %v10177_v62  ;;  %v6844_v20 = vpop.f32.mrf.mxu0 }
 0x252   :  { %v6778_v29 = vpop.f32.mrf.mxu1 }
 0x253   :  { %v9579_v18 = vadd.f32 %v3563_v53, %v3169_v60  ;;  %v3174_v22 = vadd.f32 %v6778_v29, %v10178_v38  ;;  %v3576_v63 = vpop.f32.mrf.mxu0  ;;  %v10184_v53 = vld [vmem:[#allocation10_spill] sm:$0xff] }
 0x254   :  { %v3025_v34 = vpop.f32.mrf.mxu1 }
 0x255   :  { %v9582_v7 = vadd.f32 %v6844_v20, %v3174_v22  ;;  %v3172_v42 = vadd.f32 %v3025_v34, %v10180_v6  ;;  %v6845_v37 = vpop.f32.mrf.mxu0  ;;  %v10186_v20 = vld [vmem:[#allocation12_spill] sm:$0xff] }
 0x256   :  { %v6779_v19 = vpop.f32.mrf.mxu1 }
 0x257   :  { %10179 = vst [vmem:[#allocation23_spill] sm:$0xff] %v9582_v7  ;;  %v9585_v35 = vadd.f32 %v3576_v63, %v3172_v42  ;;  %v3175_v55 = vadd.f32 %v6779_v19, %v10182_v31  ;;  %v3579_v14 = vpop.f32.mrf.mxu0  ;;  %v10188_v63 = vld [vmem:[#allocation13_spill] sm:$0xff] }
 0x258   :  { %v3028_v56 = vpop.f32.mrf.mxu1 }
 0x259   :  { %10181 = vst [vmem:[#allocation44_spill] sm:$0xff] %v9585_v35  ;;  %v9588_v59 = vadd.f32 %v6845_v37, %v3175_v55  ;;  %v3173_v62 = vadd.f32 %v3028_v56, %v10184_v53  ;;  %v6848_v29 = vpop.f32.mrf.mxu0  ;;  %v10190_v37 = vld [vmem:[#allocation11_spill] sm:$0xff] }
 0x25a   :  { %v6782_v60 = vpop.f32.mrf.mxu1 }
 0x25b   :  { %10183 = vst [vmem:[#allocation45_spill] sm:$0xff] %v9588_v59  ;;  %v9591_v38 = vadd.f32 %v3579_v14, %v3173_v62  ;;  %v3178_v22 = vadd.f32 %v6782_v60, %v10186_v20  ;;  %v3592_v34 = vpop.f32.mrf.mxu0  ;;  %v10192_v14 = vld [vmem:[#allocation14_spill] sm:$0xff] }
 0x25c   :  { %v3041_v7 = vpop.f32.mrf.mxu1 }
 0x25d   :  { %10185 = vst [vmem:[#allocation25_spill] sm:$0xff] %v9591_v38  ;;  %v9594_v6 = vadd.f32 %v6848_v29, %v3178_v22  ;;  %v3176_v42 = vadd.f32 %v3041_v7, %v10188_v63  ;;  %v6849_v19 = vpop.f32.mrf.mxu0  ;;  %v10194_v29 = vld [vmem:[#allocation15_spill] sm:$0xff] }
 0x25e   :  { %v6783_v35 = vpop.f32.mrf.mxu1 }
 0x25f   :  { %10187 = vst [vmem:[#allocation24_spill] sm:$0xff] %v9594_v6  ;;  %v9597_v31 = vadd.f32 %v3592_v34, %v3176_v42  ;;  %v3179_v55 = vadd.f32 %v6783_v35, %v10190_v37  ;;  %v3595_v56 = vpop.f32.mrf.mxu0  ;;  %v10196_v34 = vld [vmem:[#allocation40_spill] sm:$0xff] }
 0x260   :  { %v3044_v59 = vpop.f32.mrf.mxu1 }
 0x261   :  { %10189 = vst [vmem:[#allocation26_spill] sm:$0xff] %v9597_v31  ;;  %v9600_v53 = vadd.f32 %v6849_v19, %v3179_v55  ;;  %v3177_v62 = vadd.f32 %v3044_v59, %v10192_v14  ;;  %v6852_v60 = vpop.f32.mrf.mxu0  ;;  %v10198_v19 = vld [vmem:[#allocation41_spill] sm:$0xff] }
 0x262   :  { %v6786_v38 = vpop.f32.mrf.mxu1 }
 0x263   :  { %10191 = vst [vmem:[#allocation27_spill] sm:$0xff] %v9600_v53  ;;  %v9603_v20 = vadd.f32 %v3595_v56, %v3177_v62  ;;  %v3182_v22 = vadd.f32 %v6786_v38, %v10194_v29  ;;  %v3608_v7 = vpop.f32.mrf.mxu0  ;;  %v10200_v56 = vld [vmem:[#allocation17_spill] sm:$0xff] }
 0x264   :  { %v3057_v6 = vpop.f32.mrf.mxu1 }
 0x265   :  { %10193 = vst [vmem:[#allocation46_spill] sm:$0xff] %v9603_v20  ;;  %v9606_v63 = vadd.f32 %v6852_v60, %v3182_v22  ;;  %v3180_v42 = vadd.f32 %v3057_v6, %v10196_v34  ;;  %v6853_v35 = vpop.f32.mrf.mxu0  ;;  %v10202_v60 = vld [vmem:[#allocation16_spill] sm:$0xff] }
 0x266   :  { %v6787_v31 = vpop.f32.mrf.mxu1 }
 0x267   :  { %10195 = vst [vmem:[#allocation47_spill] sm:$0xff] %v9606_v63  ;;  %v9609_v37 = vadd.f32 %v3608_v7, %v3180_v42  ;;  %v3183_v55 = vadd.f32 %v6787_v31, %v10198_v19  ;;  %v3611_v59 = vpop.f32.mrf.mxu0  ;;  %v10204_v7 = vld [vmem:[#allocation18_spill] sm:$0xff] }
 0x268   :  { %v3060_v53 = vpop.f32.mrf.mxu1 }
 0x269   :  { %10197 = vst [vmem:[#allocation29_spill] sm:$0xff] %v9609_v37  ;;  %v9612_v14 = vadd.f32 %v6853_v35, %v3183_v55  ;;  %v3181_v62 = vadd.f32 %v3060_v53, %v10200_v56  ;;  %v6856_v38 = vpop.f32.mrf.mxu0  ;;  %v10206_v35 = vld [vmem:[#allocation19_spill] sm:$0xff] }
 0x26a   :  { %v6790_v20 = vpop.f32.mrf.mxu1 }
 0x26b   :  { %10199 = vst [vmem:[#allocation28_spill] sm:$0xff] %v9612_v14  ;;  %v9615_v29 = vadd.f32 %v3611_v59, %v3181_v62  ;;  %v3186_v22 = vadd.f32 %v6790_v20, %v10202_v60  ;;  %v3624_v6 = vpop.f32.mrf.mxu0  ;;  %v10208_v59 = vld [vmem:[#allocation42_spill] sm:$0xff] }
 0x26c   :  { %v3073_v63 = vpop.f32.mrf.mxu1 }
 0x26d   :  { %10201 = vst [vmem:[#allocation30_spill] sm:$0xff] %v9615_v29  ;;  %v9618_v34 = vadd.f32 %v6856_v38, %v3186_v22  ;;  %v3184_v42 = vadd.f32 %v3073_v63, %v10204_v7  ;;  %v6857_v31 = vpop.f32.mrf.mxu0  ;;  %v10210_v38 = vld [vmem:[#allocation43_spill] sm:$0xff] }
 0x26e   :  { %v6791_v37 = vpop.f32.mrf.mxu1 }
 0x26f   :  { %10203 = vst [vmem:[#allocation33_spill] sm:$0xff] %v9618_v34  ;;  %v9621_v19 = vadd.f32 %v3624_v6, %v3184_v42  ;;  %v3187_v55 = vadd.f32 %v6791_v37, %v10206_v35  ;;  %v3627_v53 = vpop.f32.mrf.mxu0  ;;  %v10211_v6 = vld [vmem:[#allocation21_spill] sm:$0xff] }
 0x270   :  { %v3076_v14 = vpop.f32.mrf.mxu1 }
 0x271   :  { %10205 = vst [vmem:[#allocation31_spill] sm:$0xff] %v9621_v19  ;;  %v9624_v56 = vadd.f32 %v6857_v31, %v3187_v55  ;;  %v3185_v62 = vadd.f32 %v3076_v14, %v10208_v59  ;;  %v6860_v20 = vpop.f32.mrf.mxu0  ;;  %v10212_v31 = vld [vmem:[#allocation20_spill] sm:$0xff] }
 0x272   :  { %v6794_v29 = vpop.f32.mrf.mxu1 }
 0x273   :  { %10207 = vst [vmem:[#allocation32_spill] sm:$0xff] %v9624_v56  ;;  %v9627_v60 = vadd.f32 %v3627_v53, %v3185_v62  ;;  %v3190_v22 = vadd.f32 %v6794_v29, %v10210_v38  ;;  %v3640_v63 = vpop.f32.mrf.mxu0  ;;  %v10213_v53 = vld [vmem:[#allocation22_spill] sm:$0xff] }
 0x274   :  { %v3089_v34 = vpop.f32.mrf.mxu1 }
 0x275   :  { %10209 = vst [vmem:[#allocation34_spill] sm:$0xff] %v9627_v60  ;;  %v9630_v7 = vadd.f32 %v6860_v20, %v3190_v22  ;;  %v3188_v42 = vadd.f32 %v3089_v34, %v10211_v6  ;;  %v6861_v37 = vpop.f32.mrf.mxu0 }
 0x276   :  { %v6795_v19 = vpop.f32.mrf.mxu1 }
 0x277   :  { %v9633_v35 = vadd.f32 %v3640_v63, %v3188_v42  ;;  %v3191_v55 = vadd.f32 %v6795_v19, %v10212_v31  ;;  %v3643_v14 = vpop.f32.mrf.mxu0 }
 0x278   :  { %v3092_v56 = vpop.f32.mrf.mxu1 }
 0x279   :  { %v9636_v59 = vadd.f32 %v6861_v37, %v3191_v55  ;;  %v3189_v62 = vadd.f32 %v3092_v56, %v10213_v53  ;;  %v6864_v29 = vpop.f32.mrf.mxu0 }
 0x27a   :  { %v6798_v60 = vpop.f32.mrf.mxu1 }
 0x27b   :  { %v9639_v38 = vadd.f32 %v3643_v14, %v3189_v62  ;;  %v3194_v20 = vadd.f32 %v6798_v60, %v9305_v40  ;;  %v3656_v34 = vpop.f32.mrf.mxu0 }
 0x27c   :  { %v3105_v22 = vpop.f32.mrf.mxu1 }
 0x27d   :  { %v9642_v6 = vadd.f32 %v6864_v29, %v3194_v20  ;;  %v3192_v63 = vadd.f32 %v3105_v22, %v9308_v39  ;;  %v6865_v19 = vpop.f32.mrf.mxu0 }
 0x27e   :  { %v6799_v42 = vpop.f32.mrf.mxu1 }
 0x27f   :  { %v9645_v31 = vadd.f32 %v3656_v34, %v3192_v63  ;;  %v3195_v37 = vadd.f32 %v6799_v42, %v9311_v25  ;;  %v3659_v56 = vpop.f32.mrf.mxu0 }
 0x280   :  { %v3108_v55 = vpop.f32.mrf.mxu1 }
 0x281   :  { %v9648_v53 = vadd.f32 %v6865_v19, %v3195_v37  ;;  %v3193_v14 = vadd.f32 %v3108_v55, %v9316_v48  ;;  %v6868_v40 = vpop.f32.mrf.mxu0 }
 0x282   :  { %v6802_v62 = vpop.f32.mrf.mxu1 }
 0x283   :  { %v9651_v60 = vadd.f32 %v3659_v56, %v3193_v14  ;;  %v3198_v29 = vadd.f32 %v6802_v62, %v9334_v24  ;;  %v3672_v39 = vpop.f32.mrf.mxu0 }
 0x284   :  { %v3121_v20 = vpop.f32.mrf.mxu1 }
 0x285   :  { %v9654_v22 = vadd.f32 %v6868_v40, %v3198_v29  ;;  %v3196_v34 = vadd.f32 %v3121_v20, %v9337_v4  ;;  %v6869_v25 = vpop.f32.mrf.mxu0  ;;  %v9669_v4 = vld [vmem:[%s9947_s2] ss:$0 sm:$0xff] }
 0x286   :  { %v6803_v63 = vpop.f32.mrf.mxu1 }
 0x287   :  { %v9657_v42 = vadd.f32 %v3672_v39, %v3196_v34  ;;  %v3199_v19 = vadd.f32 %v6803_v63, %v9340_v21  ;;  %v3675_v48 = vpop.f32.mrf.mxu0 }
 0x288   :  { %v3124_v37 = vpop.f32.mrf.mxu1 }
 0x289   :  { %v9660_v55 = vadd.f32 %v6869_v25, %v3199_v19  ;;  %v3197_v56 = vadd.f32 %v3124_v37, %v9346_v30  ;;  %v6940_v24 = vpop.f32.mrf.mxu0 }
 0x28a   :  { %v6874_v14 = vpop.f32.mrf.mxu1 }
 0x28b   :  { %10214 = vst [vmem:[#allocation36_spill] sm:$0xff] %v9660_v55  ;;  %v9663_v62 = vadd.f32 %v3675_v48, %v3197_v56  ;;  %v4239_v40 = vadd.f32 %v6874_v14, %v9364_v12  ;;  %v4532_v20 = vpop.f32.mrf.mxu0 }
 0x28c   :  { %v3982_v29 = vpop.f32.mrf.mxu1 }
 0x28d   :  { %10215 = vst [vmem:[#allocation35_spill] sm:$0xff] %v9663_v62  ;;  %v4789_v21 = vadd.f32 %v6940_v24, %v4239_v40  ;;  %v4237_v39 = vadd.f32 %v3982_v29, %v9367_v47  ;;  %v6941_v63 = vpop.f32.mrf.mxu0 }
 0x28e   :  { %v6875_v34 = vpop.f32.mrf.mxu1 }
 0x28f   :  { %v4860_v30 = vadd.f32 %v9669_v4, %v4789_v21  ;;  %v4787_v25 = vadd.f32 %v4532_v20, %v4237_v39  ;;  %v4240_v19 = vadd.f32 %v6875_v34, %v9370_v45  ;;  %v4535_v12 = vpop.f32.mrf.mxu0 }
 0x290   :  { %v3985_v37 = vpop.f32.mrf.mxu1 }
 0x291   :  { %v4924_v48 = vmax.f32 %v4860_v30, 0.0  ;;  %v4858_v56 = vadd.f32 %v9669_v4, %v4787_v25  ;;  %v4790_v14 = vadd.f32 %v6941_v63, %v4240_v19  ;;  %v4238_v62 = vadd.f32 %v3985_v37, %v9376_v61  ;;  %v6944_v24 = vpop.f32.mrf.mxu0 }
 0x292   :  { %v6878_v55 = vpop.f32.mrf.mxu1 }
 0x293   :  { %4989 = vst.msk [vmem:[#allocation2 + $0x10] sm:$0xff] %vm4986_vm3, %v4924_v48  ;;  %v4922_v47 = vmax.f32 %v4858_v56, 0.0  ;;  %v4861_v40 = vadd.f32 %v9669_v4, %v4790_v14  ;;  %v4788_v29 = vadd.f32 %v4535_v12, %v4238_v62  ;;  %v4243_v20 = vadd.f32 %v6878_v55, %v9394_v15  ;;  %v4548_v21 = vpop.f32.mrf.mxu0 }
 0x294   :  { %v3998_v45 = vpop.f32.mrf.mxu1 }
 0x295   :  { %4987 = vst.msk [vmem:[#allocation2] sm:$0xff] %vm4986_vm3, %v4922_v47  ;;  %v4925_v39 = vmax.f32 %v4861_v40, 0.0  ;;  %v4859_v34 = vadd.f32 %v9669_v4, %v4788_v29  ;;  %v4793_v63 = vadd.f32 %v6944_v24, %v4243_v20  ;;  %v4241_v61 = vadd.f32 %v3998_v45, %v9397_v58  ;;  %v6945_v25 = vpop.f32.mrf.mxu0 }
 0x296   :  { %v6879_v30 = vpop.f32.mrf.mxu1 }
 0x297   :  { %4990 = vst.msk [vmem:[#allocation2 + $0x18] sm:$0xff] %vm4986_vm3, %v4925_v39  ;;  %v4923_v19 = vmax.f32 %v4859_v34, 0.0  ;;  %v4864_v37 = vadd.f32 %v9669_v4, %v4793_v63  ;;  %v4791_v62 = vadd.f32 %v4548_v21, %v4241_v61  ;;  %v4244_v15 = vadd.f32 %v6879_v30, %v9400_v17  ;;  %v4551_v12 = vpop.f32.mrf.mxu0 }
 0x298   :  { %v4001_v55 = vpop.f32.mrf.mxu1 }
 0x299   :  { %4988 = vst.msk [vmem:[#allocation2 + $0x8] sm:$0xff] %vm4986_vm3, %v4923_v19  ;;  %v4928_v48 = vmax.f32 %v4864_v37, 0.0  ;;  %v4862_v56 = vadd.f32 %v9669_v4, %v4791_v62  ;;  %v4794_v14 = vadd.f32 %v6945_v25, %v4244_v15  ;;  %v4242_v58 = vadd.f32 %v4001_v55, %v9406_v46  ;;  %v6948_v47 = vpop.f32.mrf.mxu0 }
 0x29a   :  { %v6882_v24 = vpop.f32.mrf.mxu1 }
 0x29b   :  { %4993 = vst.msk [vmem:[#allocation2 + $0x30] sm:$0xff] %vm4986_vm3, %v4928_v48  ;;  %v4926_v40 = vmax.f32 %v4862_v56, 0.0  ;;  %v4865_v29 = vadd.f32 %v9669_v4, %v4794_v14  ;;  %v4792_v20 = vadd.f32 %v4551_v12, %v4242_v58  ;;  %v4247_v17 = vadd.f32 %v6882_v24, %v9424_v33  ;;  %v4564_v21 = vpop.f32.mrf.mxu0 }
 0x29c   :  { %v4014_v45 = vpop.f32.mrf.mxu1 }
 0x29d   :  { %4991 = vst.msk [vmem:[#allocation2 + $0x20] sm:$0xff] %vm4986_vm3, %v4926_v40  ;;  %v4929_v39 = vmax.f32 %v4865_v29, 0.0  ;;  %v4863_v34 = vadd.f32 %v9669_v4, %v4792_v20  ;;  %v4797_v63 = vadd.f32 %v6948_v47, %v4247_v17  ;;  %v4245_v46 = vadd.f32 %v4014_v45, %v9427_v44  ;;  %v6949_v30 = vpop.f32.mrf.mxu0 }
 0x29e   :  { %v6883_v61 = vpop.f32.mrf.mxu1  ;;  %v5053_v62 = vld [vmem:[#allocation2 + $0x10] ss:$2 sm:$0xff]  ;;  %v5117_v15 = vld [vmem:[#allocation2 + $0x11] ss:$2 sm:$0xff] }
 0x29f   :  { %4994 = vst.msk [vmem:[#allocation2 + $0x38] sm:$0xff] %vm4986_vm3, %v4929_v39  ;;  %v4927_v25 = vmax.f32 %v4863_v34, 0.0  ;;  %v4868_v19 = vadd.f32 %v9669_v4, %v4797_v63  ;;  %v4795_v37 = vadd.f32 %v4564_v21, %v4245_v46  ;;  %v4248_v33 = vadd.f32 %v6883_v61, %v9430_v32  ;;  %v4567_v12 = vpop.f32.mrf.mxu0  ;;  %v9706_v39 = vld [vmem:[%s9948_s3] sm:$0xff] }
 0x2a0   :  { %v4017_v55 = vpop.f32.mrf.mxu1  ;;  %v5051_v48 = vld [vmem:[#allocation2] ss:$2 sm:$0xff]  ;;  %v5115_v56 = vld [vmem:[#allocation2 + $0x1] ss:$2 sm:$0xff]  ;;  %v5179_v20 = vmax.f32 %v5053_v62, %v5117_v15 }
 0x2a1   :  { %4992 = vst.msk [vmem:[#allocation2 + $0x28] sm:$0xff] %vm4986_vm3, %v4927_v25  ;;  %v4932_v14 = vmax.f32 %v4868_v19, 0.0  ;;  %v4866_v44 = vadd.f32 %v9669_v4, %v4795_v37  ;;  %v4798_v58 = vadd.f32 %v6949_v30, %v4248_v33  ;;  %v4246_v24 = vadd.f32 %v4017_v55, %v9436_v36  ;;  %v6952_v40 = vpop.f32.mrf.mxu0 }
 0x2a2   :  { %v6886_v47 = vpop.f32.mrf.mxu1  ;;  %v5178_v29 = vmax.f32 %v5051_v48, %v5115_v56 }
 0x2a3   :  { %4997 = vst.msk [vmem:[#allocation2 + $0x50] sm:$0xff] %vm4986_vm3, %v4932_v14  ;;  %v4930_v32 = vmax.f32 %v4866_v44, 0.0  ;;  %v4869_v17 = vadd.f32 %v9669_v4, %v4798_v58  ;;  %v4796_v45 = vadd.f32 %v4567_v12, %v4246_v24  ;;  %v4251_v21 = vadd.f32 %v6886_v47, %v9454_v11  ;;  %v4580_v63 = vpop.f32.mrf.mxu0 }
 0x2a4   :  { %v4030_v34 = vpop.f32.mrf.mxu1  ;;  %v5210_v36 = vmax.f32 %v5178_v29, %v5179_v20 }
 0x2a5   :  { %4995 = vst.msk [vmem:[#allocation2 + $0x40] sm:$0xff] %vm4986_vm3, %v4930_v32  ;;  %v4933_v46 = vmax.f32 %v4869_v17, 0.0  ;;  %v4867_v61 = vadd.f32 %v9669_v4, %v4796_v45  ;;  %v4801_v30 = vadd.f32 %v6952_v40, %v4251_v21  ;;  %v4249_v25 = vadd.f32 %v4030_v34, %v9457_v10  ;;  %v6953_v37 = vpop.f32.mrf.mxu0 }
 0x2a6   :  { %v6887_v19 = vpop.f32.mrf.mxu1  ;;  %v5234_v11 = vmul.f32 %v9706_v39, %v5210_v36  ;;  %v5057_v12 = vld [vmem:[#allocation2 + $0x30] ss:$2 sm:$0xff]  ;;  %v5121_v48 = vld [vmem:[#allocation2 + $0x31] ss:$2 sm:$0xff]  ;;  %v9725_v36 = vld [vmem:[%s9948_s3 + $0x8] sm:$0xff] }
 0x2a7   :  { %4998 = vst.msk [vmem:[#allocation2 + $0x58] sm:$0xff] %vm4986_vm3, %v4933_v46  ;;  %v4931_v33 = vmax.f32 %v4867_v61, 0.0  ;;  %v4872_v62 = vadd.f32 %v9669_v4, %v4801_v30  ;;  %v4799_v15 = vadd.f32 %v4580_v63, %v4249_v25  ;;  %v4252_v55 = vadd.f32 %v6887_v19, %v9460_v27  ;;  %v4583_v14 = vpop.f32.mrf.mxu0 }
 0x2a8   :  { %v4033_v56 = vpop.f32.mrf.mxu1  ;;  %v5250_v44 = vsel %vm4986_vm3, %v5234_v11, 0.0  ;;  %v5055_v58 = vld [vmem:[#allocation2 + $0x20] ss:$2 sm:$0xff]  ;;  %v5119_v10 = vld [vmem:[#allocation2 + $0x21] ss:$2 sm:$0xff]  ;;  %v5181_v17 = vmax.f32 %v5057_v12, %v5121_v48 }
 0x2a9   :  { %4996 = vst.msk [vmem:[#allocation2 + $0x48] sm:$0xff] %vm4986_vm3, %v4931_v33  ;;  %v4936_v24 = vmax.f32 %v4872_v62, 0.0  ;;  %v4870_v47 = vadd.f32 %v9669_v4, %v4799_v15  ;;  %v4802_v40 = vadd.f32 %v6953_v37, %v4252_v55  ;;  %v4250_v29 = vadd.f32 %v4033_v56, %v9466_v26  ;;  %5251 = vadd.xlane.f32.xlu1 %v5250_v44  ;;  %v6956_v32 = vpop.f32.mrf.mxu0 }
 0x2aa   :  { %v6890_v20 = vpop.f32.mrf.mxu1  ;;  %v5180_v27 = vmax.f32 %v5055_v58, %v5119_v10 }
 0x2ab   :  { %5001 = vst.msk [vmem:[#allocation2 + $0x70] sm:$0xff] %vm4986_vm3, %v4936_v24  ;;  %v4934_v45 = vmax.f32 %v4870_v47, 0.0  ;;  %v4873_v21 = vadd.f32 %v9669_v4, %v4802_v40  ;;  %v4800_v34 = vadd.f32 %v4583_v14, %v4250_v29  ;;  %v4255_v63 = vadd.f32 %v6890_v20, %v9484_v28  ;;  %v4596_v26 = vpop.f32.mrf.mxu0 }
 0x2ac   :  { %v4046_v46 = vpop.f32.mrf.mxu1  ;;  %v5211_v61 = vmax.f32 %v5180_v27, %v5181_v17 }
 0x2ad   :  { %4999 = vst.msk [vmem:[#allocation2 + $0x60] sm:$0xff] %vm4986_vm3, %v4934_v45  ;;  %v4937_v30 = vmax.f32 %v4873_v21, 0.0  ;;  %v4871_v25 = vadd.f32 %v9669_v4, %v4800_v34  ;;  %v4805_v19 = vadd.f32 %v6956_v32, %v4255_v63  ;;  %v4253_v37 = vadd.f32 %v4046_v46, %v9487_v43  ;;  %v6957_v33 = vpop.f32.mrf.mxu0  ;;  %v9744_v63 = vld [vmem:[%s9948_s3 + $0x10] sm:$0xff] }
 0x2ae   :  { %v6891_v11 = vpop.f32.mrf.mxu1  ;;  %v5235_v28 = vmul.f32 %v9725_v36, %v5211_v61  ;;  %v5061_v48 = vld [vmem:[#allocation2 + $0x50] ss:$2 sm:$0xff]  ;;  %v5125_v56 = vld [vmem:[#allocation2 + $0x51] ss:$2 sm:$0xff] }
 0x2af   :  { %5002 = vst.msk [vmem:[#allocation2 + $0x78] sm:$0xff] %vm4986_vm3, %v4937_v30  ;;  %v4935_v62 = vmax.f32 %v4871_v25, 0.0  ;;  %v4876_v15 = vadd.f32 %v9669_v4, %v4805_v19  ;;  %v4803_v55 = vadd.f32 %v4596_v26, %v4253_v37  ;;  %v4256_v12 = vadd.f32 %v6891_v11, %v9490_v16  ;;  %v4599_v44 = vpop.f32.mrf.mxu0 }
 0x2b0   :  { %v4049_v14 = vpop.f32.mrf.mxu1  ;;  %v5253_v58 = vsel %vm4986_vm3, %v5235_v28, 0.0  ;;  %v5059_v10 = vld [vmem:[#allocation2 + $0x40] ss:$2 sm:$0xff]  ;;  %v5123_v43 = vld [vmem:[#allocation2 + $0x41] ss:$2 sm:$0xff]  ;;  %v5183_v27 = vmax.f32 %v5061_v48, %v5125_v56 }
 0x2b1   :  { %5000 = vst.msk [vmem:[#allocation2 + $0x68] sm:$0xff] %vm4986_vm3, %v4935_v62  ;;  %v4940_v24 = vmax.f32 %v4876_v15, 0.0  ;;  %v4874_v47 = vadd.f32 %v9669_v4, %v4803_v55  ;;  %v4806_v40 = vadd.f32 %v6957_v33, %v4256_v12  ;;  %v4254_v29 = vadd.f32 %v4049_v14, %v9496_v54  ;;  %5254 = vadd.xlane.f32.xlu1 %v5253_v58  ;;  %v6960_v32 = vpop.f32.mrf.mxu0 }
 0x2b2   :  { %v6894_v20 = vpop.f32.mrf.mxu1  ;;  %v5182_v16 = vmax.f32 %v5059_v10, %v5123_v43 }
 0x2b3   :  { %5005 = vst.msk [vmem:[#allocation2 + $0x90] sm:$0xff] %vm4986_vm3, %v4940_v24  ;;  %v4938_v17 = vmax.f32 %v4874_v47, 0.0  ;;  %v4877_v45 = vadd.f32 %v9669_v4, %v4806_v40  ;;  %v4804_v21 = vadd.f32 %v4599_v44, %v4254_v29  ;;  %v4259_v34 = vadd.f32 %v6894_v20, %v9514_v41  ;;  %v4612_v54 = vpop.f32.mrf.mxu0 }
 0x2b4   :  { %v4062_v46 = vpop.f32.mrf.mxu1  ;;  %v5212_v26 = vmax.f32 %v5182_v16, %v5183_v27 }
 0x2b5   :  { %5003 = vst.msk [vmem:[#allocation2 + $0x80] sm:$0xff] %vm4986_vm3, %v4938_v17  ;;  %v4941_v61 = vmax.f32 %v4877_v45, 0.0  ;;  %v4875_v30 = vadd.f32 %v9669_v4, %v4804_v21  ;;  %v4809_v25 = vadd.f32 %v6960_v32, %v4259_v34  ;;  %v4257_v19 = vadd.f32 %v4062_v46, %v9517_v49  ;;  %v6961_v11 = vpop.f32.mrf.mxu0  ;;  %v9763_v17 = vld [vmem:[%s9948_s3 + $0x18] sm:$0xff] }
 0x2b6   :  { %v6895_v37 = vpop.f32.mrf.mxu1  ;;  %v5236_v41 = vmul.f32 %v9744_v63, %v5212_v26  ;;  %v5065_v55 = vld [vmem:[#allocation2 + $0x70] ss:$2 sm:$0xff]  ;;  %v5129_v12 = vld [vmem:[#allocation2 + $0x71] ss:$2 sm:$0xff] }
 0x2b7   :  { %5006 = vst.msk [vmem:[#allocation2 + $0x98] sm:$0xff] %vm4986_vm3, %v4941_v61  ;;  %v4939_v33 = vmax.f32 %v4875_v30, 0.0  ;;  %v4880_v28 = vadd.f32 %v9669_v4, %v4809_v25  ;;  %v4807_v62 = vadd.f32 %v4612_v54, %v4257_v19  ;;  %v4260_v15 = vadd.f32 %v6895_v37, %v9520_v2  ;;  %v4615_v56 = vpop.f32.mrf.mxu0 }
 0x2b8   :  { %v4065_v48 = vpop.f32.mrf.mxu1  ;;  %v5256_v14 = vsel %vm4986_vm3, %v5236_v41, 0.0  ;;  %v5063_v44 = vld [vmem:[#allocation2 + $0x60] ss:$2 sm:$0xff]  ;;  %v5127_v49 = vld [vmem:[#allocation2 + $0x61] ss:$2 sm:$0xff]  ;;  %v5185_v29 = vmax.f32 %v5065_v55, %v5129_v12 }
 0x2b9   :  { %5004 = vst.msk [vmem:[#allocation2 + $0x88] sm:$0xff] %vm4986_vm3, %v4939_v33  ;;  %v4944_v58 = vmax.f32 %v4880_v28, 0.0  ;;  %v4878_v10 = vadd.f32 %v9669_v4, %v4807_v62  ;;  %v4810_v43 = vadd.f32 %v6961_v11, %v4260_v15  ;;  %v4258_v24 = vadd.f32 %v4065_v48, %v9529_v50  ;;  %5257 = vadd.xlane.f32.xlu1 %v5256_v14  ;;  %v6964_v40 = vpop.f32.mrf.mxu0 }
 0x2ba   :  { %v6898_v47 = vpop.f32.mrf.mxu1  ;;  %v5184_v2 = vmax.f32 %v5063_v44, %v5127_v49 }
 0x2bb   :  { %5009 = vst.msk [vmem:[#allocation2 + $0xb0] sm:$0xff] %vm4986_vm3, %v4944_v58  ;;  %v4942_v20 = vmax.f32 %v4878_v10, 0.0  ;;  %v4881_v32 = vadd.f32 %v9669_v4, %v4810_v43  ;;  %v4808_v16 = vadd.f32 %v4615_v56, %v4258_v24  ;;  %v4263_v27 = vadd.f32 %v6898_v47, %v9544_v51  ;;  %v4628_v50 = vpop.f32.mrf.mxu0 }
 0x2bc   :  { %v4078_v45 = vpop.f32.mrf.mxu1  ;;  %v5213_v21 = vmax.f32 %v5184_v2, %v5185_v29 }
 0x2bd   :  { %5007 = vst.msk [vmem:[#allocation2 + $0xa0] sm:$0xff] %vm4986_vm3, %v4942_v20  ;;  %v4945_v34 = vmax.f32 %v4881_v32, 0.0  ;;  %v4879_v46 = vadd.f32 %v9669_v4, %v4808_v16  ;;  %v4813_v54 = vadd.f32 %v6964_v40, %v4263_v27  ;;  %v4261_v26 = vadd.f32 %v4078_v45, %v9547_v3  ;;  %v6965_v30 = vpop.f32.mrf.mxu0  ;;  %v9782_v40 = vld [vmem:[%s9948_s3 + $0x20] sm:$0xff] }
 0x2be   :  { %v6899_v61 = vpop.f32.mrf.mxu1  ;;  %v5237_v51 = vmul.f32 %v9763_v17, %v5213_v21  ;;  %v5069_v41 = vld [vmem:[#allocation2 + $0x90] ss:$2 sm:$0xff]  ;;  %v5133_v33 = vld [vmem:[#allocation2 + $0x91] ss:$2 sm:$0xff] }
 0x2bf   :  { %5010 = vst.msk [vmem:[#allocation2 + $0xb8] sm:$0xff] %vm4986_vm3, %v4945_v34  ;;  %v4943_v25 = vmax.f32 %v4879_v46, 0.0  ;;  %v4884_v19 = vadd.f32 %v9669_v4, %v4813_v54  ;;  %v4811_v37 = vadd.f32 %v4628_v50, %v4261_v26  ;;  %v4264_v11 = vadd.f32 %v6899_v61, %v9550_v52  ;;  %v4631_v62 = vpop.f32.mrf.mxu0 }
 0x2c0   :  { %v4081_v28 = vpop.f32.mrf.mxu1  ;;  %v5259_v15 = vsel %vm4986_vm3, %v5237_v51, 0.0  ;;  %v5067_v55 = vld [vmem:[#allocation2 + $0x80] ss:$2 sm:$0xff]  ;;  %v5131_v3 = vld [vmem:[#allocation2 + $0x81] ss:$2 sm:$0xff]  ;;  %v5187_v58 = vmax.f32 %v5069_v41, %v5133_v33 }
 0x2c1   :  { %5008 = vst.msk [vmem:[#allocation2 + $0xa8] sm:$0xff] %vm4986_vm3, %v4943_v25  ;;  %v4948_v12 = vmax.f32 %v4884_v19, 0.0  ;;  %v4882_v48 = vadd.f32 %v9669_v4, %v4811_v37  ;;  %v4814_v56 = vadd.f32 %v6965_v30, %v4264_v11  ;;  %v4262_v14 = vadd.f32 %v4081_v28, %v9555_v0  ;;  %5260 = vadd.xlane.f32.xlu1 %v5259_v15  ;;  %v6968_v49 = vpop.f32.mrf.mxu0 }
 0x2c2   :  { %v6902_v44 = vpop.f32.mrf.mxu1  ;;  %v5186_v52 = vmax.f32 %v5067_v55, %v5131_v3 }
 0x2c3   :  { %5013 = vst.msk [vmem:[#allocation2 + $0xd0] sm:$0xff] %vm4986_vm3, %v4948_v12  ;;  %v4946_v10 = vmax.f32 %v4882_v48, 0.0  ;;  %v4885_v43 = vadd.f32 %v9669_v4, %v4814_v56  ;;  %v4812_v24 = vadd.f32 %v4631_v62, %v4262_v14  ;;  %v4267_v47 = vadd.f32 %v6902_v44, %v9558_v13  ;;  %v4644_v0 = vpop.f32.mrf.mxu0  ;;  %v9801_v56 = vld [vmem:[%s9948_s3 + $0x28] sm:$0xff] }
 0x2c4   :  { %v4094_v2 = vpop.f32.mrf.mxu1  ;;  %v5214_v29 = vmax.f32 %v5186_v52, %v5187_v58 }
 0x2c5   :  { %5011 = vst.msk [vmem:[#allocation2 + $0xc0] sm:$0xff] %vm4986_vm3, %v4946_v10  ;;  %v4949_v20 = vmax.f32 %v4885_v43, 0.0  ;;  %v4883_v32 = vadd.f32 %v9669_v4, %v4812_v24  ;;  %v4817_v16 = vadd.f32 %v6968_v49, %v4267_v47  ;;  %v4265_v27 = vadd.f32 %v4094_v2, %v9561_v57  ;;  %v6969_v50 = vpop.f32.mrf.mxu0 }
 0x2c6   :  { %v6903_v45 = vpop.f32.mrf.mxu1  ;;  %v5238_v13 = vmul.f32 %v9782_v40, %v5214_v29  ;;  %v5073_v26 = vld [vmem:[#allocation2 + $0xb0] ss:$2 sm:$0xff]  ;;  %v5137_v61 = vld [vmem:[#allocation2 + $0xb1] ss:$2 sm:$0xff] }
 0x2c7   :  { %5014 = vst.msk [vmem:[#allocation2 + $0xd8] sm:$0xff] %vm4986_vm3, %v4949_v20  ;;  %v4947_v21 = vmax.f32 %v4883_v32, 0.0  ;;  %v4888_v34 = vadd.f32 %v9669_v4, %v4817_v16  ;;  %v4815_v46 = vadd.f32 %v4644_v0, %v4265_v27  ;;  %v4268_v54 = vadd.f32 %v6903_v45, %v9564_v8  ;;  %v4647_v51 = vpop.f32.mrf.mxu0 }
 0x2c8   :  { %v4097_v30 = vpop.f32.mrf.mxu1  ;;  %v5262_v25 = vsel %vm4986_vm3, %v5238_v13, 0.0  ;;  %v5071_v19 = vld [vmem:[#allocation2 + $0xa0] ss:$2 sm:$0xff]  ;;  %v5135_v57 = vld [vmem:[#allocation2 + $0xa1] ss:$2 sm:$0xff]  ;;  %v5189_v15 = vmax.f32 %v5073_v26, %v5137_v61 }
 0x2c9   :  { %5012 = vst.msk [vmem:[#allocation2 + $0xc8] sm:$0xff] %vm4986_vm3, %v4947_v21  ;;  %v4952_v37 = vmax.f32 %v4888_v34, 0.0  ;;  %v4886_v11 = vadd.f32 %v9669_v4, %v4815_v46  ;;  %v4818_v41 = vadd.f32 %v6969_v50, %v4268_v54  ;;  %v4266_v33 = vadd.f32 %v4097_v30, %v9567_v5  ;;  %5263 = vadd.xlane.f32.xlu1 %v5262_v25  ;;  %v6972_v62 = vpop.f32.mrf.mxu0 }
 0x2ca   :  { %v6906_v28 = vpop.f32.mrf.mxu1  ;;  %v5188_v8 = vmax.f32 %v5071_v19, %v5135_v57  ;;  %v10216_v19 = vld [vmem:[#allocation23_spill] sm:$0xff] }
 0x2cb   :  { %5017 = vst.msk [vmem:[#allocation2 + $0xf0] sm:$0xff] %vm4986_vm3, %v4952_v37  ;;  %v4950_v55 = vmax.f32 %v4886_v11, 0.0  ;;  %v4889_v3 = vadd.f32 %v9669_v4, %v4818_v41  ;;  %v4816_v12 = vadd.f32 %v4647_v51, %v4266_v33  ;;  %v4271_v48 = vadd.f32 %v6906_v28, %v9570_v9  ;;  %v4660_v5 = vpop.f32.mrf.mxu0  ;;  %v9820_v37 = vld [vmem:[%s9948_s3 + $0x30] sm:$0xff] }
 0x2cc   :  { %v4110_v14 = vpop.f32.mrf.mxu1  ;;  %v5215_v44 = vmax.f32 %v5188_v8, %v5189_v15  ;;  %v10217_v8 = vld [vmem:[#allocation44_spill] sm:$0xff] }
 0x2cd   :  { %5015 = vst.msk [vmem:[#allocation2 + $0xe0] sm:$0xff] %vm4986_vm3, %v4950_v55  ;;  %v4953_v49 = vmax.f32 %v4889_v3, 0.0  ;;  %v4887_v52 = vadd.f32 %v9669_v4, %v4816_v12  ;;  %v4821_v58 = vadd.f32 %v6972_v62, %v4271_v48  ;;  %v4269_v10 = vadd.f32 %v4110_v14, %v9573_v23  ;;  %v6973_v24 = vpop.f32.mrf.mxu0 }
 0x2ce   :  { %v6907_v43 = vpop.f32.mrf.mxu1  ;;  %v5239_v9 = vmul.f32 %v9801_v56, %v5215_v44  ;;  %v5077_v20 = vld [vmem:[#allocation2 + $0xd0] ss:$2 sm:$0xff]  ;;  %v5141_v32 = vld [vmem:[#allocation2 + $0xd1] ss:$2 sm:$0xff] }
 0x2cf   :  { %5018 = vst.msk [vmem:[#allocation2 + $0xf8] sm:$0xff] %vm4986_vm3, %v4953_v49  ;;  %v4951_v47 = vmax.f32 %v4887_v52, 0.0  ;;  %v4892_v2 = vadd.f32 %v9669_v4, %v4821_v58  ;;  %v4819_v0 = vadd.f32 %v4660_v5, %v4269_v10  ;;  %v4272_v29 = vadd.f32 %v6907_v43, %v9576_v1  ;;  %v4663_v27 = vpop.f32.mrf.mxu0  ;;  %v10218_v44 = vld [vmem:[#allocation45_spill] sm:$0xff] }
 0x2d0   :  { %v4113_v16 = vpop.f32.mrf.mxu1  ;;  %v5265_v45 = vsel %vm4986_vm3, %v5239_v9, 0.0  ;;  %v5075_v50 = vld [vmem:[#allocation2 + $0xc0] ss:$2 sm:$0xff]  ;;  %v5139_v23 = vld [vmem:[#allocation2 + $0xc1] ss:$2 sm:$0xff]  ;;  %v5191_v61 = vmax.f32 %v5077_v20, %v5141_v32 }
 0x2d1   :  { %5016 = vst.msk [vmem:[#allocation2 + $0xe8] sm:$0xff] %vm4986_vm3, %v4951_v47  ;;  %v4956_v13 = vmax.f32 %v4892_v2, 0.0  ;;  %v4890_v21 = vadd.f32 %v9669_v4, %v4819_v0  ;;  %v4822_v34 = vadd.f32 %v6973_v24, %v4272_v29  ;;  %v4270_v46 = vadd.f32 %v4113_v16, %v9579_v18  ;;  %5266 = vadd.xlane.f32.xlu1 %v5265_v45  ;;  %v6976_v26 = vpop.f32.mrf.mxu0  ;;  %v10219_v20 = vld [vmem:[#allocation25_spill] sm:$0xff] }
 0x2d2   :  { %v6910_v54 = vpop.f32.mrf.mxu1  ;;  %v5190_v1 = vmax.f32 %v5075_v50, %v5139_v23 }
 0x2d3   :  { %5021 = vst.msk [vmem:[#allocation2 + $0x110] sm:$0xff] %vm4986_vm3, %v4956_v13  ;;  %v4954_v30 = vmax.f32 %v4890_v21, 0.0  ;;  %v4893_v51 = vadd.f32 %v9669_v4, %v4822_v34  ;;  %v4820_v25 = vadd.f32 %v4663_v27, %v4270_v46  ;;  %v4275_v57 = vadd.f32 %v6910_v54, %v10216_v19  ;;  %v4676_v18 = vpop.f32.mrf.mxu0  ;;  %v10220_v34 = vld [vmem:[#allocation24_spill] sm:$0xff]  ;;  %v9839_v54 = vld [vmem:[%s9948_s3 + $0x38] sm:$0xff] }
 0x2d4   :  { %v4126_v11 = vpop.f32.mrf.mxu1  ;;  %v5216_v41 = vmax.f32 %v5190_v1, %v5191_v61  ;;  %v10221_v19 = vld [vmem:[#allocation26_spill] sm:$0xff] }
 0x2d5   :  { %5019 = vst.msk [vmem:[#allocation2 + $0x100] sm:$0xff] %vm4986_vm3, %v4954_v30  ;;  %v4957_v33 = vmax.f32 %v4893_v51, 0.0  ;;  %v4891_v28 = vadd.f32 %v9669_v4, %v4820_v25  ;;  %v4825_v62 = vadd.f32 %v6976_v26, %v4275_v57  ;;  %v4273_v15 = vadd.f32 %v4126_v11, %v10217_v8  ;;  %v6977_v3 = vpop.f32.mrf.mxu0  ;;  %v10222_v8 = vld [vmem:[#allocation27_spill] sm:$0xff] }
 0x2d6   :  { %v6911_v55 = vpop.f32.mrf.mxu1  ;;  %v5240_v12 = vmul.f32 %v9820_v37, %v5216_v41  ;;  %v5081_v52 = vld [vmem:[#allocation2 + $0xf0] ss:$2 sm:$0xff]  ;;  %v5145_v58 = vld [vmem:[#allocation2 + $0xf1] ss:$2 sm:$0xff] }
 0x2d7   :  { %5022 = vst.msk [vmem:[#allocation2 + $0x118] sm:$0xff] %vm4986_vm3, %v4957_v33  ;;  %v4955_v48 = vmax.f32 %v4891_v28, 0.0  ;;  %v4896_v14 = vadd.f32 %v9669_v4, %v4825_v62  ;;  %v4823_v5 = vadd.f32 %v4676_v18, %v4273_v15  ;;  %v4276_v49 = vadd.f32 %v6911_v55, %v10218_v44  ;;  %v4679_v43 = vpop.f32.mrf.mxu0 }
 0x2d8   :  { %v4129_v10 = vpop.f32.mrf.mxu1  ;;  %v5268_v24 = vsel %vm4986_vm3, %v5240_v12, 0.0  ;;  %v5079_v9 = vld [vmem:[#allocation2 + $0xe0] ss:$2 sm:$0xff]  ;;  %v5143_v47 = vld [vmem:[#allocation2 + $0xe1] ss:$2 sm:$0xff]  ;;  %v5193_v50 = vmax.f32 %v5081_v52, %v5145_v58 }
 0x2d9   :  { %5020 = vst.msk [vmem:[#allocation2 + $0x108] sm:$0xff] %vm4986_vm3, %v4955_v48  ;;  %v4960_v2 = vmax.f32 %v4896_v14, 0.0  ;;  %v4894_v0 = vadd.f32 %v9669_v4, %v4823_v5  ;;  %v4826_v29 = vadd.f32 %v6977_v3, %v4276_v49  ;;  %v4274_v32 = vadd.f32 %v4129_v10, %v10219_v20  ;;  %5269 = vadd.xlane.f32.xlu1 %v5268_v24  ;;  %v6980_v27 = vpop.f32.mrf.mxu0  ;;  %v10223_v10 = vld [vmem:[#allocation46_spill] sm:$0xff] }
 0x2da   :  { %v6914_v16 = vpop.f32.mrf.mxu1  ;;  %v5192_v45 = vmax.f32 %v5079_v9, %v5143_v47 }
 0x2db   :  { %5025 = vst.msk [vmem:[#allocation2 + $0x130] sm:$0xff] %vm4986_vm3, %v4960_v2  ;;  %v4958_v23 = vmax.f32 %v4894_v0, 0.0  ;;  %v4897_v13 = vadd.f32 %v9669_v4, %v4826_v29  ;;  %v4824_v21 = vadd.f32 %v4679_v43, %v4274_v32  ;;  %v4279_v46 = vadd.f32 %v6914_v16, %v10220_v34  ;;  %v4692_v1 = vpop.f32.mrf.mxu0  ;;  %v10224_v32 = vld [vmem:[#allocation47_spill] sm:$0xff]  ;;  %v10225_v34 = vld [vmem:[#allocation29_spill] sm:$0xff] }
 0x2dc   :  { %v4142_v26 = vpop.f32.mrf.mxu1  ;;  %v5217_v61 = vmax.f32 %v5192_v45, %v5193_v50 }
 0x2dd   :  { %5023 = vst.msk [vmem:[#allocation2 + $0x120] sm:$0xff] %vm4986_vm3, %v4958_v23  ;;  %v4961_v30 = vmax.f32 %v4897_v13, 0.0  ;;  %v4895_v51 = vadd.f32 %v9669_v4, %v4824_v21  ;;  %v4829_v25 = vadd.f32 %v6980_v27, %v4279_v46  ;;  %v4277_v57 = vadd.f32 %v4142_v26, %v10221_v19  ;;  %v6981_v18 = vpop.f32.mrf.mxu0  ;;  %v10226_v19 = vld [vmem:[#allocation28_spill] sm:$0xff] }
 0x2de   :  { %v6915_v11 = vpop.f32.mrf.mxu1  ;;  %v5241_v41 = vmul.f32 %v9839_v54, %v5217_v61  ;;  %v5085_v55 = vld [vmem:[#allocation2 + $0x110] ss:$2 sm:$0xff]  ;;  %v5149_v3 = vld [vmem:[#allocation2 + $0x111] ss:$2 sm:$0xff] }
 0x2df   :  { %5026 = vst.msk [vmem:[#allocation2 + $0x138] sm:$0xff] %vm4986_vm3, %v4961_v30  ;;  %v4959_v33 = vmax.f32 %v4895_v51, 0.0  ;;  %v4900_v28 = vadd.f32 %v9669_v4, %v4829_v25  ;;  %v4827_v62 = vadd.f32 %v4692_v1, %v4277_v57  ;;  %v4280_v15 = vadd.f32 %v6915_v11, %v10222_v8  ;;  %v4695_v48 = vpop.f32.mrf.mxu0 }
 0x2e0   :  { %v4145_v12 = vpop.f32.mrf.mxu1  ;;  %v5271_v14 = vsel %vm4986_vm3, %v5241_v41, 0.0  ;;  %v5083_v5 = vld [vmem:[#allocation2 + $0x100] ss:$2 sm:$0xff]  ;;  %v5147_v44 = vld [vmem:[#allocation2 + $0x101] ss:$2 sm:$0xff]  ;;  %v5195_v2 = vmax.f32 %v5085_v55, %v5149_v3  ;;  %v10227_v3 = vld [vmem:[#allocation30_spill] sm:$0xff] }
 0x2e1   :  { %5024 = vst.msk [vmem:[#allocation2 + $0x128] sm:$0xff] %vm4986_vm3, %v4959_v33  ;;  %v4964_v49 = vmax.f32 %v4900_v28, 0.0  ;;  %v4898_v52 = vadd.f32 %v9669_v4, %v4827_v62  ;;  %v4830_v58 = vadd.f32 %v6981_v18, %v4280_v15  ;;  %v4278_v43 = vadd.f32 %v4145_v12, %v10223_v10  ;;  %5272 = vadd.xlane.f32.xlu1 %v5271_v14  ;;  %v6984_v9 = vpop.f32.mrf.mxu0  ;;  %v10228_v10 = vld [vmem:[#allocation33_spill] sm:$0xff] }
 0x2e2   :  { %v6918_v24 = vpop.f32.mrf.mxu1  ;;  %v5194_v47 = vmax.f32 %v5083_v5, %v5147_v44 }
 0x2e3   :  { %5029 = vst.msk [vmem:[#allocation2 + $0x150] sm:$0xff] %vm4986_vm3, %v4964_v49  ;;  %v4962_v0 = vmax.f32 %v4898_v52, 0.0  ;;  %v4901_v29 = vadd.f32 %v9669_v4, %v4830_v58  ;;  %v4828_v20 = vadd.f32 %v4695_v48, %v4278_v43  ;;  %v4283_v16 = vadd.f32 %v6918_v24, %v10224_v32  ;;  %v4708_v45 = vpop.f32.mrf.mxu0 }
 0x2e4   :  { %v4158_v27 = vpop.f32.mrf.mxu1  ;;  %v5218_v50 = vmax.f32 %v5194_v47, %v5195_v2 }
 0x2e5   :  { %5027 = vst.msk [vmem:[#allocation2 + $0x140] sm:$0xff] %vm4986_vm3, %v4962_v0  ;;  %v4965_v23 = vmax.f32 %v4901_v29, 0.0  ;;  %v4899_v13 = vadd.f32 %v9669_v4, %v4828_v20  ;;  %v4833_v21 = vadd.f32 %v6984_v9, %v4283_v16  ;;  %v4281_v46 = vadd.f32 %v4158_v27, %v10225_v34  ;;  %v6985_v1 = vpop.f32.mrf.mxu0  ;;  %v10229_v20 = vld [vmem:[#allocation31_spill] sm:$0xff] }
 0x2e6   :  { %v6919_v26 = vpop.f32.mrf.mxu1  ;;  %v5242_v61 = vmul.f32 %v9706_v39, %v5218_v50  ;;  %v5089_v11 = vld [vmem:[#allocation2 + $0x130] ss:$2 sm:$0xff]  ;;  %v5153_v18 = vld [vmem:[#allocation2 + $0x131] ss:$2 sm:$0xff] }
 0x2e7   :  { %5030 = vst.msk [vmem:[#allocation2 + $0x158] sm:$0xff] %vm4986_vm3, %v4965_v23  ;;  %v4963_v30 = vmax.f32 %v4899_v13, 0.0  ;;  %v4904_v51 = vadd.f32 %v9669_v4, %v4833_v21  ;;  %v4831_v25 = vadd.f32 %v4708_v45, %v4281_v46  ;;  %v4284_v57 = vadd.f32 %v6919_v26, %v10226_v19  ;;  %v4711_v33 = vpop.f32.mrf.mxu0  ;;  %v10230_v21 = vld [vmem:[#allocation32_spill] sm:$0xff] }
 0x2e8   :  { %v4161_v41 = vpop.f32.mrf.mxu1  ;;  %v5274_v28 = vsel %vm4986_vm3, %v5242_v61, 0.0  ;;  %v5087_v62 = vld [vmem:[#allocation2 + $0x120] ss:$2 sm:$0xff]  ;;  %v5151_v8 = vld [vmem:[#allocation2 + $0x121] ss:$2 sm:$0xff]  ;;  %v5197_v44 = vmax.f32 %v5089_v11, %v5153_v18  ;;  %v10231_v18 = vld [vmem:[#allocation34_spill] sm:$0xff] }
 0x2e9   :  { %5028 = vst.msk [vmem:[#allocation2 + $0x148] sm:$0xff] %vm4986_vm3, %v4963_v30  ;;  %v4968_v15 = vmax.f32 %v4904_v51, 0.0  ;;  %v4902_v39 = vadd.f32 %v9669_v4, %v4831_v25  ;;  %v4834_v55 = vadd.f32 %v6985_v1, %v4284_v57  ;;  %v4282_v12 = vadd.f32 %v4161_v41, %v10227_v3  ;;  %5275 = vadd.xlane.f32.xlu0 %v5274_v28  ;;  %v6988_v14 = vpop.f32.mrf.mxu0 }
 0x2ea   :  { %v6922_v48 = vpop.f32.mrf.mxu1  ;;  %v5196_v5 = vmax.f32 %v5087_v62, %v5151_v8 }
 0x2eb   :  { %5033 = vst.msk [vmem:[#allocation2 + $0x170] sm:$0xff] %vm4986_vm3, %v4968_v15  ;;  %v4966_v49 = vmax.f32 %v4902_v39, 0.0  ;;  %v4905_v52 = vadd.f32 %v9669_v4, %v4834_v55  ;;  %v4832_v58 = vadd.f32 %v4711_v33, %v4282_v12  ;;  %v4287_v43 = vadd.f32 %v6922_v48, %v10228_v10  ;;  %v4724_v9 = vpop.f32.mrf.mxu0 }
 0x2ec   :  { %v4174_v24 = vpop.f32.mrf.mxu1  ;;  %v5219_v47 = vmax.f32 %v5196_v5, %v5197_v44 }
 0x2ed   :  { %5031 = vst.msk [vmem:[#allocation2 + $0x160] sm:$0xff] %vm4986_vm3, %v4966_v49  ;;  %v4969_v2 = vmax.f32 %v4905_v52, 0.0  ;;  %v4903_v0 = vadd.f32 %v9669_v4, %v4832_v58  ;;  %v4837_v29 = vadd.f32 %v6988_v14, %v4287_v43  ;;  %v4285_v32 = vadd.f32 %v4174_v24, %v10229_v20  ;;  %v6989_v27 = vpop.f32.mrf.mxu0 }
 0x2ee   :  { %v6923_v16 = vpop.f32.mrf.mxu1  ;;  %v5243_v45 = vmul.f32 %v9725_v36, %v5219_v47  ;;  %v5093_v46 = vld [vmem:[#allocation2 + $0x150] ss:$2 sm:$0xff]  ;;  %v5157_v26 = vld [vmem:[#allocation2 + $0x151] ss:$2 sm:$0xff]  ;;  %v10_v36 = vstv %s9949_s4 }
 0x2ef   :  { %5034 = vst.msk [vmem:[#allocation2 + $0x178] sm:$0xff] %vm4986_vm3, %v4969_v2  ;;  %v4967_v50 = vmax.f32 %v4903_v0, 0.0  ;;  %v4908_v23 = vadd.f32 %v9669_v4, %v4837_v29  ;;  %v4835_v13 = vadd.f32 %v4724_v9, %v4285_v32  ;;  %v4288_v34 = vadd.f32 %v6923_v16, %v10230_v21  ;;  %v4727_v61 = vpop.f32.mrf.mxu0  ;;  %11 = vst [vmem:[#allocation3] sm:$0x1] %v10_v36 }
 0x2f0   :  { %v4177_v1 = vpop.f32.mrf.mxu1  ;;  %v5277_v30 = vsel %vm4986_vm3, %v5243_v45, 0.0  ;;  %v5091_v51 = vld [vmem:[#allocation2 + $0x140] ss:$2 sm:$0xff]  ;;  %v5155_v25 = vld [vmem:[#allocation2 + $0x141] ss:$2 sm:$0xff]  ;;  %v5199_v8 = vmax.f32 %v5093_v46, %v5157_v26 }
 0x2f1   :  { %5032 = vst.msk [vmem:[#allocation2 + $0x168] sm:$0xff] %vm4986_vm3, %v4967_v50  ;;  %v4972_v19 = vmax.f32 %v4908_v23, 0.0  ;;  %v4906_v57 = vadd.f32 %v9669_v4, %v4835_v13  ;;  %v4838_v11 = vadd.f32 %v6989_v27, %v4288_v34  ;;  %v4286_v41 = vadd.f32 %v4177_v1, %v10231_v18  ;;  %5278 = vadd.xlane.f32.xlu0 %v5277_v30  ;;  %v6992_v28 = vpop.f32.mrf.mxu0  ;;  %v9901_v46 = vld [vmem:[%s9947_s2] ss:$0 sm:$0xff] }
 0x2f2   :  { %v6926_v33 = vpop.f32.mrf.mxu1  ;;  %v5198_v62 = vmax.f32 %v5091_v51, %v5155_v25 }
 0x2f3   :  { %5037 = vst.msk [vmem:[#allocation2 + $0x190] sm:$0xff] %vm4986_vm3, %v4972_v19  ;;  %v4970_v15 = vmax.f32 %v4906_v57, 0.0  ;;  %v4909_v39 = vadd.f32 %v9669_v4, %v4838_v11  ;;  %v4836_v55 = vadd.f32 %v4727_v61, %v4286_v41  ;;  %v4291_v3 = vadd.f32 %v6926_v33, %v9630_v7  ;;  %v4740_v48 = vpop.f32.mrf.mxu0 }
 0x2f4   :  { %v4190_v12 = vpop.f32.mrf.mxu1  ;;  %v5220_v14 = vmax.f32 %v5198_v62, %v5199_v8 }
 0x2f5   :  { %5035 = vst.msk [vmem:[#allocation2 + $0x180] sm:$0xff] %vm4986_vm3, %v4970_v15  ;;  %v4973_v5 = vmax.f32 %v4909_v39, 0.0  ;;  %v4907_v44 = vadd.f32 %v9669_v4, %v4836_v55  ;;  %v4841_v49 = vadd.f32 %v6992_v28, %v4291_v3  ;;  %v4289_v52 = vadd.f32 %v4190_v12, %v9633_v35  ;;  %v6993_v10 = vpop.f32.mrf.mxu0 }
 0x2f6   :  { %v6927_v58 = vpop.f32.mrf.mxu1  ;;  %v5244_v43 = vmul.f32 %v9744_v63, %v5220_v14  ;;  %v5097_v2 = vld [vmem:[#allocation2 + $0x170] ss:$2 sm:$0xff]  ;;  %v5161_v0 = vld [vmem:[#allocation2 + $0x171] ss:$2 sm:$0xff] }
 0x2f7   :  { %5038 = vst.msk [vmem:[#allocation2 + $0x198] sm:$0xff] %vm4986_vm3, %v4973_v5  ;;  %v4971_v24 = vmax.f32 %v4907_v44, 0.0  ;;  %v4912_v7 = vadd.f32 %v9669_v4, %v4841_v49  ;;  %v4839_v9 = vadd.f32 %v4740_v48, %v4289_v52  ;;  %v4292_v47 = vadd.f32 %v6927_v58, %v9636_v59  ;;  %v4743_v20 = vpop.f32.mrf.mxu0 }
 0x2f8   :  { %v4193_v29 = vpop.f32.mrf.mxu1  ;;  %v5280_v32 = vsel %vm4986_vm3, %v5244_v43, 0.0  ;;  %v5095_v16 = vld [vmem:[#allocation2 + $0x160] ss:$2 sm:$0xff]  ;;  %v5159_v35 = vld [vmem:[#allocation2 + $0x161] ss:$2 sm:$0xff]  ;;  %v5201_v21 = vmax.f32 %v5097_v2, %v5161_v0 }
 0x2f9   :  { %5036 = vst.msk [vmem:[#allocation2 + $0x188] sm:$0xff] %vm4986_vm3, %v4971_v24  ;;  %v4976_v27 = vmax.f32 %v4912_v7, 0.0  ;;  %v4910_v63 = vadd.f32 %v9669_v4, %v4839_v9  ;;  %v4842_v45 = vadd.f32 %v6993_v10, %v4292_v47  ;;  %v4290_v50 = vadd.f32 %v4193_v29, %v9639_v38  ;;  %5281 = vadd.xlane.f32.xlu0 %v5280_v32  ;;  %v6996_v13 = vpop.f32.mrf.mxu0 }
 0x2fa   :  { %v6930_v23 = vpop.f32.mrf.mxu1  ;;  %v5200_v59 = vmax.f32 %v5095_v16, %v5159_v35 }
 0x2fb   :  { %5041 = vst.msk [vmem:[#allocation2 + $0x1b0] sm:$0xff] %vm4986_vm3, %v4976_v27  ;;  %v4974_v34 = vmax.f32 %v4910_v63, 0.0  ;;  %v4913_v26 = vadd.f32 %v9901_v46, %v4842_v45  ;;  %v4840_v1 = vadd.f32 %v4743_v20, %v4290_v50  ;;  %v4295_v4 = vadd.f32 %v6930_v23, %v9642_v6  ;;  %v4756_v38 = vpop.f32.mrf.mxu0  ;;  %v10232_v27 = vld [vmem:[#allocation36_spill] sm:$0xff] }
 0x2fc   :  { %v4206_v61 = vpop.f32.mrf.mxu1  ;;  %v5221_v30 = vmax.f32 %v5200_v59, %v5201_v21 }
 0x2fd   :  { %5039 = vst.msk [vmem:[#allocation2 + $0x1a0] sm:$0xff] %vm4986_vm3, %v4974_v34  ;;  %v4977_v51 = vmax.f32 %v4913_v26, 0.0  ;;  %v4911_v25 = vadd.f32 %v9901_v46, %v4840_v1  ;;  %v4845_v36 = vadd.f32 %v6996_v13, %v4295_v4  ;;  %v4293_v19 = vadd.f32 %v4206_v61, %v9645_v31  ;;  %v6997_v11 = vpop.f32.mrf.mxu0  ;;  %v10233_v26 = vld [vmem:[#allocation35_spill] sm:$0xff] }
 0x2fe   :  { %v6931_v57 = vpop.f32.mrf.mxu1  ;;  %v5245_v18 = vmul.f32 %v9763_v17, %v5221_v30  ;;  %v5101_v62 = vld [vmem:[#allocation2 + $0x190] ss:$2 sm:$0xff]  ;;  %v5165_v8 = vld [vmem:[#allocation2 + $0x191] ss:$2 sm:$0xff] }
 0x2ff   :  { %5042 = vst.msk [vmem:[#allocation2 + $0x1b8] sm:$0xff] %vm4986_vm3, %v4977_v51  ;;  %v4975_v41 = vmax.f32 %v4911_v25, 0.0  ;;  %v4916_v6 = vadd.f32 %v9901_v46, %v4845_v36  ;;  %v4843_v33 = vadd.f32 %v4756_v38, %v4293_v19  ;;  %v4296_v28 = vadd.f32 %v6931_v57, %v9648_v53  ;;  %v4759_v39 = vpop.f32.mrf.mxu0 }
 0x300   :  { %v4209_v15 = vpop.f32.mrf.mxu1  ;;  %v5283_v55 = vsel %vm4986_vm3, %v5245_v18, 0.0  ;;  %v5099_v3 = vld [vmem:[#allocation2 + $0x180] ss:$2 sm:$0xff]  ;;  %v5163_v31 = vld [vmem:[#allocation2 + $0x181] ss:$2 sm:$0xff]  ;;  %v5203_v49 = vmax.f32 %v5101_v62, %v5165_v8 }
 0x301   :  { %5040 = vst.msk [vmem:[#allocation2 + $0x1a8] sm:$0xff] %vm4986_vm3, %v4975_v41  ;;  %v4980_v12 = vmax.f32 %v4916_v6, 0.0  ;;  %v4914_v17 = vadd.f32 %v9901_v46, %v4843_v33  ;;  %v4846_v48 = vadd.f32 %v6997_v11, %v4296_v28  ;;  %v4294_v14 = vadd.f32 %v4209_v15, %v9651_v60  ;;  %5284 = vadd.xlane.f32.xlu0 %v5283_v55  ;;  %v7000_v44 = vpop.f32.mrf.mxu0 }
 0x302   :  { %v6934_v5 = vpop.f32.mrf.mxu1  ;;  %v5202_v53 = vmax.f32 %v5099_v3, %v5163_v31 }
 0x303   :  { %5045 = vst.msk [vmem:[#allocation2 + $0x1d0] sm:$0xff] %vm4986_vm3, %v4980_v12  ;;  %v4978_v52 = vmax.f32 %v4914_v17, 0.0  ;;  %v4917_v58 = vadd.f32 %v9901_v46, %v4846_v48  ;;  %v4844_v10 = vadd.f32 %v4759_v39, %v4294_v14  ;;  %v4299_v43 = vadd.f32 %v6934_v5, %v9654_v22  ;;  %v4772_v7 = vpop.f32.mrf.mxu0 }
 0x304   :  { %v4222_v24 = vpop.f32.mrf.mxu1  ;;  %v5222_v9 = vmax.f32 %v5202_v53, %v5203_v49 }
 0x305   :  { %5043 = vst.msk [vmem:[#allocation2 + $0x1c0] sm:$0xff] %vm4986_vm3, %v4978_v52  ;;  %v4981_v47 = vmax.f32 %v4917_v58, 0.0  ;;  %v4915_v60 = vadd.f32 %v9901_v46, %v4844_v10  ;;  %v4849_v2 = vadd.f32 %v7000_v44, %v4299_v43  ;;  %v4297_v0 = vadd.f32 %v4222_v24, %v9657_v42  ;;  %v7001_v20 = vpop.f32.mrf.mxu0 }
 0x306   :  { %v6935_v29 = vpop.f32.mrf.mxu1  ;;  %v5246_v32 = vmul.f32 %v9782_v40, %v5222_v9  ;;  %v5105_v45 = vld [vmem:[#allocation2 + $0x1b0] ss:$2 sm:$0xff]  ;;  %v5169_v50 = vld [vmem:[#allocation2 + $0x1b1] ss:$2 sm:$0xff] }
 0x307   :  { %5046 = vst.msk [vmem:[#allocation2 + $0x1d8] sm:$0xff] %vm4986_vm3, %v4981_v47  ;;  %v4979_v16 = vmax.f32 %v4915_v60, 0.0  ;;  %v4920_v22 = vadd.f32 %v9901_v46, %v4849_v2  ;;  %v4847_v35 = vadd.f32 %v4772_v7, %v4297_v0  ;;  %v4300_v63 = vadd.f32 %v6935_v29, %v10232_v27  ;;  %v4775_v4 = vpop.f32.mrf.mxu0 }
 0x308   :  { %v4225_v23 = vpop.f32.mrf.mxu1  ;;  %v5286_v13 = vsel %vm4986_vm3, %v5246_v32, 0.0  ;;  %v5103_v59 = vld [vmem:[#allocation2 + $0x1a0] ss:$2 sm:$0xff]  ;;  %v5167_v21 = vld [vmem:[#allocation2 + $0x1a1] ss:$2 sm:$0xff]  ;;  %v5205_v38 = vmax.f32 %v5105_v45, %v5169_v50 }
 0x309   :  { %5044 = vst.msk [vmem:[#allocation2 + $0x1c8] sm:$0xff] %vm4986_vm3, %v4979_v16  ;;  %v4984_v42 = vmax.f32 %v4920_v22, 0.0  ;;  %v4918_v40 = vadd.f32 %v9901_v46, %v4847_v35  ;;  %v4850_v34 = vadd.f32 %v7001_v20, %v4300_v63  ;;  %v4298_v1 = vadd.f32 %v4225_v23, %v10233_v26  ;;  %5287 = vadd.xlane.f32.xlu0 %v5286_v13 }
 0x30a   :  { %v5204_v61 = vmax.f32 %v5103_v59, %v5167_v21 }
 0x30b   :  { %5049 = vst.msk [vmem:[#allocation2 + $0x1f0] sm:$0xff] %vm4986_vm3, %v4984_v42  ;;  %v4982_v30 = vmax.f32 %v4918_v40, 0.0  ;;  %v4921_v51 = vadd.f32 %v9901_v46, %v4850_v34  ;;  %v4848_v25 = vadd.f32 %v4775_v4, %v4298_v1 }
 0x30c   :  { %v5223_v36 = vmax.f32 %v5204_v61, %v5205_v38 }
 0x30d   :  { %5047 = vst.msk [vmem:[#allocation2 + $0x1e0] sm:$0xff] %vm4986_vm3, %v4982_v30  ;;  %v4985_v19 = vmax.f32 %v4921_v51, 0.0  ;;  %v4919_v57 = vadd.f32 %v9901_v46, %v4848_v25 }
 0x30e   :  { %v5247_v11 = vmul.f32 %v9801_v56, %v5223_v36  ;;  %v5109_v18 = vld [vmem:[#allocation2 + $0x1d0] ss:$2 sm:$0xff]  ;;  %v5173_v41 = vld [vmem:[#allocation2 + $0x1d1] ss:$2 sm:$0xff] }
 0x30f   :  { %5050 = vst.msk [vmem:[#allocation2 + $0x1f8] sm:$0xff] %vm4986_vm3, %v4985_v19  ;;  %v4983_v6 = vmax.f32 %v4919_v57, 0.0  ;;  %v5207_v15 = vmax.f32 %v5109_v18, %v5173_v41 }
 0x310   :  { %v5289_v33 = vsel %vm4986_vm3, %v5247_v11, 0.0  ;;  %v5107_v28 = vld [vmem:[#allocation2 + $0x1c0] ss:$2 sm:$0xff]  ;;  %v5171_v62 = vld [vmem:[#allocation2 + $0x1c1] ss:$2 sm:$0xff] }
 0x311   :  { %5048 = vst.msk [vmem:[#allocation2 + $0x1e8] sm:$0xff] %vm4986_vm3, %v4983_v6  ;;  %5290 = vadd.xlane.f32.xlu0 %v5289_v33  ;;  %v5206_v8 = vmax.f32 %v5107_v28, %v5171_v62 }
 0x313   :  { %v5224_v39 = vmax.f32 %v5206_v8, %v5207_v15 }
 0x315   :  { %v5248_v55 = vmul.f32 %v9820_v37, %v5224_v39 }
 0x316   :  { %v5113_v46 = vld [vmem:[#allocation2 + $0x1f0] ss:$2 sm:$0xff]  ;;  %v5177_v3 = vld [vmem:[#allocation2 + $0x1f1] ss:$2 sm:$0xff] }
 0x317   :  { %v5292_v56 = vsel %vm4986_vm3, %v5248_v55, 0.0  ;;  %v5209_v48 = vmax.f32 %v5113_v46, %v5177_v3 }
 0x318   :  { %5293 = vadd.xlane.f32.xlu0 %v5292_v56  ;;  %v5111_v31 = vld [vmem:[#allocation2 + $0x1e0] ss:$2 sm:$0xff]  ;;  %v5175_v12 = vld [vmem:[#allocation2 + $0x1e1] ss:$2 sm:$0xff] }
 0x319   :  { %v5208_v17 = vmax.f32 %v5111_v31, %v5175_v12 }
 0x31b   :  { %v5225_v14 = vmax.f32 %v5208_v17, %v5209_v48 }
 0x31d   :  { %v5249_v5 = vmul.f32 %v9839_v54, %v5225_v14 }
 0x31f   :  { %v5295_v44 = vsel %vm4986_vm3, %v5249_v5, 0.0 }
 0x320   :  { %5296 = vadd.xlane.f32.xlu0 %v5295_v44 }
 0x332   :  { %v5252_v53 = vpop.xlane.xlu1 %5251 }
 0x333   :  { %v5298_v47 = vrot.slane %v5252_v53, 4 }
 0x335   :  { %v5299_v22 = vadd.f32 %v5298_v47, %v5252_v53 }
 0x337   :  { %v5300_v34 = vrot.slane %v5299_v22, 2 }
 0x339   :  { %v5301_v8 = vadd.f32 %v5300_v34, %v5299_v22 }
 0x33a   :  { %v5255_v49 = vpop.xlane.xlu1 %5254 }
 0x33b   :  { %v5304_v7 = vrot.slane %v5255_v49, 4 }
 0x33d   :  { %v5305_v54 = vadd.f32 %v5304_v7, %v5255_v49 }
 0x33f   :  { %v5306_v21 = vrot.slane %v5305_v54, 2 }
 0x341   :  { %v5307_v11 = vadd.f32 %v5306_v21, %v5305_v54 }
 0x342   :  { %v5258_v58 = vpop.xlane.xlu1 %5257 }
 0x343   :  { %v5310_v0 = vrot.slane %v5258_v58, 4  ;;  %v5308_v31 = vrot.slane %v5307_v11, 1 }
 0x345   :  { %v5311_v45 = vadd.f32 %v5310_v0, %v5258_v58  ;;  %v5309_v47 = vadd.f32 %v5308_v31, %v5307_v11 }
 0x347   :  { %v5312_v38 = vrot.slane %v5311_v45, 2 }
 0x349   :  { %v5313_v15 = vadd.f32 %v5312_v38, %v5311_v45 }
 0x34a   :  { %v5261_v10 = vpop.xlane.xlu1 %5260 }
 0x34b   :  { %v5316_v32 = vrot.slane %v5261_v10, 4  ;;  %v5314_v58 = vrot.slane %v5313_v15, 1 }
 0x34d   :  { %v5317_v42 = vadd.f32 %v5316_v32, %v5261_v10  ;;  %v5315_v22 = vadd.f32 %v5314_v58, %v5313_v15 }
 0x34f   :  { %v5318_v18 = vrot.slane %v5317_v42, 2 }
 0x351   :  { %v5319_v12 = vadd.f32 %v5318_v18, %v5317_v42 }
 0x352   :  { %v5264_v24 = vpop.xlane.xlu1 %5263 }
 0x353   :  { %v5322_v50 = vrot.slane %v5264_v24, 4 }
 0x355   :  { %v5323_v30 = vadd.f32 %v5322_v50, %v5264_v24 }
 0x357   :  { %v5324_v39 = vrot.slane %v5323_v30, 2 }
 0x35a   :  { %v5267_v60 = vpop.xlane.xlu1 %5266 }
 0x35b   :  { %v5328_v40 = vrot.slane %v5267_v60, 4 }
 0x35d   :  { %v5329_v41 = vadd.f32 %v5328_v40, %v5267_v60  ;;  %v5320_v60 = vrot.slane %v5319_v12, 1 }
 0x35f   :  { %v5330_v17 = vrot.slane %v5329_v41, 2 }
 0x362   :  { %v5270_v35 = vpop.xlane.xlu1 %5269 }
 0x363   :  { %v5334_v51 = vrot.slane %v5270_v35, 4 }
 0x365   :  { %v5335_v55 = vadd.f32 %v5334_v51, %v5270_v35 }
 0x367   :  { %v5336_v10 = vrot.slane %v5335_v55, 2 }
 0x36a   :  { %v5273_v26 = vpop.xlane.xlu1 %5272 }
 0x36b   :  { %v5340_v6 = vrot.slane %v5273_v26, 4 }
 0x36d   :  { %v5341_v48 = vadd.f32 %v5340_v6, %v5273_v26 }
 0x36f   :  { %v5342_v0 = vrot.slane %v5341_v48, 2 }
 0x371   :  { %v5343_v42 = vadd.f32 %v5342_v0, %v5341_v48 }
 0x372   :  { %v5276_v52 = vpop.xlane.xlu0 %5275 }
 0x373   :  { %v5346_v29 = vrot.slane %v5276_v52, 4  ;;  %v5344_v18 = vrot.slane %v5343_v42, 1 }
 0x375   :  { %v5347_v23 = vadd.f32 %v5346_v29, %v5276_v52  ;;  %v5302_v52 = vrot.slane %v5301_v8, 1 }
 0x377   :  { %v5348_v36 = vrot.slane %v5347_v23, 2 }
 0x379   :  { %v5349_v46 = vadd.f32 %v5348_v36, %v5347_v23 }
 0x37a   :  { %v5279_v37 = vpop.xlane.xlu0 %5278 }
 0x37b   :  { %v5352_v2 = vrot.slane %v5279_v37, 4 }
 0x37d   :  { %v5353_v27 = vadd.f32 %v5352_v2, %v5279_v37  ;;  %v5325_v37 = vadd.f32 %v5324_v39, %v5323_v30  ;;  %v5331_v2 = vadd.f32 %v5330_v17, %v5329_v41 }
 0x37f   :  { %v5354_v1 = vrot.slane %v5353_v27, 2  ;;  %v5326_v35 = vrot.slane %v5325_v37, 1  ;;  %v5332_v21 = vrot.slane %v5331_v2, 1 }
 0x381   :  { %v5355_v33 = vadd.f32 %v5354_v1, %v5353_v27  ;;  %v5337_v27 = vadd.f32 %v5336_v10, %v5335_v55  ;;  %v5327_v38 = vadd.f32 %v5326_v35, %v5325_v37  ;;  %v5333_v11 = vadd.f32 %v5332_v21, %v5331_v2 }
 0x382   :  { %v5282_v43 = vpop.xlane.xlu0 %5281 }
 0x383   :  { %v5358_v20 = vrot.slane %v5282_v43, 4  ;;  %v5356_v5 = vrot.slane %v5355_v33, 1  ;;  %v5338_v30 = vrot.slane %v5337_v27, 1 }
 0x385   :  { %v5359_v13 = vadd.f32 %v5358_v20, %v5282_v43  ;;  %v5350_v43 = vrot.slane %v5349_v46, 1  ;;  %v5357_v29 = vadd.f32 %v5356_v5, %v5355_v33  ;;  %v6110_v5 = vld [vmem:[#allocation3] ss:$0 sm:$0xff] }
 0x387   :  { %v5360_v19 = vrot.slane %v5359_v13, 2 }
 0x389   :  { %v5361_v3 = vadd.f32 %v5360_v19, %v5359_v13 }
 0x38a   :  { %v5285_v9 = vpop.xlane.xlu0 %5284 }
 0x38b   :  { %v5364_v63 = vrot.slane %v5285_v9, 4  ;;  %v5362_v24 = vrot.slane %v5361_v3, 1 }
 0x38d   :  { %v5365_v4 = vadd.f32 %v5364_v63, %v5285_v9  ;;  %v5351_v63 = vadd.f32 %v5350_v43, %v5349_v46  ;;  %v5363_v45 = vadd.f32 %v5362_v24, %v5361_v3  ;;  %v5345_v46 = vadd.f32 %v5344_v18, %v5343_v42 }
 0x38f   :  { %v5366_v28 = vrot.slane %v5365_v4, 2  ;;  %v5401_v34 = vadd.f32 %v5357_v29, %v5351_v63 }
 0x391   :  { %v5367_v44 = vadd.f32 %v5366_v28, %v5365_v4  ;;  %v5402_v51 = vadd.f32 %v5401_v34, %v5363_v45 }
 0x392   :  { %v5288_v16 = vpop.xlane.xlu0 %5287 }
 0x393   :  { %v5370_v59 = vrot.slane %v5288_v16, 4  ;;  %v5368_v20 = vrot.slane %v5367_v44, 1 }
 0x395   :  { %v5371_v57 = vadd.f32 %v5370_v59, %v5288_v16  ;;  %v5303_v16 = vadd.f32 %v5302_v52, %v5301_v8  ;;  %v5321_v59 = vadd.f32 %v5320_v60, %v5319_v12  ;;  %v5369_v26 = vadd.f32 %v5368_v20, %v5367_v44 }
 0x397   :  { %v5372_v56 = vrot.slane %v5371_v57, 2  ;;  %v5394_v13 = vadd.f32 %v5309_v47, %v5303_v16  ;;  %v5403_v41 = vadd.f32 %v5402_v51, %v5369_v26 }
 0x399   :  { %v5373_v7 = vadd.f32 %v5372_v56, %v5371_v57 }
 0x39a   :  { %v5291_v61 = vpop.xlane.xlu0 %5290 }
 0x39b   :  { %v5376_v25 = vrot.slane %v5291_v61, 4  ;;  %v5374_v50 = vrot.slane %v5373_v7, 1 }
 0x39d   :  { %v5377_v62 = vadd.f32 %v5376_v25, %v5291_v61  ;;  %v5395_v61 = vadd.f32 %v5394_v13, %v5315_v22  ;;  %v5375_v25 = vadd.f32 %v5374_v50, %v5373_v7 }
 0x39f   :  { %v5378_v53 = vrot.slane %v5377_v62, 2  ;;  %v5396_v57 = vadd.f32 %v5395_v61, %v5321_v59  ;;  %v5404_v8 = vadd.f32 %v5403_v41, %v5375_v25 }
 0x3a1   :  { %v5294_v14 = vpop.xlane.xlu0 %5293  ;;  %v5379_v54 = vadd.f32 %v5378_v53, %v5377_v62  ;;  %v5397_v28 = vadd.f32 %v5396_v57, %v5327_v38  ;;  %v5339_v62 = vadd.f32 %v5338_v30, %v5337_v27 }
 0x3a2   :  { %v5382_v49 = vrot.slane %v5294_v14, 4 }
 0x3a3   :  { %v5380_v1 = vrot.slane %v5379_v54, 1  ;;  %v5398_v55 = vadd.f32 %v5397_v28, %v5333_v11 }
 0x3a4   :  { %v5383_v9 = vadd.f32 %v5382_v49, %v5294_v14 }
 0x3a5   :  { %v5381_v6 = vadd.f32 %v5380_v1, %v5379_v54  ;;  %v5399_v31 = vadd.f32 %v5398_v55, %v5339_v62 }
 0x3a6   :  { %v5384_v32 = vrot.slane %v5383_v9, 2 }
 0x3a7   :  { %v5405_v3 = vadd.f32 %v5404_v8, %v5381_v6  ;;  %v5400_v48 = vadd.f32 %v5399_v31, %v5345_v46 }
 0x3a8   :  { %v5385_v23 = vadd.f32 %v5384_v32, %v5383_v9 }
 0x3a9   :  { %v5297_v40 = vpop.xlane.xlu0 %5296  ;;  %v5415_v53 = vadd.f32 %v6110_v5, %v5400_v48 }
 0x3aa   :  { %v5388_v4 = vrot.slane %v5297_v40, 4  ;;  %v5386_v36 = vrot.slane %v5385_v23, 1 }
 0x3ac   :  { %v5389_v19 = vadd.f32 %v5388_v4, %v5297_v40  ;;  %v5387_v15 = vadd.f32 %v5386_v36, %v5385_v23 }
 0x3ae   :  { %v5390_v33 = vrot.slane %v5389_v19, 2  ;;  %v5406_v12 = vadd.f32 %v5405_v3, %v5387_v15 }
 0x3b0   :  { %v5391_v39 = vadd.f32 %v5390_v33, %v5389_v19 }
 0x3b2   :  { %v5392_v56 = vrot.slane %v5391_v39, 1 }
 0x3b4   :  { %v5393_v17 = vadd.f32 %v5392_v56, %v5391_v39 }
 0x3b6   :  { %v5407_v14 = vadd.f32 %v5406_v12, %v5393_v17 }
 0x3b8   :  { %v5416_v44 = vadd.f32 %v6110_v5, %v5407_v14 }
 0x3ba   :  { %v5419_v49 = vrot.slane %v5416_v44, 7 }
 0x3bc   :  { %v5421_v52 = vsel %vm5420_vm4, %v5419_v49, %v5415_v53 }
 0x3bd   :  { %5424 = vst.msk [vmem:[%s9950_s5] sm:$0x3] %vm5423_vm5, %v5421_v52 }

</bundles_post_ra>
